<compile_context>
chip_gen: v7x
topology: tpu7x:2x2x1
jax: 0.10.0
libtpu: 0.0.40
codegen_flags: <defaults>
</compile_context>

<pallas_src>
from functools import partial

import jax
import jax.numpy as jnp
from jax.experimental import pallas as pl
from jax.experimental.pallas import tpu as pltpu


def _linear_attention_kernel(x_ref, wqkv_ref, wout_ref, bout_ref, g2s_ref, o_ref,
                             m_sc, l_sc, ctx_sc, *, head, dim_head, scale):
    # x_ref:    (1, C, tm)       spatial tile of one batch element (spatial on lanes)
    # wqkv_ref: (3*hidden, C)    qkv 1x1-conv weight with g1*sqrt(C) folded in
    # wout_ref: (C, hidden)      out 1x1-conv weight
    # bout_ref: (C, 1)           out 1x1-conv bias
    # g2s_ref:  (C, 1)           g2 * sqrt(C) for the final RMSNorm
    # o_ref:    (1, C, tm)
    # m_sc:     (hidden, 1) f32  running max of k        (per head, per feature f)
    # l_sc:     (hidden, 1) f32  running k-softmax denom (per head, per feature f)
    # ctx_sc:   (hidden, F) f32  running context[f, e] = sum_m exp_k[f,m] * v[e,m]
    p = pl.program_id(1)   # 0 = accumulate context/stats, 1 = produce output
    t = pl.program_id(2)   # spatial tile index
    F = dim_head
    hidden = head * dim_head

    x = x_ref[0].astype(jnp.float32)                         # (C, tm)

    # ---- RMSNorm over channels (F.normalize(x, dim=1)); g1*sqrt(C) is in wqkv ----
    ss = jnp.sum(x * x, axis=0, keepdims=True)               # (1, tm) sublane reduce
    xn = x * jax.lax.rsqrt(jnp.maximum(ss, 1e-24))           # == x / max(||x||, 1e-12)
    xn_b = xn.astype(jnp.bfloat16)

    wqkv = wqkv_ref[...].astype(jnp.bfloat16)                # (3*hidden, C)

    @pl.when((p == 0) & (t == 0))
    def _init():
        m_sc[...] = jnp.full_like(m_sc, -jnp.inf)
        l_sc[...] = jnp.zeros_like(l_sc)
        ctx_sc[...] = jnp.zeros_like(ctx_sc)

    # ---------------- phase 0: accumulate k-softmax stats + context ----------------
    @pl.when(p == 0)
    def _accumulate():
        # k,v projections for this spatial tile (all heads in one matmul, K=C).
        kv = jnp.dot(wqkv[hidden:3 * hidden, :], xn_b,
                     preferred_element_type=jnp.float32)     # (2*hidden, tm)
        for h in range(head):                                # static unroll
            k = kv[h * F:(h + 1) * F, :]                     # (F, tm)
            v = kv[hidden + h * F: hidden + (h + 1) * F, :]  # (F, tm)

            m_old = m_sc[h * F:(h + 1) * F, :]               # (F, 1)
            m_new = jnp.maximum(m_old, jnp.max(k, axis=1, keepdims=True))
            alpha = jnp.exp(m_old - m_new)                   # (F, 1) rescale factor
            ek = jnp.exp(k - m_new)                          # (F, tm)

            l_sc[h * F:(h + 1) * F, :] = (
                alpha * l_sc[h * F:(h + 1) * F, :]
                + jnp.sum(ek, axis=1, keepdims=True))

            # ctx[f, e] += sum_m ek[f, m] * v[e, m]   (A . B^T on the MXU)
            # TODO(synk): verify via bundle dump that this transposed-RHS matmul does
            # not emit an M-wide XLU transpose of v (restructure onto the (F,F) context
            # if it does).
            ctx_new = jax.lax.dot_general(
                ek.astype(jnp.bfloat16), v.astype(jnp.bfloat16),
                (((1,), (1,)), ((), ())),
                preferred_element_type=jnp.float32)          # (F, F)
            ctx_sc[h * F:(h + 1) * F, :] = (
                alpha * ctx_sc[h * F:(h + 1) * F, :] + ctx_new)
            m_sc[h * F:(h + 1) * F, :] = m_new

    # ---------------- phase 1: produce the output for this spatial tile ------------
    @pl.when(p == 1)
    def _produce():
        q_all = jnp.dot(wqkv[0:hidden, :], xn_b,
                        preferred_element_type=jnp.float32)  # (hidden, tm)
        la_parts = []
        for h in range(head):                                # static unroll
            q = q_all[h * F:(h + 1) * F, :]                  # (F, tm)
            # softmax over the feature axis (dim=-2), then * dim_head**-0.5
            q = jnp.exp(q - jnp.max(q, axis=0, keepdims=True))
            q = q * (scale * pl.reciprocal(jnp.sum(q, axis=0, keepdims=True),
                                           approx=True))
            # fold the k-softmax denominator into the tiny (F, F) context
            inv_l = pl.reciprocal(l_sc[h * F:(h + 1) * F, :], approx=True)  # (F, 1)
            ctx = ctx_sc[h * F:(h + 1) * F, :] * inv_l        # (F, F): ctx[f, e]
            # la[e, n] = sum_f ctx[f, e] * q[f, n]; transpose only the tiny context.
            la_parts.append(jnp.dot(ctx.T.astype(jnp.bfloat16),
                                    q.astype(jnp.bfloat16),
                                    preferred_element_type=jnp.float32))    # (F, tm)

        la_all = jnp.concatenate(la_parts, axis=0)            # (hidden, tm)

        # Single fused out-projection: K = hidden = 128 fills the MXU contraction.
        y = jnp.dot(wout_ref[...].astype(jnp.bfloat16), la_all.astype(jnp.bfloat16),
                    preferred_element_type=jnp.float32)        # (C, tm)
        y = y + bout_ref[...].astype(jnp.float32)

        # ---- final RMSNorm over channels, g2*sqrt(C) precomputed in the wrapper ----
        ss2 = jnp.sum(y * y, axis=0, keepdims=True)
        out = y * jax.lax.rsqrt(jnp.maximum(ss2, 1e-24)) * g2s_ref[...].astype(jnp.float32)
        o_ref[0] = out.astype(o_ref.dtype)


def linear_attention(x, w_qkv, w_out, b_out, g1, g2, *, head, dim_head,
                     max_spatial_tile=2048):
    """x: (N, C, H, W); w_qkv: (3*hidden, C); w_out: (C, hidden); b_out: (C,);
    g1, g2: (1, C, 1, 1). Returns (N, C, H, W)."""
    N, C, H, W = x.shape
    M = H * W
    hidden = head * dim_head
    scale = float(dim_head) ** -0.5
    sqrt_c = float(C) ** 0.5

    # Free reshape: channel on sublanes, spatial (H*W) on lanes. No transposes.
    x3 = x.reshape(N, C, M)

    # Fold RMSNorm-1's per-channel g1 * sqrt(C) into the qkv conv weight.
    w_qkv_folded = (w_qkv * (g1.reshape(1, C) * sqrt_c)).astype(jnp.float32)
    g2_scaled = (g2.reshape(C, 1) * sqrt_c).astype(jnp.float32)
    b_out2 = b_out.reshape(C, 1).astype(jnp.float32)

    # Spatial tile: largest candidate that divides M (bounded per-step VMEM,
    # many grid steps for pipelining); fall back to the untiled full slab.
    tm = M
    for cand in (4096, 2048, 1024, 512, 256, 128):
        if cand <= max_spatial_tile and M % cand == 0:
            tm = cand
            break
    num_tiles = M // tm

    kernel = partial(_linear_attention_kernel,
                     head=head, dim_head=dim_head, scale=scale)

    # TODO(synk): when H*W is tiny and N is large, process several batch elements per
    # grid step (block (B_blk, C, tm)) to amortize the ~0.35us per-step overhead.
    out3 = pl.pallas_call(
        kernel,
        out_shape=jax.ShapeDtypeStruct((N, C, M), x.dtype),
        grid_spec=pltpu.PrefetchScalarGridSpec(
            num_scalar_prefetch=0,
            grid=(N, 2, num_tiles),   # (batch, phase, spatial tile)
            in_specs=[
                pl.BlockSpec((1, C, tm), lambda n, p, t: (n, 0, t)),
                pl.BlockSpec((3 * hidden, C), lambda n, p, t: (0, 0)),
                pl.BlockSpec((C, hidden), lambda n, p, t: (0, 0)),
                pl.BlockSpec((C, 1), lambda n, p, t: (0, 0)),
                pl.BlockSpec((C, 1), lambda n, p, t: (0, 0)),
            ],
            # Phase 0 pins the output index to tile 0 and never writes it, so the
            # buffer is only flushed to HBM after phase 1 fills it; each output tile
            # is written exactly once.
            out_specs=pl.BlockSpec((1, C, tm), lambda n, p, t: (n, 0, t * p)),
            scratch_shapes=[
                pltpu.VMEM((hidden, 1), jnp.float32),         # running k max
                pltpu.VMEM((hidden, 1), jnp.float32),         # running k-softmax denom
                pltpu.VMEM((hidden, dim_head), jnp.float32),  # running context[f, e]
            ],
        ),
        compiler_params=pltpu.CompilerParams(
            dimension_semantics=("parallel", "arbitrary", "arbitrary"),
        ),
    )(x3, w_qkv_folded, w_out.astype(jnp.float32), b_out2, g2_scaled)

    return out3.reshape(N, C, H, W)


def linear_attention_ref(x, w_qkv, w_out, b_out, g1, g2, *, head, dim_head):
    """Pure-JAX reference mirroring the PyTorch forward exactly."""
    N, C, H, W = x.shape
    M = H * W
    hidden = head * dim_head
    scale = float(dim_head) ** -0.5
    eps = 1e-12
    hp = jax.lax.Precision.HIGHEST

    # RMSNorm(dim) on the input
    norm1 = jnp.sqrt(jnp.sum(x * x, axis=1, keepdims=True))
    xn = x / jnp.maximum(norm1, eps) * g1 * (float(C) ** 0.5)

    # to_qkv 1x1 conv (no bias)
    xn_f = xn.reshape(N, C, M)
    qkv = jnp.einsum('oc,ncm->nom', w_qkv, xn_f, precision=hp)
    q = qkv[:, 0 * hidden:1 * hidden].reshape(N, head, dim_head, M)
    k = qkv[:, 1 * hidden:2 * hidden].reshape(N, head, dim_head, M)
    v = qkv[:, 2 * hidden:3 * hidden].reshape(N, head, dim_head, M)

    q = jax.nn.softmax(q, axis=2) * scale          # softmax over features (dim=-2)
    k = jax.nn.softmax(k, axis=3)                  # softmax over spatial  (dim=-1)

    context = jnp.einsum('nhfm,nhem->nhfe', k, v, precision=hp)
    la = jnp.einsum('nhfe,nhfm->nhem', context, q, precision=hp)
    la = la.reshape(N, hidden, M)

    # to_out: 1x1 conv with bias, then RMSNorm(dim)
    y = jnp.einsum('co,nom->ncm', w_out, la, precision=hp) + b_out.reshape(1, C, 1)
    norm2 = jnp.sqrt(jnp.sum(y * y, axis=1, keepdims=True))
    out = y / jnp.maximum(norm2, eps) * g2.reshape(1, C, 1) * (float(C) ** 0.5)
    return out.reshape(N, C, H, W)


if __name__ == "__main__":
    N, C, H, W = 2, 4, 16, 16
    head, dim_head = 4, 32
    hidden = head * dim_head

    key = jax.random.PRNGKey(0)
    kx, kqkv, kout, kb = jax.random.split(key, 4)
    x = jax.random.normal(kx, (N, C, H, W), dtype=jnp.float32)
    # 1x1 conv weights are plain channel matrices.
    w_qkv = 0.1 * jax.random.normal(kqkv, (3 * hidden, C), dtype=jnp.float32)
    w_out = 0.1 * jax.random.normal(kout, (C, hidden), dtype=jnp.float32)
    b_out = 0.1 * jax.random.normal(kb, (C,), dtype=jnp.float32)
    g1 = jnp.ones((1, C, 1, 1), dtype=jnp.float32)   # RMSNorm params init to ones
    g2 = jnp.ones((1, C, 1, 1), dtype=jnp.float32)

    out = linear_attention(x, w_qkv, w_out, b_out, g1, g2,
                           head=head, dim_head=dim_head)
    out = jax.block_until_ready(out)

    ref = linear_attention_ref(x, w_qkv, w_out, b_out, g1, g2,
                               head=head, dim_head=dim_head)
    assert out.shape == (N, C, H, W)
    # Tolerance covers bf16 MXU operands + approx EUP reciprocals vs the
    # HIGHEST-precision f32 XLA reference.
    assert jnp.allclose(out, ref, atol=2e-2, rtol=2e-2), (
        f"mismatch vs reference, max abs err = {jnp.max(jnp.abs(out - ref))}")

    print("KERNEL_OK")
</pallas_src>

<mosaic_0001>
module attributes {stable_mosaic.version = 11 : i64} {
  func.func @_linear_attention_kernel(%arg0: i32, %arg1: i32, %arg2: i32, %arg3: memref<1x4x256xf32, #tpu.memory_space<vmem>>, %arg4: memref<384x4xf32, #tpu.memory_space<vmem>>, %arg5: memref<4x128xf32, #tpu.memory_space<vmem>>, %arg6: memref<4x1xf32, #tpu.memory_space<vmem>>, %arg7: memref<4x1xf32, #tpu.memory_space<vmem>>, %arg8: memref<1x4x256xf32, #tpu.memory_space<vmem>>, %arg9: memref<128x1xf32, #tpu.memory_space<vmem>>, %arg10: memref<128x1xf32, #tpu.memory_space<vmem>>, %arg11: memref<128x32xf32, #tpu.memory_space<vmem>>) attributes {dimension_semantics = [#tpu.dimension_semantics<parallel>, #tpu.dimension_semantics<arbitrary>, #tpu.dimension_semantics<arbitrary>], iteration_bounds = array<i64: 2, 2, 1>, scalar_prefetch = 0 : i64, scratch_operands = 3 : i64, tpu.core_type = #tpu.core_type<tc>, window_params = [{transform_indices = @transform_0, window_bounds = array<i64: 1, 4, 256>}, {pipeline_mode = #tpu.pipeline_mode<synchronous>, transform_indices = @transform_1, window_bounds = array<i64: 384, 4>}, {pipeline_mode = #tpu.pipeline_mode<synchronous>, transform_indices = @transform_2, window_bounds = array<i64: 4, 128>}, {pipeline_mode = #tpu.pipeline_mode<synchronous>, transform_indices = @transform_3, window_bounds = array<i64: 4, 1>}, {pipeline_mode = #tpu.pipeline_mode<synchronous>, transform_indices = @transform_4, window_bounds = array<i64: 4, 1>}, {transform_indices = @transform_5, window_bounds = array<i64: 1, 4, 256>}]} {
    %c0 = arith.constant 0 : index
    %c0_0 = arith.constant 0 : index
    %c0_1 = arith.constant 0 : index
    %0 = vector.load %arg3[%c0, %c0_0, %c0_1] : memref<1x4x256xf32, #tpu.memory_space<vmem>>, vector<1x4x256xf32>
    %1 = vector.shape_cast %0 : vector<1x4x256xf32> to vector<4x256xf32>
    %2 = arith.mulf %1, %1 : vector<4x256xf32>
    %cst = arith.constant dense<0.000000e+00> : vector<256xf32>
    %3 = vector.multi_reduction <add>, %2, %cst [0] : vector<4x256xf32> to vector<256xf32>
    %4 = vector.shape_cast %3 : vector<256xf32> to vector<1x256xf32>
    %cst_2 = arith.constant 1.000000e-24 : f32
    %5 = vector.broadcast %cst_2 : f32 to vector<1x256xf32>
    %6 = arith.maximumf %4, %5 : vector<1x256xf32>
    %7 = math.rsqrt %6 : vector<1x256xf32>
    %8 = vector.broadcast %7 : vector<1x256xf32> to vector<4x256xf32>
    %9 = arith.mulf %1, %8 : vector<4x256xf32>
    %10 = arith.truncf %9 : vector<4x256xf32> to vector<4x256xbf16>
    %c0_3 = arith.constant 0 : index
    %c0_4 = arith.constant 0 : index
    %11 = vector.load %arg4[%c0_3, %c0_4] : memref<384x4xf32, #tpu.memory_space<vmem>>, vector<384x4xf32>
    %12 = arith.truncf %11 : vector<384x4xf32> to vector<384x4xbf16>
    %c0_i32 = arith.constant 0 : i32
    %13 = arith.cmpi eq, %arg1, %c0_i32 : i32
    %c0_i32_5 = arith.constant 0 : i32
    %14 = arith.cmpi eq, %arg2, %c0_i32_5 : i32
    %15 = arith.andi %13, %14 : i1
    %16 = arith.extui %15 : i1 to i32
    %c0_i32_6 = arith.constant 0 : i32
    %17 = arith.cmpi ne, %16, %c0_i32_6 : i32
    scf.if %17 {
      %cst_10 = arith.constant 0xFF800000 : f32
      %24 = vector.broadcast %cst_10 : f32 to vector<128x1xf32>
      %c0_11 = arith.constant 0 : index
      %c0_12 = arith.constant 0 : index
      %25 = vector.load %arg9[%c0_11, %c0_12] : memref<128x1xf32, #tpu.memory_space<vmem>>, vector<128x1xf32>
      tpu.vector_store %arg9[%c0_11, %c0_12], %24 {strides = array<i32>} : memref<128x1xf32, #tpu.memory_space<vmem>>, vector<128x1xf32>,
      %cst_13 = arith.constant 0.000000e+00 : f32
      %26 = vector.broadcast %cst_13 : f32 to vector<128x1xf32>
      %c0_14 = arith.constant 0 : index
      %c0_15 = arith.constant 0 : index
      %27 = vector.load %arg10[%c0_14, %c0_15] : memref<128x1xf32, #tpu.memory_space<vmem>>, vector<128x1xf32>
      tpu.vector_store %arg10[%c0_14, %c0_15], %26 {strides = array<i32>} : memref<128x1xf32, #tpu.memory_space<vmem>>, vector<128x1xf32>,
      %cst_16 = arith.constant 0.000000e+00 : f32
      %28 = vector.broadcast %cst_16 : f32 to vector<128x32xf32>
      %c0_17 = arith.constant 0 : index
      %c0_18 = arith.constant 0 : index
      %29 = vector.load %arg11[%c0_17, %c0_18] : memref<128x32xf32, #tpu.memory_space<vmem>>, vector<128x32xf32>
      tpu.vector_store %arg11[%c0_17, %c0_18], %28 {strides = array<i32>} : memref<128x32xf32, #tpu.memory_space<vmem>>, vector<128x32xf32>,
    } else {
    }
    %c0_i32_7 = arith.constant 0 : i32
    %18 = arith.cmpi eq, %arg1, %c0_i32_7 : i32
    %19 = arith.extui %18 : i1 to i32
    %c0_i32_8 = arith.constant 0 : i32
    %20 = arith.cmpi ne, %19, %c0_i32_8 : i32
    scf.if %20 {
      %24 = vector.extract_strided_slice %12 {offsets = [128, 0], sizes = [256, 4], strides = [1, 1]} : vector<384x4xbf16> to vector<256x4xbf16>
      %cst_10 = arith.constant dense<0.000000e+00> : vector<256x256xf32>
      %25 = tpu.matmul %24, %10, %cst_10 {dimension_numbers = #tpu.dot_dimension_numbers<[1], [0], [0], [1], [0, 0, 1, 1], [], []>} : vector<256x4xbf16>, vector<4x256xbf16>, vector<256x256xf32> -> vector<256x256xf32>
      %26 = vector.extract_strided_slice %25 {offsets = [0, 0], sizes = [32, 256], strides = [1, 1]} : vector<256x256xf32> to vector<32x256xf32>
      %27 = vector.extract_strided_slice %25 {offsets = [128, 0], sizes = [32, 256], strides = [1, 1]} : vector<256x256xf32> to vector<32x256xf32>
      %c0_11 = arith.constant 0 : index
      %c0_12 = arith.constant 0 : index
      %28 = vector.load %arg9[%c0_11, %c0_12] : memref<128x1xf32, #tpu.memory_space<vmem>>, vector<32x1xf32>
      %cst_13 = arith.constant dense<0xFF800000> : vector<32xf32>
      %29 = vector.multi_reduction <maximumf>, %26, %cst_13 [1] : vector<32x256xf32> to vector<32xf32>
      %30 = vector.shape_cast %29 : vector<32xf32> to vector<32x1xf32>
      %31 = arith.maximumf %28, %30 : vector<32x1xf32>
      %32 = arith.subf %28, %31 : vector<32x1xf32>
      %33 = math.exp %32 : vector<32x1xf32>
      %34 = vector.broadcast %31 : vector<32x1xf32> to vector<32x256xf32>
      %35 = arith.subf %26, %34 : vector<32x256xf32>
      %36 = math.exp %35 : vector<32x256xf32>
      %c0_14 = arith.constant 0 : index
      %c0_15 = arith.constant 0 : index
      %37 = vector.load %arg10[%c0_14, %c0_15] : memref<128x1xf32, #tpu.memory_space<vmem>>, vector<32x1xf32>
      %38 = arith.mulf %33, %37 : vector<32x1xf32>
      %cst_16 = arith.constant dense<0.000000e+00> : vector<32xf32>
      %39 = vector.multi_reduction <add>, %36, %cst_16 [1] : vector<32x256xf32> to vector<32xf32>
      %40 = vector.shape_cast %39 : vector<32xf32> to vector<32x1xf32>
      %41 = arith.addf %38, %40 : vector<32x1xf32>
      %c0_17 = arith.constant 0 : index
      %c0_18 = arith.constant 0 : index
      %42 = vector.load %arg10[%c0_17, %c0_18] : memref<128x1xf32, #tpu.memory_space<vmem>>, vector<32x1xf32>
      tpu.vector_store %arg10[%c0_17, %c0_18], %41 {strides = array<i32>} : memref<128x1xf32, #tpu.memory_space<vmem>>, vector<32x1xf32>,
      %43 = arith.truncf %36 : vector<32x256xf32> to vector<32x256xbf16>
      %44 = arith.truncf %27 : vector<32x256xf32> to vector<32x256xbf16>
      %cst_19 = arith.constant dense<0.000000e+00> : vector<32x32xf32>
      %45 = tpu.matmul %43, %44, %cst_19 {dimension_numbers = #tpu.dot_dimension_numbers<[1], [1], [0], [0], [0, 0, 1, 0], [], []>} : vector<32x256xbf16>, vector<32x256xbf16>, vector<32x32xf32> -> vector<32x32xf32>
      %c0_20 = arith.constant 0 : index
      %c0_21 = arith.constant 0 : index
      %46 = vector.load %arg11[%c0_20, %c0_21] : memref<128x32xf32, #tpu.memory_space<vmem>>, vector<32x32xf32>
      %47 = vector.broadcast %33 : vector<32x1xf32> to vector<32x32xf32>
      %48 = arith.mulf %47, %46 : vector<32x32xf32>
      %49 = arith.addf %48, %45 : vector<32x32xf32>
      %c0_22 = arith.constant 0 : index
      %c0_23 = arith.constant 0 : index
      %50 = vector.load %arg11[%c0_22, %c0_23] : memref<128x32xf32, #tpu.memory_space<vmem>>, vector<32x32xf32>
      tpu.vector_store %arg11[%c0_22, %c0_23], %49 {strides = array<i32>} : memref<128x32xf32, #tpu.memory_space<vmem>>, vector<32x32xf32>,
      %c0_24 = arith.constant 0 : index
      %c0_25 = arith.constant 0 : index
      %51 = vector.load %arg9[%c0_24, %c0_25] : memref<128x1xf32, #tpu.memory_space<vmem>>, vector<32x1xf32>
      tpu.vector_store %arg9[%c0_24, %c0_25], %31 {strides = array<i32>} : memref<128x1xf32, #tpu.memory_space<vmem>>, vector<32x1xf32>,
      %52 = vector.extract_strided_slice %25 {offsets = [32, 0], sizes = [32, 256], strides = [1, 1]} : vector<256x256xf32> to vector<32x256xf32>
      %53 = vector.extract_strided_slice %25 {offsets = [160, 0], sizes = [32, 256], strides = [1, 1]} : vector<256x256xf32> to vector<32x256xf32>
      %c32 = arith.constant 32 : index
      %c0_26 = arith.constant 0 : index
      %54 = vector.load %arg9[%c32, %c0_26] : memref<128x1xf32, #tpu.memory_space<vmem>>, vector<32x1xf32>
      %cst_27 = arith.constant dense<0xFF800000> : vector<32xf32>
      %55 = vector.multi_reduction <maximumf>, %52, %cst_27 [1] : vector<32x256xf32> to vector<32xf32>
      %56 = vector.shape_cast %55 : vector<32xf32> to vector<32x1xf32>
      %57 = arith.maximumf %54, %56 : vector<32x1xf32>
      %58 = arith.subf %54, %57 : vector<32x1xf32>
      %59 = math.exp %58 : vector<32x1xf32>
      %60 = vector.broadcast %57 : vector<32x1xf32> to vector<32x256xf32>
      %61 = arith.subf %52, %60 : vector<32x256xf32>
      %62 = math.exp %61 : vector<32x256xf32>
      %c32_28 = arith.constant 32 : index
      %c0_29 = arith.constant 0 : index
      %63 = vector.load %arg10[%c32_28, %c0_29] : memref<128x1xf32, #tpu.memory_space<vmem>>, vector<32x1xf32>
      %64 = arith.mulf %59, %63 : vector<32x1xf32>
      %cst_30 = arith.constant dense<0.000000e+00> : vector<32xf32>
      %65 = vector.multi_reduction <add>, %62, %cst_30 [1] : vector<32x256xf32> to vector<32xf32>
      %66 = vector.shape_cast %65 : vector<32xf32> to vector<32x1xf32>
      %67 = arith.addf %64, %66 : vector<32x1xf32>
      %c32_31 = arith.constant 32 : index
      %c0_32 = arith.constant 0 : index
      %68 = vector.load %arg10[%c32_31, %c0_32] : memref<128x1xf32, #tpu.memory_space<vmem>>, vector<32x1xf32>
      tpu.vector_store %arg10[%c32_31, %c0_32], %67 {strides = array<i32>} : memref<128x1xf32, #tpu.memory_space<vmem>>, vector<32x1xf32>,
      %69 = arith.truncf %62 : vector<32x256xf32> to vector<32x256xbf16>
      %70 = arith.truncf %53 : vector<32x256xf32> to vector<32x256xbf16>
      %cst_33 = arith.constant dense<0.000000e+00> : vector<32x32xf32>
      %71 = tpu.matmul %69, %70, %cst_33 {dimension_numbers = #tpu.dot_dimension_numbers<[1], [1], [0], [0], [0, 0, 1, 0], [], []>} : vector<32x256xbf16>, vector<32x256xbf16>, vector<32x32xf32> -> vector<32x32xf32>
      %c32_34 = arith.constant 32 : index
      %c0_35 = arith.constant 0 : index
      %72 = vector.load %arg11[%c32_34, %c0_35] : memref<128x32xf32, #tpu.memory_space<vmem>>, vector<32x32xf32>
      %73 = vector.broadcast %59 : vector<32x1xf32> to vector<32x32xf32>
      %74 = arith.mulf %73, %72 : vector<32x32xf32>
      %75 = arith.addf %74, %71 : vector<32x32xf32>
      %c32_36 = arith.constant 32 : index
      %c0_37 = arith.constant 0 : index
      %76 = vector.load %arg11[%c32_36, %c0_37] : memref<128x32xf32, #tpu.memory_space<vmem>>, vector<32x32xf32>
      tpu.vector_store %arg11[%c32_36, %c0_37], %75 {strides = array<i32>} : memref<128x32xf32, #tpu.memory_space<vmem>>, vector<32x32xf32>,
      %c32_38 = arith.constant 32 : index
      %c0_39 = arith.constant 0 : index
      %77 = vector.load %arg9[%c32_38, %c0_39] : memref<128x1xf32, #tpu.memory_space<vmem>>, vector<32x1xf32>
      tpu.vector_store %arg9[%c32_38, %c0_39], %57 {strides = array<i32>} : memref<128x1xf32, #tpu.memory_space<vmem>>, vector<32x1xf32>,
      %78 = vector.extract_strided_slice %25 {offsets = [64, 0], sizes = [32, 256], strides = [1, 1]} : vector<256x256xf32> to vector<32x256xf32>
      %79 = vector.extract_strided_slice %25 {offsets = [192, 0], sizes = [32, 256], strides = [1, 1]} : vector<256x256xf32> to vector<32x256xf32>
      %c64 = arith.constant 64 : index
      %c0_40 = arith.constant 0 : index
      %80 = vector.load %arg9[%c64, %c0_40] : memref<128x1xf32, #tpu.memory_space<vmem>>, vector<32x1xf32>
      %cst_41 = arith.constant dense<0xFF800000> : vector<32xf32>
      %81 = vector.multi_reduction <maximumf>, %78, %cst_41 [1] : vector<32x256xf32> to vector<32xf32>
      %82 = vector.shape_cast %81 : vector<32xf32> to vector<32x1xf32>
      %83 = arith.maximumf %80, %82 : vector<32x1xf32>
      %84 = arith.subf %80, %83 : vector<32x1xf32>
      %85 = math.exp %84 : vector<32x1xf32>
      %86 = vector.broadcast %83 : vector<32x1xf32> to vector<32x256xf32>
      %87 = arith.subf %78, %86 : vector<32x256xf32>
      %88 = math.exp %87 : vector<32x256xf32>
      %c64_42 = arith.constant 64 : index
      %c0_43 = arith.constant 0 : index
      %89 = vector.load %arg10[%c64_42, %c0_43] : memref<128x1xf32, #tpu.memory_space<vmem>>, vector<32x1xf32>
      %90 = arith.mulf %85, %89 : vector<32x1xf32>
      %cst_44 = arith.constant dense<0.000000e+00> : vector<32xf32>
      %91 = vector.multi_reduction <add>, %88, %cst_44 [1] : vector<32x256xf32> to vector<32xf32>
      %92 = vector.shape_cast %91 : vector<32xf32> to vector<32x1xf32>
      %93 = arith.addf %90, %92 : vector<32x1xf32>
      %c64_45 = arith.constant 64 : index
      %c0_46 = arith.constant 0 : index
      %94 = vector.load %arg10[%c64_45, %c0_46] : memref<128x1xf32, #tpu.memory_space<vmem>>, vector<32x1xf32>
      tpu.vector_store %arg10[%c64_45, %c0_46], %93 {strides = array<i32>} : memref<128x1xf32, #tpu.memory_space<vmem>>, vector<32x1xf32>,
      %95 = arith.truncf %88 : vector<32x256xf32> to vector<32x256xbf16>
      %96 = arith.truncf %79 : vector<32x256xf32> to vector<32x256xbf16>
      %cst_47 = arith.constant dense<0.000000e+00> : vector<32x32xf32>
      %97 = tpu.matmul %95, %96, %cst_47 {dimension_numbers = #tpu.dot_dimension_numbers<[1], [1], [0], [0], [0, 0, 1, 0], [], []>} : vector<32x256xbf16>, vector<32x256xbf16>, vector<32x32xf32> -> vector<32x32xf32>
      %c64_48 = arith.constant 64 : index
      %c0_49 = arith.constant 0 : index
      %98 = vector.load %arg11[%c64_48, %c0_49] : memref<128x32xf32, #tpu.memory_space<vmem>>, vector<32x32xf32>
      %99 = vector.broadcast %85 : vector<32x1xf32> to vector<32x32xf32>
      %100 = arith.mulf %99, %98 : vector<32x32xf32>
      %101 = arith.addf %100, %97 : vector<32x32xf32>
      %c64_50 = arith.constant 64 : index
      %c0_51 = arith.constant 0 : index
      %102 = vector.load %arg11[%c64_50, %c0_51] : memref<128x32xf32, #tpu.memory_space<vmem>>, vector<32x32xf32>
      tpu.vector_store %arg11[%c64_50, %c0_51], %101 {strides = array<i32>} : memref<128x32xf32, #tpu.memory_space<vmem>>, vector<32x32xf32>,
      %c64_52 = arith.constant 64 : index
      %c0_53 = arith.constant 0 : index
      %103 = vector.load %arg9[%c64_52, %c0_53] : memref<128x1xf32, #tpu.memory_space<vmem>>, vector<32x1xf32>
      tpu.vector_store %arg9[%c64_52, %c0_53], %83 {strides = array<i32>} : memref<128x1xf32, #tpu.memory_space<vmem>>, vector<32x1xf32>,
      %104 = vector.extract_strided_slice %25 {offsets = [96, 0], sizes = [32, 256], strides = [1, 1]} : vector<256x256xf32> to vector<32x256xf32>
      %105 = vector.extract_strided_slice %25 {offsets = [224, 0], sizes = [32, 256], strides = [1, 1]} : vector<256x256xf32> to vector<32x256xf32>
      %c96 = arith.constant 96 : index
      %c0_54 = arith.constant 0 : index
      %106 = vector.load %arg9[%c96, %c0_54] : memref<128x1xf32, #tpu.memory_space<vmem>>, vector<32x1xf32>
      %cst_55 = arith.constant dense<0xFF800000> : vector<32xf32>
      %107 = vector.multi_reduction <maximumf>, %104, %cst_55 [1] : vector<32x256xf32> to vector<32xf32>
      %108 = vector.shape_cast %107 : vector<32xf32> to vector<32x1xf32>
      %109 = arith.maximumf %106, %108 : vector<32x1xf32>
      %110 = arith.subf %106, %109 : vector<32x1xf32>
      %111 = math.exp %110 : vector<32x1xf32>
      %112 = vector.broadcast %109 : vector<32x1xf32> to vector<32x256xf32>
      %113 = arith.subf %104, %112 : vector<32x256xf32>
      %114 = math.exp %113 : vector<32x256xf32>
      %c96_56 = arith.constant 96 : index
      %c0_57 = arith.constant 0 : index
      %115 = vector.load %arg10[%c96_56, %c0_57] : memref<128x1xf32, #tpu.memory_space<vmem>>, vector<32x1xf32>
      %116 = arith.mulf %111, %115 : vector<32x1xf32>
      %cst_58 = arith.constant dense<0.000000e+00> : vector<32xf32>
      %117 = vector.multi_reduction <add>, %114, %cst_58 [1] : vector<32x256xf32> to vector<32xf32>
      %118 = vector.shape_cast %117 : vector<32xf32> to vector<32x1xf32>
      %119 = arith.addf %116, %118 : vector<32x1xf32>
      %c96_59 = arith.constant 96 : index
      %c0_60 = arith.constant 0 : index
      %120 = vector.load %arg10[%c96_59, %c0_60] : memref<128x1xf32, #tpu.memory_space<vmem>>, vector<32x1xf32>
      tpu.vector_store %arg10[%c96_59, %c0_60], %119 {strides = array<i32>} : memref<128x1xf32, #tpu.memory_space<vmem>>, vector<32x1xf32>,
      %121 = arith.truncf %114 : vector<32x256xf32> to vector<32x256xbf16>
      %122 = arith.truncf %105 : vector<32x256xf32> to vector<32x256xbf16>
      %cst_61 = arith.constant dense<0.000000e+00> : vector<32x32xf32>
      %123 = tpu.matmul %121, %122, %cst_61 {dimension_numbers = #tpu.dot_dimension_numbers<[1], [1], [0], [0], [0, 0, 1, 0], [], []>} : vector<32x256xbf16>, vector<32x256xbf16>, vector<32x32xf32> -> vector<32x32xf32>
      %c96_62 = arith.constant 96 : index
      %c0_63 = arith.constant 0 : index
      %124 = vector.load %arg11[%c96_62, %c0_63] : memref<128x32xf32, #tpu.memory_space<vmem>>, vector<32x32xf32>
      %125 = vector.broadcast %111 : vector<32x1xf32> to vector<32x32xf32>
      %126 = arith.mulf %125, %124 : vector<32x32xf32>
      %127 = arith.addf %126, %123 : vector<32x32xf32>
      %c96_64 = arith.constant 96 : index
      %c0_65 = arith.constant 0 : index
      %128 = vector.load %arg11[%c96_64, %c0_65] : memref<128x32xf32, #tpu.memory_space<vmem>>, vector<32x32xf32>
      tpu.vector_store %arg11[%c96_64, %c0_65], %127 {strides = array<i32>} : memref<128x32xf32, #tpu.memory_space<vmem>>, vector<32x32xf32>,
      %c96_66 = arith.constant 96 : index
      %c0_67 = arith.constant 0 : index
      %129 = vector.load %arg9[%c96_66, %c0_67] : memref<128x1xf32, #tpu.memory_space<vmem>>, vector<32x1xf32>
      tpu.vector_store %arg9[%c96_66, %c0_67], %109 {strides = array<i32>} : memref<128x1xf32, #tpu.memory_space<vmem>>, vector<32x1xf32>,
    } else {
    }
    %c1_i32 = arith.constant 1 : i32
    %21 = arith.cmpi eq, %arg1, %c1_i32 : i32
    %22 = arith.extui %21 : i1 to i32
    %c0_i32_9 = arith.constant 0 : i32
    %23 = arith.cmpi ne, %22, %c0_i32_9 : i32
    scf.if %23 {
      %24 = vector.extract_strided_slice %12 {offsets = [0, 0], sizes = [128, 4], strides = [1, 1]} : vector<384x4xbf16> to vector<128x4xbf16>
      %cst_10 = arith.constant dense<0.000000e+00> : vector<128x256xf32>
      %25 = tpu.matmul %24, %10, %cst_10 {dimension_numbers = #tpu.dot_dimension_numbers<[1], [0], [0], [1], [0, 0, 1, 1], [], []>} : vector<128x4xbf16>, vector<4x256xbf16>, vector<128x256xf32> -> vector<128x256xf32>
      %26 = vector.extract_strided_slice %25 {offsets = [0, 0], sizes = [32, 256], strides = [1, 1]} : vector<128x256xf32> to vector<32x256xf32>
      %cst_11 = arith.constant dense<0xFF800000> : vector<256xf32>
      %27 = vector.multi_reduction <maximumf>, %26, %cst_11 [0] : vector<32x256xf32> to vector<256xf32>
      %28 = vector.shape_cast %27 : vector<256xf32> to vector<1x256xf32>
      %29 = vector.broadcast %28 : vector<1x256xf32> to vector<32x256xf32>
      %30 = arith.subf %26, %29 : vector<32x256xf32>
      %31 = math.exp %30 : vector<32x256xf32>
      %cst_12 = arith.constant dense<0.000000e+00> : vector<256xf32>
      %32 = vector.multi_reduction <add>, %31, %cst_12 [0] : vector<32x256xf32> to vector<256xf32>
      %33 = vector.shape_cast %32 : vector<256xf32> to vector<1x256xf32>
      %34 = tpu.reciprocal %33 {approx = true} : vector<1x256xf32> -> vector<1x256xf32>
      %cst_13 = arith.constant 0.176776692 : f32
      %35 = vector.broadcast %cst_13 : f32 to vector<1x256xf32>
      %36 = arith.mulf %35, %34 : vector<1x256xf32>
      %37 = vector.broadcast %36 : vector<1x256xf32> to vector<32x256xf32>
      %38 = arith.mulf %31, %37 : vector<32x256xf32>
      %c0_14 = arith.constant 0 : index
      %c0_15 = arith.constant 0 : index
      %39 = vector.load %arg10[%c0_14, %c0_15] : memref<128x1xf32, #tpu.memory_space<vmem>>, vector<32x1xf32>
      %40 = tpu.reciprocal %39 {approx = true} : vector<32x1xf32> -> vector<32x1xf32>
      %c0_16 = arith.constant 0 : index
      %c0_17 = arith.constant 0 : index
      %41 = vector.load %arg11[%c0_16, %c0_17] : memref<128x32xf32, #tpu.memory_space<vmem>>, vector<32x32xf32>
      %42 = vector.broadcast %40 : vector<32x1xf32> to vector<32x32xf32>
      %43 = arith.mulf %41, %42 : vector<32x32xf32>
      %44 = tpu.transpose %43, [1, 0] : vector<32x32xf32> -> vector<32x32xf32>
      %45 = arith.truncf %44 : vector<32x32xf32> to vector<32x32xbf16>
      %46 = arith.truncf %38 : vector<32x256xf32> to vector<32x256xbf16>
      %cst_18 = arith.constant dense<0.000000e+00> : vector<32x256xf32>
      %47 = tpu.matmul %45, %46, %cst_18 {dimension_numbers = #tpu.dot_dimension_numbers<[1], [0], [0], [1], [0, 0, 1, 1], [], []>} : vector<32x32xbf16>, vector<32x256xbf16>, vector<32x256xf32> -> vector<32x256xf32>
      %48 = vector.extract_strided_slice %25 {offsets = [32, 0], sizes = [32, 256], strides = [1, 1]} : vector<128x256xf32> to vector<32x256xf32>
      %cst_19 = arith.constant dense<0xFF800000> : vector<256xf32>
      %49 = vector.multi_reduction <maximumf>, %48, %cst_19 [0] : vector<32x256xf32> to vector<256xf32>
      %50 = vector.shape_cast %49 : vector<256xf32> to vector<1x256xf32>
      %51 = vector.broadcast %50 : vector<1x256xf32> to vector<32x256xf32>
      %52 = arith.subf %48, %51 : vector<32x256xf32>
      %53 = math.exp %52 : vector<32x256xf32>
      %cst_20 = arith.constant dense<0.000000e+00> : vector<256xf32>
      %54 = vector.multi_reduction <add>, %53, %cst_20 [0] : vector<32x256xf32> to vector<256xf32>
      %55 = vector.shape_cast %54 : vector<256xf32> to vector<1x256xf32>
      %56 = tpu.reciprocal %55 {approx = true} : vector<1x256xf32> -> vector<1x256xf32>
      %cst_21 = arith.constant 0.176776692 : f32
      %57 = vector.broadcast %cst_21 : f32 to vector<1x256xf32>
      %58 = arith.mulf %57, %56 : vector<1x256xf32>
      %59 = vector.broadcast %58 : vector<1x256xf32> to vector<32x256xf32>
      %60 = arith.mulf %53, %59 : vector<32x256xf32>
      %c32 = arith.constant 32 : index
      %c0_22 = arith.constant 0 : index
      %61 = vector.load %arg10[%c32, %c0_22] : memref<128x1xf32, #tpu.memory_space<vmem>>, vector<32x1xf32>
      %62 = tpu.reciprocal %61 {approx = true} : vector<32x1xf32> -> vector<32x1xf32>
      %c32_23 = arith.constant 32 : index
      %c0_24 = arith.constant 0 : index
      %63 = vector.load %arg11[%c32_23, %c0_24] : memref<128x32xf32, #tpu.memory_space<vmem>>, vector<32x32xf32>
      %64 = vector.broadcast %62 : vector<32x1xf32> to vector<32x32xf32>
      %65 = arith.mulf %63, %64 : vector<32x32xf32>
      %66 = tpu.transpose %65, [1, 0] : vector<32x32xf32> -> vector<32x32xf32>
      %67 = arith.truncf %66 : vector<32x32xf32> to vector<32x32xbf16>
      %68 = arith.truncf %60 : vector<32x256xf32> to vector<32x256xbf16>
      %cst_25 = arith.constant dense<0.000000e+00> : vector<32x256xf32>
      %69 = tpu.matmul %67, %68, %cst_25 {dimension_numbers = #tpu.dot_dimension_numbers<[1], [0], [0], [1], [0, 0, 1, 1], [], []>} : vector<32x32xbf16>, vector<32x256xbf16>, vector<32x256xf32> -> vector<32x256xf32>
      %70 = vector.extract_strided_slice %25 {offsets = [64, 0], sizes = [32, 256], strides = [1, 1]} : vector<128x256xf32> to vector<32x256xf32>
      %cst_26 = arith.constant dense<0xFF800000> : vector<256xf32>
      %71 = vector.multi_reduction <maximumf>, %70, %cst_26 [0] : vector<32x256xf32> to vector<256xf32>
      %72 = vector.shape_cast %71 : vector<256xf32> to vector<1x256xf32>
      %73 = vector.broadcast %72 : vector<1x256xf32> to vector<32x256xf32>
      %74 = arith.subf %70, %73 : vector<32x256xf32>
      %75 = math.exp %74 : vector<32x256xf32>
      %cst_27 = arith.constant dense<0.000000e+00> : vector<256xf32>
      %76 = vector.multi_reduction <add>, %75, %cst_27 [0] : vector<32x256xf32> to vector<256xf32>
      %77 = vector.shape_cast %76 : vector<256xf32> to vector<1x256xf32>
      %78 = tpu.reciprocal %77 {approx = true} : vector<1x256xf32> -> vector<1x256xf32>
      %cst_28 = arith.constant 0.176776692 : f32
      %79 = vector.broadcast %cst_28 : f32 to vector<1x256xf32>
      %80 = arith.mulf %79, %78 : vector<1x256xf32>
      %81 = vector.broadcast %80 : vector<1x256xf32> to vector<32x256xf32>
      %82 = arith.mulf %75, %81 : vector<32x256xf32>
      %c64 = arith.constant 64 : index
      %c0_29 = arith.constant 0 : index
      %83 = vector.load %arg10[%c64, %c0_29] : memref<128x1xf32, #tpu.memory_space<vmem>>, vector<32x1xf32>
      %84 = tpu.reciprocal %83 {approx = true} : vector<32x1xf32> -> vector<32x1xf32>
      %c64_30 = arith.constant 64 : index
      %c0_31 = arith.constant 0 : index
      %85 = vector.load %arg11[%c64_30, %c0_31] : memref<128x32xf32, #tpu.memory_space<vmem>>, vector<32x32xf32>
      %86 = vector.broadcast %84 : vector<32x1xf32> to vector<32x32xf32>
      %87 = arith.mulf %85, %86 : vector<32x32xf32>
      %88 = tpu.transpose %87, [1, 0] : vector<32x32xf32> -> vector<32x32xf32>
      %89 = arith.truncf %88 : vector<32x32xf32> to vector<32x32xbf16>
      %90 = arith.truncf %82 : vector<32x256xf32> to vector<32x256xbf16>
      %cst_32 = arith.constant dense<0.000000e+00> : vector<32x256xf32>
      %91 = tpu.matmul %89, %90, %cst_32 {dimension_numbers = #tpu.dot_dimension_numbers<[1], [0], [0], [1], [0, 0, 1, 1], [], []>} : vector<32x32xbf16>, vector<32x256xbf16>, vector<32x256xf32> -> vector<32x256xf32>
      %92 = vector.extract_strided_slice %25 {offsets = [96, 0], sizes = [32, 256], strides = [1, 1]} : vector<128x256xf32> to vector<32x256xf32>
      %cst_33 = arith.constant dense<0xFF800000> : vector<256xf32>
      %93 = vector.multi_reduction <maximumf>, %92, %cst_33 [0] : vector<32x256xf32> to vector<256xf32>
      %94 = vector.shape_cast %93 : vector<256xf32> to vector<1x256xf32>
      %95 = vector.broadcast %94 : vector<1x256xf32> to vector<32x256xf32>
      %96 = arith.subf %92, %95 : vector<32x256xf32>
      %97 = math.exp %96 : vector<32x256xf32>
      %cst_34 = arith.constant dense<0.000000e+00> : vector<256xf32>
      %98 = vector.multi_reduction <add>, %97, %cst_34 [0] : vector<32x256xf32> to vector<256xf32>
      %99 = vector.shape_cast %98 : vector<256xf32> to vector<1x256xf32>
      %100 = tpu.reciprocal %99 {approx = true} : vector<1x256xf32> -> vector<1x256xf32>
      %cst_35 = arith.constant 0.176776692 : f32
      %101 = vector.broadcast %cst_35 : f32 to vector<1x256xf32>
      %102 = arith.mulf %101, %100 : vector<1x256xf32>
      %103 = vector.broadcast %102 : vector<1x256xf32> to vector<32x256xf32>
      %104 = arith.mulf %97, %103 : vector<32x256xf32>
      %c96 = arith.constant 96 : index
      %c0_36 = arith.constant 0 : index
      %105 = vector.load %arg10[%c96, %c0_36] : memref<128x1xf32, #tpu.memory_space<vmem>>, vector<32x1xf32>
      %106 = tpu.reciprocal %105 {approx = true} : vector<32x1xf32> -> vector<32x1xf32>
      %c96_37 = arith.constant 96 : index
      %c0_38 = arith.constant 0 : index
      %107 = vector.load %arg11[%c96_37, %c0_38] : memref<128x32xf32, #tpu.memory_space<vmem>>, vector<32x32xf32>
      %108 = vector.broadcast %106 : vector<32x1xf32> to vector<32x32xf32>
      %109 = arith.mulf %107, %108 : vector<32x32xf32>
      %110 = tpu.transpose %109, [1, 0] : vector<32x32xf32> -> vector<32x32xf32>
      %111 = arith.truncf %110 : vector<32x32xf32> to vector<32x32xbf16>
      %112 = arith.truncf %104 : vector<32x256xf32> to vector<32x256xbf16>
      %cst_39 = arith.constant dense<0.000000e+00> : vector<32x256xf32>
      %113 = tpu.matmul %111, %112, %cst_39 {dimension_numbers = #tpu.dot_dimension_numbers<[1], [0], [0], [1], [0, 0, 1, 1], [], []>} : vector<32x32xbf16>, vector<32x256xbf16>, vector<32x256xf32> -> vector<32x256xf32>
      %114 = tpu.concatenate %47, %69, %91, %113 in 0 : vector<32x256xf32>, vector<32x256xf32>, vector<32x256xf32>, vector<32x256xf32> -> vector<128x256xf32>
      %c0_40 = arith.constant 0 : index
      %c0_41 = arith.constant 0 : index
      %115 = vector.load %arg5[%c0_40, %c0_41] : memref<4x128xf32, #tpu.memory_space<vmem>>, vector<4x128xf32>
      %116 = arith.truncf %115 : vector<4x128xf32> to vector<4x128xbf16>
      %117 = arith.truncf %114 : vector<128x256xf32> to vector<128x256xbf16>
      %cst_42 = arith.constant dense<0.000000e+00> : vector<4x256xf32>
      %118 = tpu.matmul %116, %117, %cst_42 {dimension_numbers = #tpu.dot_dimension_numbers<[1], [0], [0], [1], [0, 0, 1, 1], [], []>} : vector<4x128xbf16>, vector<128x256xbf16>, vector<4x256xf32> -> vector<4x256xf32>
      %c0_43 = arith.constant 0 : index
      %c0_44 = arith.constant 0 : index
      %119 = vector.load %arg6[%c0_43, %c0_44] : memref<4x1xf32, #tpu.memory_space<vmem>>, vector<4x1xf32>
      %120 = vector.broadcast %119 : vector<4x1xf32> to vector<4x256xf32>
      %121 = arith.addf %118, %120 : vector<4x256xf32>
      %122 = arith.mulf %121, %121 : vector<4x256xf32>
      %cst_45 = arith.constant dense<0.000000e+00> : vector<256xf32>
      %123 = vector.multi_reduction <add>, %122, %cst_45 [0] : vector<4x256xf32> to vector<256xf32>
      %124 = vector.shape_cast %123 : vector<256xf32> to vector<1x256xf32>
      %cst_46 = arith.constant 1.000000e-24 : f32
      %125 = vector.broadcast %cst_46 : f32 to vector<1x256xf32>
      %126 = arith.maximumf %124, %125 : vector<1x256xf32>
      %127 = math.rsqrt %126 : vector<1x256xf32>
      %128 = vector.broadcast %127 : vector<1x256xf32> to vector<4x256xf32>
      %129 = arith.mulf %121, %128 : vector<4x256xf32>
      %c0_47 = arith.constant 0 : index
      %c0_48 = arith.constant 0 : index
      %130 = vector.load %arg7[%c0_47, %c0_48] : memref<4x1xf32, #tpu.memory_space<vmem>>, vector<4x1xf32>
      %131 = vector.broadcast %130 : vector<4x1xf32> to vector<4x256xf32>
      %132 = arith.mulf %129, %131 : vector<4x256xf32>
      %c0_49 = arith.constant 0 : index
      %c0_50 = arith.constant 0 : index
      %c0_51 = arith.constant 0 : index
      %133 = vector.load %arg8[%c0_49, %c0_50, %c0_51] : memref<1x4x256xf32, #tpu.memory_space<vmem>>, vector<1x4x256xf32>
      %134 = vector.shape_cast %133 : vector<1x4x256xf32> to vector<4x256xf32>
      %135 = vector.shape_cast %132 : vector<4x256xf32> to vector<1x4x256xf32>
      tpu.vector_store %arg8[%c0_49, %c0_50, %c0_51], %135 {strides = array<i32>} : memref<1x4x256xf32, #tpu.memory_space<vmem>>, vector<1x4x256xf32>,
    } else {
    }
    return
  }
  func.func @transform_0(%arg0: i32, %arg1: i32, %arg2: i32) -> (i32, i32, i32) {
    %c0_i32 = arith.constant 0 : i32
    %c0_i32_0 = arith.constant 0 : i32
    return %arg0, %c0_i32, %arg2 : i32, i32, i32
  }
  func.func @transform_1(%arg0: i32, %arg1: i32, %arg2: i32) -> (i32, i32) {
    %c0_i32 = arith.constant 0 : i32
    %c0_i32_0 = arith.constant 0 : i32
    %c0_i32_1 = arith.constant 0 : i32
    return %c0_i32, %c0_i32_0 : i32, i32
  }
  func.func @transform_2(%arg0: i32, %arg1: i32, %arg2: i32) -> (i32, i32) {
    %c0_i32 = arith.constant 0 : i32
    %c0_i32_0 = arith.constant 0 : i32
    %c0_i32_1 = arith.constant 0 : i32
    return %c0_i32, %c0_i32_0 : i32, i32
  }
  func.func @transform_3(%arg0: i32, %arg1: i32, %arg2: i32) -> (i32, i32) {
    %c0_i32 = arith.constant 0 : i32
    %c0_i32_0 = arith.constant 0 : i32
    %c0_i32_1 = arith.constant 0 : i32
    return %c0_i32, %c0_i32_0 : i32, i32
  }
  func.func @transform_4(%arg0: i32, %arg1: i32, %arg2: i32) -> (i32, i32) {
    %c0_i32 = arith.constant 0 : i32
    %c0_i32_0 = arith.constant 0 : i32
    %c0_i32_1 = arith.constant 0 : i32
    return %c0_i32, %c0_i32_0 : i32, i32
  }
  func.func @transform_5(%arg0: i32, %arg1: i32, %arg2: i32) -> (i32, i32, i32) {
    %0 = arith.muli %arg2, %arg1 : i32
    %c0_i32 = arith.constant 0 : i32
    %c0_i32_0 = arith.constant 0 : i32
    return %arg0, %c0_i32, %0 : i32, i32, i32
  }
}

</mosaic_0001>

<bundles_post_ra>
// kernel: tpu_custom_call.1
= control target key start
LH: loop header
LB: loop body
LE: loop exit
PB: predicated region body
PF: predicated region fallthrough
CT: control target
= control target key end

     0   :  { %10 = vsyncpa [#allocation6], 0  ;;  %s4601_s0 = inlined_call_operand.vmem [shape: f32[2,4,256], index: 0, kind: input, shape index: {}]   ;;  %s4602_s1 = inlined_call_operand.vmem [shape: f32[384,4], index: 1, kind: input, shape index: {}]   ;;  %s4603_s2 = inlined_call_operand.vmem [shape: f32[4,128], index: 2, kind: input, shape index: {}]   ;;  %s4604_s3 = inlined_call_operand.vmem [shape: f32[4,1], index: 3, kind: input, shape index: {}]   ;;  %s4605_s4 = inlined_call_operand.vmem [shape: f32[4,1], index: 4, kind: input, shape index: {}]   ;;  %s4606_s5 = inlined_call_operand.hbm [shape: f32[2,4,256], index: 5, kind: output, shape index: {}]  }
   0x1   :  { %12 = vsyncpa [#allocation6 + $0x1], 0  ;;  %s3137_s18 = smov 0   ;;  %s3139_s19 = smov 0  }
   0x2   :  { %s3141_s20 = smov 0   ;;  %s3143_s21 = smov 0  }
   0x3   :  { %s3145_s22 = smov 0   ;;  %s3147_s23 = smov 0  }
   0x4   :  { %s3149_s24 = smov 0   ;;  %s3151_s25 = smov 0  }
   0x5 LB: > { %s2655_s26 = sadd.s32 4294967295, %s3100_s25   ;;  %s2656_s27 = sadd.s32 4294967294, %s3100_s25   ;;  %s3100_s25 = sphi %s3151_s25, %s18_s25   ;;  %s3096_s24 = sphi %s3149_s24, %s4806_s24   ;;  %s3092_s23 = sphi %s3147_s23, %s4805_s23   ;;  %s3088_s22 = sphi %s3145_s22, %s4804_s22   ;;  %s3084_s21 = sphi %s3143_s21, %s4803_s21   ;;  %s3080_s20 = sphi %s3141_s20, %s4802_s20   ;;  %s3076_s19 = sphi %s3139_s19, %s4801_s19   ;;  %s3072_s18 = sphi %s3137_s18, %s4800_s18  }
   0x6   : > { %s33_s28 = sadd.s32 1, %s3092_s23  ;;  %s37_s29 = sadd.s32 1, %s3096_s24 }
   0x7   : > { %p35_p0 = scmp.ge.s32.totalorder %s33_s28, 2  ;;  %p170_p1 = scmp.ne.s32.totalorder %s3080_s20, %s3076_s19 }
   0x8   : > { %p171_p2 = scmp.eq.s32.totalorder %s2655_s26, 3  ;;  %p176_p4 = scmp.ne.s32.totalorder %s3076_s19, %s3072_s18 }
   0x9   : > { %s4808_s28 = smov (%p35_p0, %s33_s28), 0  ;;  %s4810_s29 = smov (!%p35_p0, %s37_s29), %s3096_s24 }
   0xa   : > { %p3186_p3 = por %p171_p2, %p170_p1  ;;  %p39_p5 = scmp.ge.s32.totalorder %s4810_s29, 2 }
   0xb   : > { %p177_p6 = scmp.eq.s32.totalorder %s2656_s27, 3  ;;  %p2659_p7 = scmp.ge.s32.totalorder %s3100_s25, 1 }
   0xc   : > { %p220_p8 = scmp.lt.s32.totalorder %s3100_s25, 5  ;;  %s4812_s29 = smov (%p39_p5, %s4810_s29), 0 }
   0xd   : > { %p3196_p9 = por %p177_p6, %p176_p4  ;;  %s155_s7 = ssub.s32 %s3096_s24, %s4812_s29 }
   0xe   : > { %p221_p10 = pnand %p2659_p7, %p220_p8  ;;  %s160_s8 = sadd.s32 1, %s3080_s20 }
   0xf   : > { %p158_p11 = scmp.eq.s32.totalorder %s155_s7, 0 }
  0x10   : > { %224 = sbr.rel (%p221_p10) target bundleno = 1864 (0x748), region = 40 }
  0x11   : > { %s3204_s9 = scalar_select %p158_p11, %s3080_s20, %s160_s8  }
  0x17   : > { %s249_s10 = sand.u32 1, %s3076_s19   ;;  %p253_p12 = scmp.lt.s32.totalorder %s3088_s22, 1  ;;  %v3211_v0 = vld [vmem:[%s4602_s1] sm:$0xff]  ;;  %v3216_v1 = vld [vmem:[%s4602_s1 + $0x8] sm:$0xff]  ;;  %v3221_v2 = vld [vmem:[%s4602_s1 + $0x10] sm:$0xff]  ;;  %vm270_vm0 = vcmask 1043456  }
  0x18   : > { %4657 = vst [vmem:[#allocation8_spill] sm:$0xff] %v3211_v0  ;;  %4658 = vst [vmem:[#allocation9_spill] sm:$0xff] %v3216_v1  ;;  %s3225_s17 = sshll.u32 %s249_s10, 3  ;;  %v3230_v3 = vld [vmem:[%s4602_s1 + $0x18] sm:$0xff]  ;;  %v3235_v4 = vld [vmem:[%s4602_s1 + $0x20] sm:$0xff]  ;;  %p371_p13 = scmp.eq.s32.totalorder %s3084_s21, 0 }
  0x19   : > { %4659 = vst [vmem:[#allocation10_spill] sm:$0xff] %v3221_v2  ;;  %4660 = vst [vmem:[#allocation11_spill] sm:$0xff] %v3230_v3  ;;  %v3240_v5 = vld [vmem:[%s4602_s1 + $0x28] sm:$0xff]  ;;  %v3248_v7 = vld [vmem:[%s4602_s1 + $0x30] sm:$0xff]  ;;  %s254_s7 = scalar_select %p253_p12, %s3088_s22, 1 }
  0x1a   : > { %4661 = vst [vmem:[#allocation12_spill] sm:$0xff] %v3235_v4  ;;  %4662 = vst [vmem:[#allocation13_spill] sm:$0xff] %v3240_v5  ;;  %v3253_v8 = vld [vmem:[%s4602_s1 + $0x38] sm:$0xff]  ;;  %v3258_v9 = vld [vmem:[%s4602_s1 + $0x40] sm:$0xff]  ;;  %s251_s15 = scalar_lea.vmem [#allocation5], %s3225_s17  ;;  %vm377_vm1 = vcmask (%p371_p13), 7168  }
  0x1b   : > { %4663 = vst [vmem:[#allocation14_spill] sm:$0xff] %v3248_v7  ;;  %4664 = vst [vmem:[#allocation15_spill] sm:$0xff] %v3253_v8  ;;  %v3270_v12 = vld [vmem:[%s4602_s1 + $0x48] sm:$0xff]  ;;  %v3275_v13 = vld [vmem:[%s4602_s1 + $0x50] sm:$0xff]  ;;  %s2705_s13 = sshll.u32 %s254_s7, 3  ;;  %vm410_vm2 = vcmask (%p371_p13), 261120  }
  0x1c   : > { %4665 = vst [vmem:[#allocation16_spill] sm:$0xff] %v3258_v9  ;;  %4666 = vst [vmem:[#allocation17_spill] sm:$0xff] %v3270_v12  ;;  %v3280_v14 = vld [vmem:[%s4602_s1 + $0x58] sm:$0xff]  ;;  %v3287_v16 = vld [vmem:[%s4602_s1 + $0x60] sm:$0xff]  ;;  %s260_s12 = scalar_lea.vmem %s4601_s0, %s2705_s13 }
  0x1d   : > { %4667 = vst [vmem:[#allocation18_spill] sm:$0xff] %v3275_v13  ;;  %4668 = vst [vmem:[#allocation19_spill] sm:$0xff] %v3280_v14  ;;  %v3292_v17 = vld [vmem:[%s4602_s1 + $0x68] sm:$0xff]  ;;  %v3297_v18 = vld [vmem:[%s4602_s1 + $0x70] sm:$0xff] }
  0x1e   : > { %4669 = vst [vmem:[#allocation20_spill] sm:$0xff] %v3287_v16  ;;  %4670 = vst [vmem:[#allocation21_spill] sm:$0xff] %v3292_v17  ;;  %v3306_v21 = vld [vmem:[%s4602_s1 + $0x78] sm:$0xff]  ;;  %v3311_v22 = vld [vmem:[%s4602_s1 + $0x80] sm:$0xff] }
  0x1f   : > { %4671 = vst [vmem:[#allocation22_spill] sm:$0xff] %v3297_v18  ;;  %4672 = vst [vmem:[#allocation23_spill] sm:$0xff] %v3306_v21  ;;  %v3316_v23 = vld [vmem:[%s4602_s1 + $0x88] sm:$0xff]  ;;  %v3326_v25 = vld [vmem:[%s4602_s1 + $0x90] sm:$0xff] }
  0x20   : > { %v3331_v26 = vld [vmem:[%s4602_s1 + $0x98] sm:$0xff]  ;;  %v3336_v27 = vld [vmem:[%s4602_s1 + $0xa0] sm:$0xff]  ;;  %v3347_v31 = vld [vmem:[%s4602_s1 + $0xa8] sm:$0xff] }
  0x21   : > { %v3342_v30 = vld [vmem:[%s260_s12] sm:$0xff]  ;;  %v3352_v32 = vld [vmem:[%s4602_s1 + $0xb0] sm:$0xff]  ;;  %v3361_v35 = vld [vmem:[%s4602_s1 + $0xb8] sm:$0xff] }
  0x22   : > { %v266_v34 = vmul.f32 %v3342_v30, %v3342_v30  ;;  %v3366_v36 = vld [vmem:[%s4602_s1 + $0xc0] sm:$0xff]  ;;  %v3371_v37 = vld [vmem:[%s4602_s1 + $0xc8] sm:$0xff]  ;;  %v3378_v39 = vld [vmem:[%s4602_s1 + $0xd0] sm:$0xff] }
  0x23   : > { %v3383_v40 = vld [vmem:[%s4602_s1 + $0xd8] sm:$0xff]  ;;  %v3388_v41 = vld [vmem:[%s4602_s1 + $0xe0] sm:$0xff]  ;;  %v3398_v46 = vld [vmem:[%s4602_s1 + $0xe8] sm:$0xff] }
  0x24   : > { %v268_v44 = vcombine.high %v266_v34, %v266_v34  ;;  %v271_v45 = vsel %vm270_vm0, %v266_v34, 0.0  ;;  %v3403_v47 = vld [vmem:[%s4602_s1 + $0xf0] sm:$0xff]  ;;  %v3408_v48 = vld [vmem:[%s4602_s1 + $0xf8] sm:$0xff]  ;;  %v3415_v51 = vld [vmem:[%s4602_s1 + $0x100] sm:$0xff] }
  0x25   : > { %v272_v50 = vrot.slane %v271_v45, 4  ;;  %v3420_v52 = vld [vmem:[%s4602_s1 + $0x108] sm:$0xff]  ;;  %v3425_v53 = vld [vmem:[%s4602_s1 + $0x110] sm:$0xff]  ;;  %v3435_v57 = vld [vmem:[%s4602_s1 + $0x118] sm:$0xff] }
  0x26   : > { %v278_v56 = vsel %vm270_vm0, %v268_v44, 0.0  ;;  %v3440_v58 = vld [vmem:[%s4602_s1 + $0x120] sm:$0xff]  ;;  %v3445_v59 = vld [vmem:[%s4602_s1 + $0x128] sm:$0xff]  ;;  %v3452_v63 = vld [vmem:[%s4602_s1 + $0x130] sm:$0xff] }
  0x27   : > { %v273_v61 = vadd.f32 %v272_v50, %v271_v45  ;;  %v279_v62 = vrot.slane %v278_v56, 4  ;;  %v3457_v34 = vld [vmem:[%s4602_s1 + $0x138] sm:$0xff]  ;;  %v3462_v44 = vld [vmem:[%s4602_s1 + $0x140] sm:$0xff]  ;;  %v3471_v50 = vld [vmem:[%s4602_s1 + $0x148] sm:$0xff] }
  0x28   : > { %v3476_v24 = vld [vmem:[%s4602_s1 + $0x150] sm:$0xff]  ;;  %v3481_v20 = vld [vmem:[%s4602_s1 + $0x158] sm:$0xff]  ;;  %v3488_v10 = vld [vmem:[%s4602_s1 + $0x160] sm:$0xff] }
  0x29   : > { %v274_v15 = vrot.slane %v273_v61, 2  ;;  %v280_v11 = vadd.f32 %v279_v62, %v278_v56  ;;  %v3493_v6 = vld [vmem:[%s4602_s1 + $0x168] sm:$0xff]  ;;  %v3498_v45 = vld [vmem:[%s4602_s1 + $0x170] sm:$0xff]  ;;  %v3507_v62 = vld [vmem:[%s4602_s1 + $0x178] sm:$0xff] }
  0x2a   : > { %v370_v54 = vpack.c.bf16 %v3507_v62, %v3498_v45 }
  0x2b   : > { %v275_v60 = vadd.f32 %v274_v15, %v273_v61  ;;  %v281_v55 = vrot.slane %v280_v11, 2 }
  0x2d   : > { %v276_v49 = vrot.slane %v275_v60, 1  ;;  %v282_v43 = vadd.f32 %v281_v55, %v280_v11  ;;  %v3102_v11 = vmov (%p371_p13), -inf  }
  0x2e   : > { %378 = vst.msk [vmem:[#allocation2] sm:$0xff] (%p371_p13), %vm377_vm1, %v3102_v11  ;;  %379 = vst.msk [vmem:[#allocation2 + $0x8] sm:$0xff] (%p371_p13), %vm377_vm1, %v3102_v11 }
  0x2f   : > { %v277_v42 = vadd.f32 %v276_v49, %v275_v60  ;;  %v283_v38 = vrot.slane %v282_v43, 1  ;;  %380 = vst.msk [vmem:[#allocation2 + $0x10] sm:$0xff] (%p371_p13), %vm377_vm1, %v3102_v11  ;;  %381 = vst.msk [vmem:[#allocation2 + $0x18] sm:$0xff] (%p371_p13), %vm377_vm1, %v3102_v11 }
  0x30   : > { %382 = vst.msk [vmem:[#allocation2 + $0x20] sm:$0xff] (%p371_p13), %vm377_vm1, %v3102_v11  ;;  %383 = vst.msk [vmem:[#allocation2 + $0x28] sm:$0xff] (%p371_p13), %vm377_vm1, %v3102_v11 }
  0x31   : > { %v284_v33 = vadd.f32 %v283_v38, %v282_v43  ;;  %v285_v56 = vmax.f32 %v277_v42, 1e-24  ;;  %384 = vst.msk [vmem:[#allocation2 + $0x30] sm:$0xff] (%p371_p13), %vm377_vm1, %v3102_v11  ;;  %385 = vst.msk [vmem:[#allocation2 + $0x38] sm:$0xff] (%p371_p13), %vm377_vm1, %v3102_v11 }
  0x32   : > { %386 = vst.msk [vmem:[#allocation2 + $0x40] sm:$0xff] (%p371_p13), %vm377_vm1, %v3102_v11  ;;  %387 = vst.msk [vmem:[#allocation2 + $0x48] sm:$0xff] (%p371_p13), %vm377_vm1, %v3102_v11 }
  0x33   : > { %v286_v19 = vmax.f32 %v284_v33, 1e-24  ;;  %2786 = vrsqrt.f32 %v285_v56  ;;  %388 = vst.msk [vmem:[#allocation2 + $0x50] sm:$0xff] (%p371_p13), %vm377_vm1, %v3102_v11  ;;  %389 = vst.msk [vmem:[#allocation2 + $0x58] sm:$0xff] (%p371_p13), %vm377_vm1, %v3102_v11 }
  0x34   : > { %390 = vst.msk [vmem:[#allocation2 + $0x60] sm:$0xff] (%p371_p13), %vm377_vm1, %v3102_v11  ;;  %391 = vst.msk [vmem:[#allocation2 + $0x68] sm:$0xff] (%p371_p13), %vm377_vm1, %v3102_v11 }
  0x35   : > { %2788 = vrsqrt.f32 %v286_v19  ;;  %392 = vst.msk [vmem:[#allocation2 + $0x70] sm:$0xff] (%p371_p13), %vm377_vm1, %v3102_v11  ;;  %393 = vst.msk [vmem:[#allocation2 + $0x78] sm:$0xff] (%p371_p13), %vm377_vm1, %v3102_v11 }
  0x3d   : > { %v2787_v29 = vpop.eup %2786 }
  0x3f   : > { %v2789_v18 = vpop.eup %2788 }
  0x40   : > { %v291_v21 = vcombine.low %v2787_v29, %v2789_v18  ;;  %v3103_v18 = vmov (%p371_p13), 0.0  }
  0x41   : > { %394 = vst.msk [vmem:[#allocation3] sm:$0xff] (%p371_p13), %vm377_vm1, %v3103_v18  ;;  %395 = vst.msk [vmem:[#allocation3 + $0x8] sm:$0xff] (%p371_p13), %vm377_vm1, %v3103_v18 }
  0x42   : > { %v293_v28 = vmul.f32 %v291_v21, %v3342_v30  ;;  %376 = sbr.rel (!%p371_p13) target bundleno = 82 (0x52), region = 44  ;;  %396 = vst.msk [vmem:[#allocation3 + $0x10] sm:$0xff] (%p371_p13), %vm377_vm1, %v3103_v18  ;;  %397 = vst.msk [vmem:[#allocation3 + $0x18] sm:$0xff] (%p371_p13), %vm377_vm1, %v3103_v18 }
  0x43   : > { %398 = vst.msk [vmem:[#allocation3 + $0x20] sm:$0xff] (%p371_p13), %vm377_vm1, %v3103_v18  ;;  %399 = vst.msk [vmem:[#allocation3 + $0x28] sm:$0xff] (%p371_p13), %vm377_vm1, %v3103_v18 }
  0x44   : > { %v295_v15 = vcombine.high %v293_v28, %v293_v28  ;;  %v3514_v61 = vpack.c.bf16 %v293_v28, %v293_v28  ;;  %400 = vst.msk [vmem:[#allocation3 + $0x30] sm:$0xff] (%p371_p13), %vm377_vm1, %v3103_v18  ;;  %401 = vst.msk [vmem:[#allocation3 + $0x38] sm:$0xff] (%p371_p13), %vm377_vm1, %v3103_v18 }
  0x45   : > { %402 = vst.msk [vmem:[#allocation3 + $0x40] sm:$0xff] (%p371_p13), %vm377_vm1, %v3103_v18  ;;  %403 = vst.msk [vmem:[#allocation3 + $0x48] sm:$0xff] (%p371_p13), %vm377_vm1, %v3103_v18 }
  0x46   : > { %4673 = vst [vmem:[#allocation24_spill] sm:$0xff] %v3514_v61  ;;  %v3516_v16 = vpack.c.bf16 %v295_v15, %v295_v15  ;;  %404 = vst.msk [vmem:[#allocation3 + $0x50] sm:$0xff] (%p371_p13), %vm377_vm1, %v3103_v18 }
  0x47   : > { %405 = vst.msk [vmem:[#allocation3 + $0x58] sm:$0xff] (%p371_p13), %vm377_vm1, %v3103_v18  ;;  %406 = vst.msk [vmem:[#allocation3 + $0x60] sm:$0xff] (%p371_p13), %vm377_vm1, %v3103_v18 }
  0x48   : > { %4674 = vst [vmem:[#allocation25_spill] sm:$0xff] %v3516_v16  ;;  %407 = vst.msk [vmem:[#allocation3 + $0x68] sm:$0xff] (%p371_p13), %vm377_vm1, %v3103_v18 }
  0x49   : > { %408 = vst.msk [vmem:[#allocation3 + $0x70] sm:$0xff] %vm377_vm1, %v3103_v18  ;;  %409 = vst.msk [vmem:[#allocation3 + $0x78] sm:$0xff] %vm377_vm1, %v3103_v18 }
  0x4a   : > { %411 = vst.msk [vmem:[#allocation4] sm:$0xff] %vm410_vm2, %v3103_v18  ;;  %412 = vst.msk [vmem:[#allocation4 + $0x8] sm:$0xff] %vm410_vm2, %v3103_v18 }
  0x4b   : > { %413 = vst.msk [vmem:[#allocation4 + $0x10] sm:$0xff] %vm410_vm2, %v3103_v18  ;;  %414 = vst.msk [vmem:[#allocation4 + $0x18] sm:$0xff] %vm410_vm2, %v3103_v18 }
  0x4c   : > { %415 = vst.msk [vmem:[#allocation4 + $0x20] sm:$0xff] %vm410_vm2, %v3103_v18  ;;  %416 = vst.msk [vmem:[#allocation4 + $0x28] sm:$0xff] %vm410_vm2, %v3103_v18 }
  0x4d   : > { %417 = vst.msk [vmem:[#allocation4 + $0x30] sm:$0xff] %vm410_vm2, %v3103_v18  ;;  %418 = vst.msk [vmem:[#allocation4 + $0x38] sm:$0xff] %vm410_vm2, %v3103_v18 }
  0x4e   : > { %419 = vst.msk [vmem:[#allocation4 + $0x40] sm:$0xff] %vm410_vm2, %v3103_v18  ;;  %420 = vst.msk [vmem:[#allocation4 + $0x48] sm:$0xff] %vm410_vm2, %v3103_v18 }
  0x4f   : > { %421 = vst.msk [vmem:[#allocation4 + $0x50] sm:$0xff] %vm410_vm2, %v3103_v18  ;;  %422 = vst.msk [vmem:[#allocation4 + $0x58] sm:$0xff] %vm410_vm2, %v3103_v18 }
  0x50   : > { %423 = vst.msk [vmem:[#allocation4 + $0x60] sm:$0xff] %vm410_vm2, %v3103_v18  ;;  %424 = vst.msk [vmem:[#allocation4 + $0x68] sm:$0xff] %vm410_vm2, %v3103_v18 }
  0x51   : > { %425 = vst.msk [vmem:[#allocation4 + $0x70] sm:$0xff] %vm410_vm2, %v3103_v18  ;;  %426 = vst.msk [vmem:[#allocation4 + $0x78] sm:$0xff] %vm410_vm2, %v3103_v18 }
  0x52 PF: > { %p2664_p0 = scmp.ne.s32.totalorder %s3084_s21, 0 }
  0x54   : > { %429 = sbr.rel (%p2664_p0) target bundleno = 994 (0x3e2), region = 48 }
  0x5b   : > { %vm479_vm3 = vcmask 1041408   ;;  %v3104_v21 = vmov 0   ;;  %vm430_vm4 = vcmask 31744   ;;  %v4675_v28 = vpack.c.bf16 %v3316_v23, %v3311_v22  ;;  %v3796_v7 = vld [vmem:[#allocation2 + $0x38] sm:$0xff]  ;;  %v1084_v0 = vld [vmem:[#allocation2 + $0x48] sm:$0xff] }
  0x5c   : > { %2665 = vmatprep.subr.msk.bf16.mxu0 %vm479_vm3, %v3516_v16  ;;  %v481_v19 = vsel %vm479_vm3, %v3514_v61, 0  ;;  %518 = vmatprep.mubr.bf16.mxu0 %v3104_v21  ;;  %v4676_v29 = vpack.c.bf16 %v3471_v50, %v3462_v44  ;;  %v4677_v30 = vpack.c.bf16 %v3331_v26, %v3326_v25  ;;  %v4678_v33 = vpack.c.bf16 %v3481_v20, %v3476_v24 }
  0x5d   : > { %487 = vmatpush1.bf16.msra.mxu0 %v481_v19  ;;  %2708 = vmatprep.subr.msk.bf16.mxu1 %vm479_vm3, %v3516_v16  ;;  %v4679_v22 = vpack.c.bf16 %v3347_v31, %v3336_v27  ;;  %v4680_v23 = vpack.c.bf16 %v3493_v6, %v3488_v10  ;;  %v4681_v25 = vpack.c.bf16 %v3361_v35, %v3352_v32  ;;  %vm779_vm5 = vcmask 7168   ;;  %v3835_v16 = vld [vmem:[#allocation2 + $0x50] sm:$0xff] }
  0x5e   : > { %2709 = vmatpush1.bf16.msra.mxu1 %v481_v19  ;;  %638 = vmatprep.mubr.bf16.mxu1 %v3104_v21  ;;  %v4682_v20 = vpack.c.bf16 %v3371_v37, %v3366_v36  ;;  %v4683_v6 = vpack.c.bf16 %v3383_v40, %v3378_v39  ;;  %v4684_v10 = vpack.c.bf16 %v3398_v46, %v3388_v41  ;;  %vm873_vm6 = vcmask 261120  }
  0x5f   : > { %2790 = vset.pattern.permute.xlu0 %v3104_v21  ;;  %2791 = vset.pattern.permute.xlu1 %v3104_v21  ;;  %v4685_v24 = vpack.c.bf16 %v3408_v48, %v3403_v47  ;;  %v4686_v26 = vpack.c.bf16 %v3420_v52, %v3415_v51  ;;  %v4687_v27 = vpack.c.bf16 %v3435_v57, %v3425_v53 }
  0x60   : > { %2666 = vmatmul.mubr.msk.bf16.vlgmr.msra.gmra.mrb[0].mxu0 %vm430_vm4, %v4675_v28  ;;  %v4688_v31 = vpack.c.bf16 %v3445_v59, %v3440_v58  ;;  %v4689_v32 = vpack.c.bf16 %v3457_v34, %v3452_v63  ;;  %4698 = vst [vmem:[#allocation34_spill] sm:$0xff] %v3796_v7  ;;  %4703 = vst [vmem:[#allocation38_spill] sm:$0xff] %v3835_v16 }
  0x61   : > { %528 = vmatprep.mubr.bf16.mxu0 %v3104_v21  ;;  %2678 = vmatmul.mubr.msk.bf16.vlgmr.msra.gmra.mrb[0].mxu1 %vm430_vm4, %v4676_v29 }
  0x62   : > { %648 = vmatprep.mubr.bf16.mxu1 %v3104_v21 }
  0x68   : > { %2667 = vmatmul.mubr.msk.bf16.gmra.mrb[4].mxu0 %vm430_vm4, %v4677_v30 }
  0x69   : > { %538 = vmatprep.mubr.bf16.mxu0 %v3104_v21  ;;  %2679 = vmatmul.mubr.msk.bf16.gmra.mrb[4].mxu1 %vm430_vm4, %v4678_v33 }
  0x6a   : > { %658 = vmatprep.mubr.bf16.mxu1 %v3104_v21 }
  0x70   : > { %2668 = vmatmul.mubr.msk.bf16.gmra.mrb[8].mxu0 %vm430_vm4, %v4679_v22 }
  0x71   : > { %548 = vmatprep.mubr.bf16.mxu0 %v3104_v21  ;;  %2680 = vmatmul.mubr.msk.bf16.gmra.mrb[8].mxu1 %vm430_vm4, %v4680_v23 }
  0x72   : > { %668 = vmatprep.mubr.bf16.mxu1 %v3104_v21 }
  0x78   : > { %2669 = vmatmul.mubr.msk.bf16.gmra.mrb[12].mxu0 %vm430_vm4, %v4681_v25 }
  0x79   : > { %558 = vmatprep.mubr.bf16.mxu0 %v3104_v21  ;;  %2681 = vmatmul.mubr.msk.bf16.gmra.mrb[12].mxu1 %vm430_vm4, %v370_v54 }
  0x80   : > { %2670 = vmatmul.mubr.msk.bf16.gmra.mrb[16].mxu0 %vm430_vm4, %v4682_v20 }
  0x81   : > { %568 = vmatprep.mubr.bf16.mxu0 %v3104_v21 }
  0x88   : > { %2671 = vmatmul.mubr.msk.bf16.gmra.mrb[20].mxu0 %vm430_vm4, %v4683_v6 }
  0x89   : > { %578 = vmatprep.mubr.bf16.mxu0 %v3104_v21 }
  0x90   : > { %2672 = vmatmul.mubr.msk.bf16.gmra.mrb[24].mxu0 %vm430_vm4, %v4684_v10 }
  0x91   : > { %588 = vmatprep.mubr.bf16.mxu0 %v3104_v21 }
  0x98   : > { %2673 = vmatmul.mubr.msk.bf16.gmra.mrb[28].mxu0 %vm430_vm4, %v4685_v24 }
  0x99   : > { %598 = vmatprep.mubr.bf16.mxu0 %v3104_v21 }
  0xa0   : > { %2674 = vmatmul.mubr.msk.bf16.gmra.mrb[32].mxu0 %vm430_vm4, %v4686_v26 }
  0xa1   : > { %608 = vmatprep.mubr.bf16.mxu0 %v3104_v21 }
  0xa8   : > { %2675 = vmatmul.mubr.msk.bf16.gmra.mrb[36].mxu0 %vm430_vm4, %v4687_v27 }
  0xa9   : > { %618 = vmatprep.mubr.bf16.mxu0 %v3104_v21 }
  0xb0   : > { %2676 = vmatmul.mubr.msk.bf16.gmra.mrb[40].mxu0 %vm430_vm4, %v4688_v31 }
  0xb1   : > { %628 = vmatprep.mubr.bf16.mxu0 %v3104_v21 }
  0xb8   : > { %2677 = vmatmul.mubr.msk.bf16.gmra.mrb[44].mxu0 %vm430_vm4, %v4689_v32  ;;  %v3733_v32 = vld [vmem:[#allocation2] sm:$0xff] }
 0x133   : > { %v3637_v35 = vpop.f32.mrb[0].mxu0 }
 0x134   : > { %v3639_v36 = vpop.f32.mrb[1].mxu0 }
 0x135   : > { %v3641_v37 = vpop.f32.mrb[2].mxu0  ;;  %v683_v38 = vmax.f32 %v3637_v35, %v3639_v36 }
 0x136   : > { %v3645_v39 = vpop.f32.mrb[3].mxu0 }
 0x137   : > { %684 = vmax.xlane.f32.xlu0 %v683_v38  ;;  %v686_v40 = vmax.f32 %v3641_v37, %v3645_v39 }
 0x13b   : > { %687 = vmax.xlane.f32.xlu0 %v686_v40  ;;  %v3649_v41 = vpop.f32.mrb[4].mxu0 }
 0x13c   : > { %v3651_v42 = vpop.f32.mrb[5].mxu0 }
 0x13d   : > { %v689_v43 = vmax.f32 %v3649_v41, %v3651_v42  ;;  %v3655_v46 = vpop.f32.mrb[6].mxu0 }
 0x13e   : > { %v3657_v47 = vpop.f32.mrb[7].mxu0 }
 0x13f   : > { %690 = vmax.xlane.f32.xlu1 %v689_v43  ;;  %v692_v48 = vmax.f32 %v3655_v46, %v3657_v47  ;;  %v3738_v43 = vld [vmem:[#allocation2 + $0x8] sm:$0xff] }
 0x143   : > { %693 = vmax.xlane.f32.xlu1 %v692_v48  ;;  %v3661_v49 = vpop.f32.mrb[8].mxu0 }
 0x144   : > { %v3663_v51 = vpop.f32.mrb[9].mxu0 }
 0x145   : > { %v886_v52 = vmax.f32 %v3661_v49, %v3663_v51  ;;  %v3667_v53 = vpop.f32.mrb[10].mxu0 }
 0x146   : > { %v3669_v54 = vpop.f32.mrb[11].mxu0 }
 0x147   : > { %887 = vmax.xlane.f32.xlu1 %v886_v52  ;;  %v889_v55 = vmax.f32 %v3667_v53, %v3669_v54 }
 0x14b   : > { %890 = vmax.xlane.f32.xlu1 %v889_v55  ;;  %v3673_v57 = vpop.f32.mrb[12].mxu0 }
 0x14c   : > { %4690 = vst [vmem:[#allocation26_spill] sm:$0xff] %v3673_v57  ;;  %v3675_v58 = vpop.f32.mrb[13].mxu0 }
 0x14d   : > { %4691 = vst [vmem:[#allocation27_spill] sm:$0xff] %v3675_v58  ;;  %v892_v59 = vmax.f32 %v3673_v57, %v3675_v58  ;;  %v3679_v60 = vpop.f32.mrb[14].mxu0 }
 0x14e   : > { %v3681_v63 = vpop.f32.mrb[15].mxu0 }
 0x14f   : > { %893 = vmax.xlane.f32.xlu1 %v892_v59  ;;  %v895_v34 = vmax.f32 %v3679_v60, %v3681_v63 }
 0x153   : > { %896 = vmax.xlane.f32.xlu1 %v895_v34  ;;  %v3685_v44 = vpop.f32.mrb[16].mxu0 }
 0x154   : > { %v3687_v45 = vpop.f32.mrb[17].mxu0 }
 0x155   : > { %v1087_v50 = vmax.f32 %v3685_v44, %v3687_v45  ;;  %v3691_v56 = vpop.f32.mrb[18].mxu0 }
 0x156   : > { %v3693_v62 = vpop.f32.mrb[19].mxu0 }
 0x157   : > { %1088 = vmax.xlane.f32.xlu1 %v1087_v50  ;;  %v1090_v15 = vmax.f32 %v3691_v56, %v3693_v62  ;;  %v3748_v50 = vld [vmem:[#allocation2 + $0x10] sm:$0xff] }
 0x15b   : > { %1091 = vmax.xlane.f32.xlu1 %v1090_v15  ;;  %v3697_v11 = vpop.f32.mrb[20].mxu0 }
 0x15c   : > { %v3699_v18 = vpop.f32.mrb[21].mxu0 }
 0x15d   : > { %v1093_v19 = vmax.f32 %v3697_v11, %v3699_v18  ;;  %v3703_v21 = vpop.f32.mrb[22].mxu0 }
 0x15e   : > { %v3705_v28 = vpop.f32.mrb[23].mxu0 }
 0x15f   : > { %1094 = vmax.xlane.f32.xlu1 %v1093_v19  ;;  %v1096_v29 = vmax.f32 %v3703_v21, %v3705_v28 }
 0x163   : > { %1097 = vmax.xlane.f32.xlu1 %v1096_v29  ;;  %v3709_v30 = vpop.f32.mrb[24].mxu0 }
 0x164   : > { %4692 = vst [vmem:[#allocation28_spill] sm:$0xff] %v3709_v30  ;;  %v3711_v33 = vpop.f32.mrb[25].mxu0 }
 0x165   : > { %4693 = vst [vmem:[#allocation29_spill] sm:$0xff] %v3711_v33  ;;  %v1288_v22 = vmax.f32 %v3709_v30, %v3711_v33  ;;  %v3715_v23 = vpop.f32.mrb[26].mxu0 }
 0x166   : > { %v3717_v25 = vpop.f32.mrb[27].mxu0 }
 0x167   : > { %1289 = vmax.xlane.f32.xlu1 %v1288_v22  ;;  %v1291_v20 = vmax.f32 %v3715_v23, %v3717_v25 }
 0x16b   : > { %1292 = vmax.xlane.f32.xlu1 %v1291_v20  ;;  %v3721_v6 = vpop.f32.mrb[28].mxu0 }
 0x16c   : > { %4694 = vst [vmem:[#allocation30_spill] sm:$0xff] %v3721_v6  ;;  %v3723_v10 = vpop.f32.mrb[29].mxu0 }
 0x16d   : > { %4695 = vst [vmem:[#allocation31_spill] sm:$0xff] %v3723_v10  ;;  %v1294_v24 = vmax.f32 %v3721_v6, %v3723_v10  ;;  %v3727_v26 = vpop.f32.mrb[30].mxu0 }
 0x16e   : > { %4696 = vst [vmem:[#allocation32_spill] sm:$0xff] %v3727_v26  ;;  %v3729_v27 = vpop.f32.mrb[31].mxu0 }
 0x16f   : > { %4697 = vst [vmem:[#allocation33_spill] sm:$0xff] %v3729_v27  ;;  %1295 = vmax.xlane.f32.xlu1 %v1294_v24 }
 0x173   : > { %v600_v55 = vpop.f32.mrb[32].mxu0 }
 0x174   : > { %v602_v34 = vpop.f32.mrb[33].mxu0 }
 0x175   : > { %v604_v15 = vpop.f32.mrb[34].mxu0 }
 0x176   : > { %v606_v19 = vpop.f32.mrb[35].mxu0  ;;  %v788_v22 = vpack.c.bf16 %v604_v15, %v600_v55  ;;  %v3766_v15 = vld [vmem:[#allocation2 + $0x20] sm:$0xff] }
 0x177   : > { %v789_v20 = vpack.c.bf16 %v606_v19, %v602_v34 }
 0x179   : > { %792 = vmatprep.subr.bf16.mxu1 %v789_v20 }
 0x17a   : > { %793 = vmatpush1.bf16.xpose.msra.mxu1 %v788_v22 }
 0x17b   : > { %v610_v31 = vpop.f32.mrb[36].mxu0 }
 0x17c   : > { %v612_v34 = vpop.f32.mrb[37].mxu0 }
 0x17d   : > { %v614_v19 = vpop.f32.mrb[38].mxu0 }
 0x17e   : > { %v616_v20 = vpop.f32.mrb[39].mxu0  ;;  %v790_v22 = vpack.c.bf16 %v614_v19, %v610_v31 }
 0x17f   : > { %v791_v17 = vpack.c.bf16 %v616_v20, %v612_v34 }
 0x181   : > { %794 = vmatprep.subr.bf16.mxu1 %v791_v17 }
 0x182   : > { %795 = vmatpush1.bf16.xpose.msra.mxu1 %v790_v22 }
 0x183   : > { %v3783_v9 = vpop.f32.mrb[40].mxu0 }
 0x184   : > { %v622_v34 = vpop.f32.mrb[41].mxu0 }
 0x185   : > { %v3788_v19 = vpop.f32.mrb[42].mxu0 }
 0x186   : > { %v626_v17 = vpop.f32.mrb[43].mxu0 }
 0x187   : > { %v991_v12 = vpack.c.bf16 %v626_v17, %v622_v34  ;;  %v3809_v34 = vld [vmem:[#allocation2 + $0x40] sm:$0xff] }
 0x188   : > { %4700 = vst [vmem:[#allocation36_spill] sm:$0xff] %v3809_v34 }
 0x189   : > { %994 = vmatprep.subr.bf16.mxu1 %v991_v12  ;;  %v4702_v12 = vmax.f32 %v3727_v26, %v3729_v27  ;;  %v3851_v26 = vld [vmem:[#allocation2 + $0x60] sm:$0xff] }
 0x18a   : > { %4707 = vst [vmem:[#allocation42_spill] sm:$0xff] %v3851_v26 }
 0x18b   : > { %v3802_v4 = vpop.f32.mrb[44].mxu0 }
 0x18c   : > { %v3807_v14 = vpop.f32.mrb[45].mxu0 }
 0x18d   : > { %v3811_v17 = vpop.f32.mrb[46].mxu0 }
 0x1c4   : > { %v685_v38 = vpop.xlane.xlu0 %684 }
 0x1c5   : > { %v3736_v40 = vmax.f32 %v3733_v32, %v685_v38  ;;  %v3756_v38 = vld [vmem:[#allocation2 + $0x18] sm:$0xff] }
 0x1c7   : > { %878 = vst.msk [vmem:[#allocation2] sm:$0xff] %vm779_vm5, %v3736_v40  ;;  %713 = vperm.xlu0 %2790, %v3736_v40  }
 0x1c8   : > { %v688_v52 = vpop.xlane.xlu0 %687 }
 0x1c9   : > { %v3746_v59 = vmax.f32 %v3738_v43, %v688_v52 }
 0x1cb   : > { %879 = vst.msk [vmem:[#allocation2 + $0x8] sm:$0xff] %vm779_vm5, %v3746_v59  ;;  %718 = vperm.xlu1 %2791, %v3746_v59   ;;  %v700_v10 = vsub.f32 %v3738_v43, %v3746_v59 }
 0x1cc   : > { %v691_v29 = vpop.xlane.xlu1 %690 }
 0x1cd   : > { %v3754_v24 = vmax.f32 %v3748_v50, %v691_v29 }
 0x1cf   : > { %880 = vst.msk [vmem:[#allocation2 + $0x10] sm:$0xff] %vm779_vm5, %v3754_v24  ;;  %723 = vperm.xlu1 %2791, %v3754_v24  }
 0x1d0   : > { %v694_v48 = vpop.xlane.xlu1 %693 }
 0x1d1   : > { %v3764_v55 = vmax.f32 %v3756_v38, %v694_v48  ;;  %v3776_v48 = vld [vmem:[#allocation2 + $0x28] sm:$0xff] }
 0x1d3   : > { %881 = vst.msk [vmem:[#allocation2 + $0x18] sm:$0xff] %vm779_vm5, %v3764_v55  ;;  %728 = vperm.xlu1 %2791, %v3764_v55  }
 0x1d4   : > { %v888_v52 = vpop.xlane.xlu1 %887 }
 0x1d5   : > { %v3774_v13 = vmax.f32 %v3766_v15, %v888_v52  ;;  %v3786_v52 = vld [vmem:[#allocation2 + $0x30] sm:$0xff] }
 0x1d7   : > { %1079 = vst.msk [vmem:[#allocation2 + $0x20] sm:$0xff] %vm779_vm5, %v3774_v13  ;;  %916 = vperm.xlu1 %2791, %v3774_v13  }
 0x1d8   : > { %v891_v29 = vpop.xlane.xlu1 %890 }
 0x1d9   : > { %v899_v31 = vmax.f32 %v3776_v48, %v891_v29  ;;  %v3820_v29 = vpop.f32.mrb[47].mxu0 }
 0x1db   : > { %1080 = vst.msk [vmem:[#allocation2 + $0x28] sm:$0xff] %vm779_vm5, %v899_v31  ;;  %921 = vperm.xlu1 %2791, %v899_v31  }
 0x1dc   : > { %v894_v20 = vpop.xlane.xlu1 %893 }
 0x1dd   : > { %v3794_v22 = vmax.f32 %v3786_v52, %v894_v20 }
 0x1df   : > { %1081 = vst.msk [vmem:[#allocation2 + $0x30] sm:$0xff] %vm779_vm5, %v3794_v22 }
 0x1e0   : > { %v897_v8 = vpop.xlane.xlu1 %896 }
 0x1e1   : > { %v3805_v5 = vmax.f32 %v3796_v7, %v897_v8 }
 0x1e3   : > { %4699 = vst [vmem:[#allocation35_spill] sm:$0xff] %v3805_v5  ;;  %1082 = vst.msk [vmem:[#allocation2 + $0x38] sm:$0xff] %vm779_vm5, %v3805_v5  ;;  %931 = vperm.xlu1 %2791, %v3805_v5  }
 0x1e4   : > { %v1089_v8 = vpop.xlane.xlu1 %1088 }
 0x1e5   : > { %v3825_v3 = vmax.f32 %v3809_v34, %v1089_v8 }
 0x1e6   : > { %1298 = vmax.xlane.f32.xlu0 %v4702_v12  ;;  %v3841_v12 = vld [vmem:[#allocation2 + $0x58] sm:$0xff] }
 0x1e7   : > { %4701 = vst [vmem:[#allocation37_spill] sm:$0xff] %v3825_v3  ;;  %1280 = vst.msk [vmem:[#allocation2 + $0x40] sm:$0xff] %vm779_vm5, %v3825_v3  ;;  %1117 = vperm.xlu1 %2791, %v3825_v3   ;;  %v3873_v3 = vld [vmem:[#allocation2 + $0x70] sm:$0xff] }
 0x1e8   : > { %v1092_v20 = vpop.xlane.xlu1 %1091  ;;  %4705 = vst [vmem:[#allocation40_spill] sm:$0xff] %v3841_v12  ;;  %4711 = vst [vmem:[#allocation46_spill] sm:$0xff] %v3873_v3 }
 0x1e9   : > { %v1100_v61 = vmax.f32 %v1084_v0, %v1092_v20 }
 0x1eb   : > { %1281 = vst.msk [vmem:[#allocation2 + $0x48] sm:$0xff] %vm779_vm5, %v1100_v61  ;;  %1122 = vperm.xlu1 %2791, %v1100_v61  }
 0x1ec   : > { %v1095_v8 = vpop.xlane.xlu1 %1094 }
 0x1ed   : > { %v3839_v2 = vmax.f32 %v3835_v16, %v1095_v8 }
 0x1ef   : > { %4704 = vst [vmem:[#allocation39_spill] sm:$0xff] %v3839_v2  ;;  %1282 = vst.msk [vmem:[#allocation2 + $0x50] sm:$0xff] %vm779_vm5, %v3839_v2  ;;  %1127 = vperm.xlu1 %2791, %v3839_v2   ;;  %v3863_v2 = vld [vmem:[#allocation2 + $0x68] sm:$0xff] }
 0x1f0   : > { %v1098_v20 = vpop.xlane.xlu1 %1097  ;;  %4709 = vst [vmem:[#allocation44_spill] sm:$0xff] %v3863_v2 }
 0x1f1   : > { %v3849_v27 = vmax.f32 %v3841_v12, %v1098_v20  ;;  %v903_v20 = vsub.f32 %v3776_v48, %v899_v31  ;;  %v705_v12 = vmul.f32 1.442695, %v700_v10 }
 0x1f3   : > { %4706 = vst [vmem:[#allocation41_spill] sm:$0xff] %v3849_v27  ;;  %1283 = vst.msk [vmem:[#allocation2 + $0x58] sm:$0xff] %vm779_vm5, %v3849_v27  ;;  %1132 = vperm.xlu1 %2791, %v3849_v27   ;;  %v908_v43 = vmul.f32 1.442695, %v903_v20  ;;  %2792 = vpow2.f32 %v705_v12 }
 0x1f4   : > { %v1290_v1 = vpop.xlane.xlu1 %1289 }
 0x1f5   : > { %v3861_v6 = vmax.f32 %v3851_v26, %v1290_v1  ;;  %v1104_v1 = vsub.f32 %v1084_v0, %v1100_v61  ;;  %2794 = vpow2.f32 %v908_v43  ;;  %v3889_v61 = vpop.f32.mrb[0].mxu1 }
 0x1f7   : > { %4708 = vst [vmem:[#allocation43_spill] sm:$0xff] %v3861_v6  ;;  %1481 = vst.msk [vmem:[#allocation2 + $0x60] sm:$0xff] %vm779_vm5, %v3861_v6  ;;  %v1109_v31 = vmul.f32 1.442695, %v1104_v1 }
 0x1f8   : > { %v1293_v8 = vpop.xlane.xlu1 %1292 }
 0x1f9   : > { %v3871_v27 = vmax.f32 %v3863_v2, %v1293_v8  ;;  %2796 = vpow2.f32 %v1109_v31  ;;  %v3891_v8 = vpop.f32.mrb[1].mxu1 }
 0x1fa   : > { %v3894_v12 = vpop.f32.mrb[2].mxu1 }
 0x1fb   : > { %4710 = vst [vmem:[#allocation45_spill] sm:$0xff] %v3871_v27  ;;  %1482 = vst.msk [vmem:[#allocation2 + $0x68] sm:$0xff] %vm779_vm5, %v3871_v27  ;;  %1323 = vperm.xlu1 %2791, %v3871_v27   ;;  %v3898_v43 = vpop.f32.mrb[3].mxu1 }
 0x1fc   : > { %926 = vperm.xlu0 %2790, %v3794_v22   ;;  %v1296_v48 = vpop.xlane.xlu1 %1295  ;;  %v3907_v31 = vpop.f32.mrb[4].mxu1 }
 0x1fd   : > { %v3882_v10 = vmax.f32 %v3873_v3, %v1296_v48  ;;  %v3902_v48 = vpop.eup %2792  ;;  %v3909_v0 = vpop.f32.mrb[5].mxu1 }
 0x1fe   : > { %4713 = vst [vmem:[#allocation48_spill] sm:$0xff] %v3902_v48  ;;  %v3911_v16 = vpop.f32.mrb[6].mxu1 }
 0x1ff   : > { %4712 = vst [vmem:[#allocation47_spill] sm:$0xff] %v3882_v10  ;;  %1483 = vst.msk [vmem:[#allocation2 + $0x70] sm:$0xff] %vm779_vm5, %v3882_v10  ;;  %v3905_v59 = vpop.eup %2794  ;;  %v3916_v27 = vpop.f32.mrb[7].mxu1 }
 0x200   : > { %1318 = vperm.xlu0 %2790, %v3861_v6   ;;  %4714 = vst [vmem:[#allocation49_spill] sm:$0xff] %v3905_v59  ;;  %v3923_v2 = vpop.f32.mrb[8].mxu1 }
 0x201   : > { %4716 = vst [vmem:[#allocation51_spill] sm:$0xff] %v3923_v2 }
 0x203   : > { %v3918_v1 = vpop.eup %2796 }
 0x204   : > { %1328 = vperm.xlu0 %2790, %v3882_v10   ;;  %4715 = vst [vmem:[#allocation50_spill] sm:$0xff] %v3918_v1  ;;  %v3925_v10 = vpop.f32.mrb[9].mxu1 }
 0x205   : > { %v3927_v3 = vpop.f32.mrb[10].mxu1 }
 0x206   : > { %4717 = vst [vmem:[#allocation52_spill] sm:$0xff] %v3927_v3  ;;  %v3931_v6 = vpop.f32.mrb[11].mxu1 }
 0x207   : > { %v3935_v26 = vpop.f32.mrb[12].mxu1 }
 0x208   : > { %852 = vperm.xlu0 %2790, %v3902_v48   ;;  %4718 = vst [vmem:[#allocation53_spill] sm:$0xff] %v3935_v26  ;;  %v3937_v34 = vpop.f32.mrb[13].mxu1 }
 0x209   : > { %4719 = vst [vmem:[#allocation54_spill] sm:$0xff] %v3937_v34  ;;  %v3939_v48 = vpop.f32.mrb[14].mxu1 }
 0x20a   : > { %4720 = vst [vmem:[#allocation55_spill] sm:$0xff] %v3939_v48  ;;  %v3943_v33 = vpop.f32.mrb[15].mxu1 }
 0x20c   : > { %1054 = vperm.xlu0 %2790, %v3905_v59  }
 0x210   : > { %1255 = vperm.xlu0 %2790, %v3918_v1  }
 0x246   : > { %v714_v59 = vpop.permute.xlu0 %713 }
 0x247   : > { %v731_v2 = vsub.f32 %v3637_v35, %v714_v59  ;;  %v732_v3 = vsub.f32 %v3639_v36, %v714_v59 }
 0x249   : > { %v739_v20 = vmul.f32 1.442695, %v731_v2  ;;  %v741_v5 = vmul.f32 1.442695, %v732_v3 }
 0x24a   : > { %v719_v7 = vpop.permute.xlu1 %718 }
 0x24b   : > { %2798 = vpow2.f32 %v739_v20  ;;  %v733_v58 = vsub.f32 %v3641_v37, %v719_v7  ;;  %v734_v57 = vsub.f32 %v3645_v39, %v719_v7 }
 0x24c   : > { %2800 = vpow2.f32 %v741_v5 }
 0x24d   : > { %v743_v1 = vmul.f32 1.442695, %v733_v58  ;;  %v745_v26 = vmul.f32 1.442695, %v734_v57 }
 0x24e   : > { %v724_v48 = vpop.permute.xlu1 %723 }
 0x24f   : > { %2802 = vpow2.f32 %v743_v1  ;;  %v735_v30 = vsub.f32 %v3649_v41, %v724_v48  ;;  %v736_v34 = vsub.f32 %v3651_v42, %v724_v48 }
 0x250   : > { %2804 = vpow2.f32 %v745_v26 }
 0x251   : > { %v747_v35 = vmul.f32 1.442695, %v735_v30  ;;  %v749_v36 = vmul.f32 1.442695, %v736_v34 }
 0x252   : > { %v729_v2 = vpop.permute.xlu1 %728 }
 0x253   : > { %2806 = vpow2.f32 %v747_v35  ;;  %v737_v3 = vsub.f32 %v3655_v46, %v729_v2  ;;  %v738_v37 = vsub.f32 %v3657_v47, %v729_v2 }
 0x254   : > { %2808 = vpow2.f32 %v749_v36 }
 0x255   : > { %v2799_v7 = vpop.eup %2798  ;;  %v751_v5 = vmul.f32 1.442695, %v737_v3  ;;  %v753_v39 = vmul.f32 1.442695, %v738_v37  ;;  %v4721_v37 = vpack.c.bf16 %v3788_v19, %v3783_v9 }
 0x256   : > { %v2801_v57 = vpop.eup %2800  ;;  %v917_v58 = vpop.permute.xlu1 %916 }
 0x257   : > { %2810 = vpow2.f32 %v751_v5  ;;  %v934_v41 = vsub.f32 %v3661_v49, %v917_v58  ;;  %v935_v42 = vsub.f32 %v3663_v51, %v917_v58  ;;  %v763_v26 = vadd.f32 %v2801_v57, %v2799_v7 }
 0x258   : > { %2812 = vpow2.f32 %v753_v39 }
 0x259   : > { %v2803_v30 = vpop.eup %2802  ;;  %v942_v34 = vmul.f32 1.442695, %v934_v41  ;;  %v944_v59 = vmul.f32 1.442695, %v935_v42  ;;  %764 = vadd.xlane.f32.xlu0 %v763_v26 }
 0x25a   : > { %v2805_v46 = vpop.eup %2804  ;;  %v922_v20 = vpop.permute.xlu1 %921  ;;  %v784_v47 = vpack.c.bf16 %v2803_v30, %v2799_v7 }
 0x25b   : > { %2814 = vpow2.f32 %v942_v34  ;;  %v936_v1 = vsub.f32 %v3667_v53, %v922_v20  ;;  %v937_v48 = vsub.f32 %v3669_v54, %v922_v20  ;;  %v785_v35 = vpack.c.bf16 %v2805_v46, %v2801_v57 }
 0x25c   : > { %2816 = vpow2.f32 %v944_v59  ;;  %v3959_v36 = vadd.f32 %v2805_v46, %v2803_v30  ;;  %v4722_v53 = vpack.c.bf16 %v3820_v29, %v3807_v14  ;;  %v4724_v46 = vpack.c.bf16 %v3898_v43, %v3891_v8 }
 0x25d   : > { %v2807_v49 = vpop.eup %2806  ;;  %v946_v51 = vmul.f32 1.442695, %v936_v1  ;;  %v948_v2 = vmul.f32 1.442695, %v937_v48  ;;  %824 = vmatprep.mubr.bf16.mxu1 %v785_v35 }
 0x25e   : > { %v2809_v3 = vpop.eup %2808  ;;  %825 = vmatmul.mubr.bf16.vlgmr.msra.gmra.mrb[16].mxu1 %v784_v47 }
 0x25f   : > { %2818 = vpow2.f32 %v946_v51  ;;  %995 = vmatpush1.bf16.xpose.msra.mxu1 %v4721_v37  ;;  %v769_v7 = vadd.f32 %v2809_v3, %v2807_v49 }
 0x260   : > { %2820 = vpow2.f32 %v948_v2  ;;  %996 = vmatprep.subr.bf16.mxu1 %v4722_v53 }
 0x261   : > { %v2811_v54 = vpop.eup %2810  ;;  %770 = vadd.xlane.f32.xlu0 %v769_v7  ;;  %v4728_v7 = vpack.c.bf16 %v3916_v27, %v3909_v0 }
 0x262   : > { %v2813_v5 = vpop.eup %2812  ;;  %v932_v39 = vpop.permute.xlu1 %931  ;;  %v786_v57 = vpack.c.bf16 %v2811_v54, %v2807_v49 }
 0x263   : > { %v940_v58 = vsub.f32 %v3679_v60, %v932_v39  ;;  %v941_v41 = vsub.f32 %v3681_v63, %v932_v39  ;;  %v772_v42 = vadd.f32 %v2813_v5, %v2811_v54  ;;  %v787_v26 = vpack.c.bf16 %v2813_v5, %v2809_v3  ;;  %v3997_v54 = vld [vmem:[#allocation2 + $0x78] sm:$0xff] }
 0x264   : > { %v4723_v60 = vpack.c.bf16 %v3811_v17, %v3802_v4  ;;  %v4726_v3 = vsub.f32 %v3748_v50, %v3754_v24 }
 0x265   : > { %v2815_v30 = vpop.eup %2814  ;;  %v954_v9 = vmul.f32 1.442695, %v940_v58  ;;  %v956_v19 = vmul.f32 1.442695, %v941_v41  ;;  %773 = vadd.xlane.f32.xlu0 %v772_v42  ;;  %832 = vmatprep.mubr.bf16.mxu1 %v787_v26  ;;  %v4731_v26 = vpack.c.bf16 %v3911_v16, %v3907_v31  ;;  %v4733_v16 = vsub.f32 %v3786_v52, %v3794_v22  ;;  %v4734_v22 = vld [vmem:[#allocation26_spill] sm:$0xff] }
 0x266   : > { %v2817_v34 = vpop.eup %2816  ;;  %833 = vmatmul.mubr.bf16.gmra.mrb[20].mxu1 %v786_v57  ;;  %v1118_v14 = vpop.permute.xlu1 %1117 }
 0x267   : > { %2822 = vpow2.f32 %v954_v9  ;;  %v1135_v29 = vsub.f32 %v3685_v44, %v1118_v14  ;;  %v1136_v59 = vsub.f32 %v3687_v45, %v1118_v14  ;;  %997 = vmatpush1.bf16.xpose.msra.mxu1 %v4723_v60  ;;  %v966_v63 = vadd.f32 %v2817_v34, %v2815_v30 }
 0x268   : > { %2824 = vpow2.f32 %v956_v19  ;;  %1195 = vmatprep.subr.bf16.mxu1 %v4724_v46  ;;  %v4725_v44 = vsub.f32 %v3733_v32, %v3736_v40  ;;  %v707_v32 = vmul.f32 1.442695, %v4726_v3  ;;  %v910_v31 = vmul.f32 1.442695, %v4733_v16  ;;  %v4735_v46 = vld [vmem:[#allocation27_spill] sm:$0xff] }
 0x269   : > { %v2819_v20 = vpop.eup %2818  ;;  %v1143_v47 = vmul.f32 1.442695, %v1135_v29  ;;  %v1145_v1 = vmul.f32 1.442695, %v1136_v59  ;;  %967 = vadd.xlane.f32.xlu0 %v966_v63 }
 0x26a   : > { %v2821_v48 = vpop.eup %2820  ;;  %v703_v35 = vmul.f32 1.442695, %v4725_v44  ;;  %v1123_v45 = vpop.permute.xlu1 %1122  ;;  %v986_v49 = vpack.c.bf16 %v2819_v20, %v2815_v30 }
 0x26b   : > { %2826 = vpow2.f32 %v1143_v47  ;;  %v1137_v4 = vsub.f32 %v3691_v56, %v1123_v45  ;;  %v1138_v17 = vsub.f32 %v3693_v62, %v1123_v45  ;;  %v987_v51 = vpack.c.bf16 %v2821_v48, %v2817_v34  ;;  %v4737_v45 = vld [vmem:[#allocation35_spill] sm:$0xff] }
 0x26c   : > { %2828 = vpow2.f32 %v1145_v1  ;;  %v3982_v8 = vadd.f32 %v2821_v48, %v2819_v20  ;;  %v4727_v62 = vpack.c.bf16 %v3894_v12, %v3889_v61 }
 0x26d   : > { %v1147_v43 = vmul.f32 1.442695, %v1137_v4  ;;  %v1149_v2 = vmul.f32 1.442695, %v1138_v17  ;;  %1026 = vmatprep.mubr.bf16.mxu1 %v987_v51  ;;  %2830 = vpow2.f32 %v703_v35  ;;  %v4736_v35 = vld [vmem:[#allocation34_spill] sm:$0xff] }
 0x26e   : > { %1027 = vmatmul.mubr.bf16.vlgmr.msra.gmra.mrb[24].mxu1 %v986_v49  ;;  %v1128_v40 = vpop.permute.xlu1 %1127  ;;  %v4738_v49 = vsub.f32 %v4736_v35, %v4737_v45  ;;  %v4751_v35 = vld [vmem:[#allocation43_spill] sm:$0xff] }
 0x26f   : > { %2832 = vpow2.f32 %v1147_v43  ;;  %v1139_v37 = vsub.f32 %v3697_v11, %v1128_v40  ;;  %v1140_v56 = vsub.f32 %v3699_v18, %v1128_v40  ;;  %1196 = vmatpush1.bf16.xpose.msra.mxu1 %v4727_v62  ;;  %v4729_v11 = vsub.f32 %v3756_v38, %v3764_v55 }
 0x270   : > { %2834 = vpow2.f32 %v1149_v2  ;;  %1197 = vmatprep.subr.bf16.mxu1 %v4728_v7  ;;  %v912_v4 = vmul.f32 1.442695, %v4738_v49  ;;  %v4739_v2 = vld [vmem:[#allocation28_spill] sm:$0xff] }
 0x271   : > { %v3995_v53 = vpop.eup %2822  ;;  %v1151_v50 = vmul.f32 1.442695, %v1139_v37  ;;  %v1153_v24 = vmul.f32 1.442695, %v1140_v56  ;;  %2836 = vpow2.f32 %v707_v32  ;;  %v709_v18 = vmul.f32 1.442695, %v4729_v11 }
 0x272   : > { %v3999_v5 = vpop.eup %2824  ;;  %v1133_v61 = vpop.permute.xlu1 %1132  ;;  %v4740_v32 = vld [vmem:[#allocation29_spill] sm:$0xff] }
 0x273   : > { %2838 = vpow2.f32 %v1151_v50  ;;  %v1141_v12 = vsub.f32 %v3703_v21, %v1133_v61  ;;  %v1142_v27 = vsub.f32 %v3705_v28, %v1133_v61  ;;  %v1299_v0 = vpop.xlane.xlu0 %1298  ;;  %v4008_v39 = vadd.f32 %v3999_v5, %v3995_v53  ;;  %v4742_v11 = vld [vmem:[#allocation37_spill] sm:$0xff] }
 0x274   : > { %2840 = vpow2.f32 %v1153_v24  ;;  %v4011_v57 = vmax.f32 %v3997_v54, %v1299_v0  ;;  %v4730_v21 = vsub.f32 %v3766_v15, %v3774_v13  ;;  %v4732_v13 = vpack.c.bf16 %v3931_v6, %v3925_v10  ;;  %v4741_v24 = vld [vmem:[#allocation36_spill] sm:$0xff] }
 0x275   : > { %v4013_v58 = vpop.eup %2826  ;;  %v1155_v41 = vmul.f32 1.442695, %v1141_v12  ;;  %v1157_v38 = vmul.f32 1.442695, %v1142_v27  ;;  %2842 = vpow2.f32 %v709_v18  ;;  %v4743_v18 = vsub.f32 %v4741_v24, %v4742_v11 }
 0x276   : > { %v4015_v55 = vpop.eup %2828  ;;  %v906_v28 = vmul.f32 1.442695, %v4730_v21  ;;  %v1307_v42 = vsub.f32 %v3997_v54, %v4011_v57  ;;  %1484 = vst.msk [vmem:[#allocation2 + $0x78] sm:$0xff] %vm779_vm5, %v4011_v57  ;;  %1333 = vperm.xlu1 %2791, %v4011_v57  }
 0x277   : > { %2844 = vpow2.f32 %v1155_v41  ;;  %1198 = vmatpush1.bf16.xpose.msra.mxu1 %v4731_v26  ;;  %v4030_v30 = vadd.f32 %v4015_v55, %v4013_v58  ;;  %v4032_v9 = vpop.eup %2830  ;;  %v1107_v61 = vmul.f32 1.442695, %v4743_v18  ;;  %v4744_v41 = vld [vmem:[#allocation38_spill] sm:$0xff] }
 0x278   : > { %2846 = vpow2.f32 %v1157_v38  ;;  %1396 = vmatprep.subr.bf16.mxu1 %v4732_v13  ;;  %v4745_v38 = vld [vmem:[#allocation39_spill] sm:$0xff] }
 0x279   : > { %v4037_v15 = vpop.eup %2832  ;;  %2848 = vpow2.f32 %v906_v28  ;;  %v4746_v21 = vsub.f32 %v4744_v41, %v4745_v38 }
 0x27a   : > { %v4039_v19 = vpop.eup %2834  ;;  %v1324_v34 = vpop.permute.xlu1 %1323  ;;  %847 = vperm.xlu1 %2791, %v4032_v9   ;;  %v1187_v14 = vpack.c.bf16 %v4037_v15, %v4013_v58  ;;  %2850 = vpow2.f32 %v910_v31 }
 0x27b   : > { %v1338_v29 = vsub.f32 %v3715_v23, %v1324_v34  ;;  %v1339_v6 = vsub.f32 %v3717_v25, %v1324_v34  ;;  %v927_v10 = vpop.permute.xlu0 %926  ;;  %v1188_v59 = vpack.c.bf16 %v4039_v19, %v4015_v55  ;;  %v4053_v60 = vadd.f32 %v4039_v19, %v4037_v15  ;;  %v4055_v52 = vpop.eup %2836  ;;  %v4747_v34 = vld [vmem:[#allocation40_spill] sm:$0xff]  ;;  %v4760_v15 = vld [vmem:[#allocation55_spill] sm:$0xff] }
 0x27c   : > { %v938_v63 = vsub.f32 %v4734_v22, %v927_v10  ;;  %v939_v20 = vsub.f32 %v4735_v46, %v927_v10  ;;  %v1111_v28 = vmul.f32 1.442695, %v4746_v21  ;;  %v4755_v19 = vld [vmem:[#allocation52_spill] sm:$0xff]  ;;  %v755_v21 = vld [vmem:[#allocation3] sm:$0xff] }
 0x27d   : > { %v4059_v47 = vpop.eup %2838  ;;  %v1348_v1 = vmul.f32 1.442695, %v1338_v29  ;;  %v1350_v23 = vmul.f32 1.442695, %v1339_v6  ;;  %v4748_v29 = vld [vmem:[#allocation41_spill] sm:$0xff] }
 0x27e   : > { %v4061_v48 = vpop.eup %2840  ;;  %v950_v25 = vmul.f32 1.442695, %v938_v63  ;;  %v952_v44 = vmul.f32 1.442695, %v939_v20  ;;  %857 = vperm.xlu1 %2791, %v4055_v52   ;;  %v4749_v6 = vsub.f32 %v4747_v34, %v4748_v29 }
 0x27f   : > { %2852 = vpow2.f32 %v1348_v1  ;;  %v1319_v17 = vpop.permute.xlu0 %1318  ;;  %v4069_v51 = vadd.f32 %v4061_v48, %v4059_v47  ;;  %v4071_v43 = vpop.eup %2842 }
 0x280   : > { %2854 = vpow2.f32 %v1350_v23  ;;  %v1336_v3 = vsub.f32 %v4739_v2, %v1319_v17  ;;  %v1337_v40 = vsub.f32 %v4740_v32, %v1319_v17  ;;  %v1113_v10 = vmul.f32 1.442695, %v4749_v6 }
 0x281   : > { %v4075_v37 = vpop.eup %2844  ;;  %2856 = vpow2.f32 %v950_v25 }
 0x282   : > { %v2847_v56 = vpop.eup %2846  ;;  %2858 = vpow2.f32 %v952_v44  ;;  %v1344_v62 = vmul.f32 1.442695, %v1336_v3  ;;  %v1346_v7 = vmul.f32 1.442695, %v1337_v40  ;;  %862 = vperm.xlu1 %2791, %v4071_v43   ;;  %v1189_v50 = vpack.c.bf16 %v4075_v37, %v4059_v47  ;;  %v4750_v44 = vld [vmem:[#allocation42_spill] sm:$0xff] }
 0x283   : > { %2860 = vpow2.f32 %v912_v4  ;;  %v1190_v12 = vpack.c.bf16 %v2847_v56, %v4061_v48  ;;  %v1176_v27 = vadd.f32 %v2847_v56, %v4075_v37  ;;  %v4085_v0 = vpop.eup %2848  ;;  %v1329_v46 = vpop.permute.xlu0 %1328  ;;  %v4752_v45 = vsub.f32 %v4750_v44, %v4751_v35  ;;  %v4753_v4 = vld [vmem:[#allocation30_spill] sm:$0xff] }
 0x284   : > { %2862 = vpow2.f32 %v1344_v62  ;;  %v4091_v26 = vpop.eup %2850  ;;  %v1340_v17 = vsub.f32 %v4753_v4, %v1329_v46 }
 0x285   : > { %2864 = vpow2.f32 %v1346_v7  ;;  %v1308_v49 = vmul.f32 1.442695, %v4752_v45 }
 0x286   : > { %1049 = vperm.xlu1 %2791, %v4085_v0   ;;  %2866 = vpow2.f32 %v1107_v61  ;;  %v1352_v37 = vmul.f32 1.442695, %v1340_v17  ;;  %v4769_v17 = vld [vmem:[#allocation45_spill] sm:$0xff] }
 0x287   : > { %2868 = vpow2.f32 %v1111_v28  ;;  %v4146_v41 = vpop.permute.xlu0 %852  ;;  %v759_v28 = vmul.f32 %v4032_v9, %v755_v21 }
 0x288   : > { %2870 = vpow2.f32 %v1113_v10  ;;  %v958_v10 = vld [vmem:[#allocation3 + $0x20] sm:$0xff] }
 0x289   : > { %v2853_v13 = vpop.eup %2852  ;;  %2872 = vpow2.f32 %v1308_v49 }
 0x28a   : > { %v2855_v16 = vpop.eup %2854  ;;  %1059 = vperm.xlu1 %2791, %v4091_v26   ;;  %2874 = vpow2.f32 %v1352_v37 }
 0x28b   : > { %v2857_v31 = vpop.eup %2856  ;;  %v1371_v22 = vadd.f32 %v2855_v16, %v2853_v13  ;;  %v4148_v38 = vpop.permute.xlu0 %1054 }
 0x28c   : > { %v2859_v63 = vpop.eup %2858  ;;  %v988_v20 = vpack.c.bf16 %v3995_v53, %v2857_v31  ;;  %v4754_v53 = vld [vmem:[#allocation31_spill] sm:$0xff] }
 0x28d   : > { %v4098_v47 = vpop.eup %2860  ;;  %v972_v1 = vadd.f32 %v2859_v63, %v2857_v31  ;;  %v989_v23 = vpack.c.bf16 %v3999_v5, %v2859_v63  ;;  %v1341_v3 = vsub.f32 %v4754_v53, %v1329_v46  ;;  %v758_v31 = vld [vmem:[#allocation3 + $0x18] sm:$0xff]  ;;  %v962_v63 = vmul.f32 %v4085_v0, %v958_v10  ;;  %v4766_v46 = vld [vmem:[#allocation32_spill] sm:$0xff] }
 0x28e   : > { %v2863_v48 = vpop.eup %2862  ;;  %1064 = vperm.xlu1 %2791, %v4098_v47   ;;  %v762_v29 = vmul.f32 %v4071_v43, %v758_v31  ;;  %v4768_v0 = vld [vmem:[#allocation44_spill] sm:$0xff] }
 0x28f   : > { %v2865_v25 = vpop.eup %2864  ;;  %973 = vadd.xlane.f32.xlu0 %v972_v1  ;;  %1034 = vmatprep.mubr.bf16.mxu1 %v989_v23  ;;  %v1388_v2 = vpack.c.bf16 %v2853_v13, %v2863_v48  ;;  %v1354_v56 = vmul.f32 1.442695, %v1341_v3  ;;  %v4767_v1 = vld [vmem:[#allocation33_spill] sm:$0xff]  ;;  %v1362_v31 = vld [vmem:[#allocation3 + $0x70] sm:$0xff] }
 0x290   : > { %1035 = vmatmul.mubr.bf16.gmra.mrb[28].mxu1 %v988_v20  ;;  %v1389_v32 = vpack.c.bf16 %v2855_v16, %v2865_v25  ;;  %v1368_v40 = vadd.f32 %v2865_v25, %v2863_v48  ;;  %v4107_v5 = vpop.eup %2866 }
 0x291   : > { %1227 = vmatprep.mubr.bf16.mxu1 %v1188_v59  ;;  %v4114_v62 = vpop.eup %2868  ;;  %2876 = vpow2.f32 %v1354_v56  ;;  %v4756_v59 = vld [vmem:[#allocation51_spill] sm:$0xff] }
 0x292   : > { %1250 = vperm.xlu1 %2791, %v4107_v5   ;;  %v4121_v55 = vpop.eup %2870  ;;  %v4757_v7 = vpack.c.bf16 %v4755_v19, %v4756_v59  ;;  %v961_v19 = vld [vmem:[#allocation3 + $0x38] sm:$0xff] }
 0x293   : > { %976 = vadd.xlane.f32.xlu0 %v4008_v39  ;;  %v4758_v39 = vld [vmem:[#allocation54_spill] sm:$0xff] }
 0x294   : > { %v4759_v24 = vpack.c.bf16 %v3943_v33, %v4758_v39  ;;  %v4763_v33 = vld [vmem:[#allocation46_spill] sm:$0xff]  ;;  %v965_v39 = vmul.f32 %v4098_v47, %v961_v19 }
 0x296   : > { %1260 = vperm.xlu1 %2791, %v4114_v62  }
 0x297   : > { %1168 = vadd.xlane.f32.xlu0 %v4030_v30  ;;  %v4131_v30 = vpop.eup %2872 }
 0x298   : > { %1228 = vmatmul.mubr.bf16.vlgmr.msra.gmra.mrb[32].mxu1 %v1187_v14  ;;  %v2875_v58 = vpop.eup %2874  ;;  %v4761_v14 = vld [vmem:[#allocation53_spill] sm:$0xff] }
 0x299   : > { %1235 = vmatprep.mubr.bf16.mxu1 %v1190_v12  ;;  %1397 = vmatpush1.bf16.xpose.msra.mxu1 %v4757_v7  ;;  %v4762_v11 = vpack.c.bf16 %v4760_v15, %v4761_v14 }
 0x29a   : > { %1265 = vperm.xlu1 %2791, %v4121_v55   ;;  %1398 = vmatprep.subr.bf16.mxu1 %v4759_v24 }
 0x29b   : > { %1174 = vadd.xlane.f32.xlu0 %v4069_v51  ;;  %v2877_v18 = vpop.eup %2876  ;;  %v4764_v51 = vld [vmem:[#allocation47_spill] sm:$0xff] }
 0x29c   : > { %v1374_v61 = vadd.f32 %v2877_v18, %v2875_v58 }
 0x29e   : > { %1451 = vperm.xlu1 %2791, %v4131_v30  }
 0x29f   : > { %1177 = vadd.xlane.f32.xlu0 %v1176_v27  ;;  %v1314_v27 = vmul.f32 1.442695, %v1307_v42  ;;  %v757_v42 = vld [vmem:[#allocation3 + $0x10] sm:$0xff] }
 0x2a0   : > { %1236 = vmatmul.mubr.bf16.gmra.mrb[36].mxu1 %v1189_v50  ;;  %v4765_v50 = vsub.f32 %v4763_v33, %v4764_v51  ;;  %v761_v13 = vmul.f32 %v4055_v52, %v757_v42  ;;  %v842_v42 = vld [vmem:[#allocation4 + $0x8] sm:$0xff] }
 0x2a1   : > { %1399 = vmatpush1.bf16.xpose.msra.mxu1 %v4762_v11  ;;  %1428 = vmatprep.mubr.bf16.mxu1 %v1389_v32  ;;  %v960_v32 = vld [vmem:[#allocation3 + $0x30] sm:$0xff] }
 0x2a2   : > { %v1312_v12 = vmul.f32 1.442695, %v4765_v50  ;;  %v964_v37 = vmul.f32 %v4091_v26, %v960_v32 }
 0x2a3   : > { %1369 = vadd.xlane.f32.xlu0 %v1368_v40 }
 0x2a4   : > { %2878 = vpow2.f32 %v1312_v12  ;;  %v1162_v12 = vld [vmem:[#allocation3 + $0x58] sm:$0xff] }
 0x2a5   : > { %2880 = vpow2.f32 %v1314_v27  ;;  %v1166_v47 = vmul.f32 %v4121_v55, %v1162_v12 }
 0x2a7   : > { %1375 = vadd.xlane.f32.xlu0 %v1374_v61 }
 0x2a8   : > { %1429 = vmatmul.mubr.bf16.vlgmr.msra.gmra.mrb[40].mxu1 %v1388_v2  ;;  %v4770_v2 = vsub.f32 %v4768_v0, %v4769_v17  ;;  %v1044_v0 = vld [vmem:[#allocation4 + $0x28] sm:$0xff] }
 0x2aa   : > { %v1310_v53 = vmul.f32 1.442695, %v4770_v2 }
 0x2c2   : > { %767 = vadd.xlane.f32.xlu1 %v3959_v36  ;;  %v4150_v36 = vpop.eup %2878 }
 0x2c6   : > { %970 = vadd.xlane.f32.xlu1 %v3982_v8  ;;  %v4153_v8 = vpop.eup %2880 }
 0x2ca   : > { %1171 = vadd.xlane.f32.xlu1 %v4053_v60  ;;  %v4155_v60 = vpop.permute.xlu0 %1255 }
 0x2ce   : > { %1372 = vadd.xlane.f32.xlu1 %v1371_v22 }
 0x2df   : > { %1461 = vperm.xlu1 %2791, %v4150_v36  }
 0x2e3   : > { %1466 = vperm.xlu1 %2791, %v4153_v8  }
 0x2e6   : > { %v765_v54 = vpop.xlane.xlu0 %764 }
 0x2e7   : > { %v775_v57 = vadd.f32 %v765_v54, %v759_v28  ;;  %v1360_v28 = vld [vmem:[#allocation3 + $0x60] sm:$0xff] }
 0x2e8   : > { %v841_v54 = vld [vmem:[#allocation4] sm:$0xff] }
 0x2e9   : > { %780 = vst.msk [vmem:[#allocation3] sm:$0xff] %vm779_vm5, %v775_v57 }
 0x2ee   : > { %v771_v16 = vpop.xlane.xlu0 %770 }
 0x2ef   : > { %v777_v34 = vadd.f32 %v771_v16, %v761_v13  ;;  %v1364_v13 = vmul.f32 %v4131_v30, %v1360_v28 }
 0x2f1   : > { %782 = vst.msk [vmem:[#allocation3 + $0x10] sm:$0xff] %vm779_vm5, %v777_v34 }
 0x2f2   : > { %v774_v6 = vpop.xlane.xlu0 %773 }
 0x2f3   : > { %v778_v22 = vadd.f32 %v774_v6, %v762_v29  ;;  %v866_v6 = vmul.f32 %v4146_v41, %v842_v42  ;;  %v1045_v42 = vld [vmem:[#allocation4 + $0x30] sm:$0xff] }
 0x2f5   : > { %783 = vst.msk [vmem:[#allocation3 + $0x18] sm:$0xff] %vm779_vm5, %v778_v22  ;;  %v1334_v9 = vpop.permute.xlu1 %1333 }
 0x2f6   : > { %v1342_v20 = vsub.f32 %v4766_v46, %v1334_v9  ;;  %v1343_v23 = vsub.f32 %v4767_v1, %v1334_v9  ;;  %v968_v52 = vpop.xlane.xlu0 %967  ;;  %v1366_v9 = vmul.f32 %v4150_v36, %v1362_v31  ;;  %v843_v1 = vld [vmem:[#allocation4 + $0x10] sm:$0xff] }
 0x2f7   : > { %v978_v48 = vadd.f32 %v968_v52, %v962_v63  ;;  %v844_v52 = vld [vmem:[#allocation4 + $0x18] sm:$0xff] }
 0x2f8   : > { %v1356_v25 = vmul.f32 1.442695, %v1342_v20  ;;  %v1358_v44 = vmul.f32 1.442695, %v1343_v23 }
 0x2f9   : > { %982 = vst.msk [vmem:[#allocation3 + $0x20] sm:$0xff] %vm779_vm5, %v978_v48  ;;  %v848_v3 = vpop.permute.xlu1 %847 }
 0x2fa   : > { %2882 = vpow2.f32 %v1356_v25  ;;  %v865_v16 = vmul.f32 %v848_v3, %v841_v54  ;;  %v1068_v3 = vmul.f32 %v4148_v38, %v1044_v0  ;;  %v4772_v38 = vld [vmem:[#allocation49_spill] sm:$0xff] }
 0x2fb   : > { %2884 = vpow2.f32 %v1358_v44 }
 0x2fc   : > { %2886 = vpow2.f32 %v1310_v53 }
 0x2fd   : > { %v858_v40 = vpop.permute.xlu1 %857 }
 0x2fe   : > { %v867_v41 = vmul.f32 %v858_v40, %v843_v1 }
 0x301   : > { %v863_v15 = vpop.permute.xlu1 %862 }
 0x302   : > { %v868_v44 = vmul.f32 %v863_v15, %v844_v52  ;;  %v1246_v52 = vld [vmem:[#allocation4 + $0x50] sm:$0xff] }
 0x304   : > { %v2883_v43 = vpop.eup %2882 }
 0x305   : > { %v2885_v35 = vpop.eup %2884  ;;  %v1390_v45 = vpack.c.bf16 %v2883_v43, %v2875_v58  ;;  %v1159_v58 = vld [vmem:[#allocation3 + $0x40] sm:$0xff]  ;;  %v1050_v33 = vpop.permute.xlu1 %1049 }
 0x306   : > { %v1377_v49 = vadd.f32 %v2885_v35, %v2883_v43  ;;  %v1391_v4 = vpack.c.bf16 %v2885_v35, %v2877_v18  ;;  %v4172_v59 = vpop.eup %2886  ;;  %v1163_v11 = vmul.f32 %v4107_v5, %v1159_v58  ;;  %v1161_v18 = vld [vmem:[#allocation3 + $0x50] sm:$0xff] }
 0x307   : > { %v1165_v51 = vmul.f32 %v4114_v62, %v1161_v18  ;;  %v4771_v58 = vld [vmem:[#allocation48_spill] sm:$0xff] }
 0x308   : > { %1378 = vadd.xlane.f32.xlu0 %v1377_v49  ;;  %1436 = vmatprep.mubr.bf16.mxu1 %v1391_v4  ;;  %v1043_v4 = vld [vmem:[#allocation4 + $0x20] sm:$0xff] }
 0x309   : > { %1437 = vmatmul.mubr.bf16.gmra.mrb[44].mxu1 %v1390_v45  ;;  %v4183_v57 = vpop.permute.xlu1 %1059  ;;  %v1067_v2 = vmul.f32 %v1050_v33, %v1043_v4  ;;  %v1160_v33 = vld [vmem:[#allocation3 + $0x48] sm:$0xff] }
 0x30d   : > { %v4188_v22 = vpop.permute.xlu1 %1064 }
 0x311   : > { %v1251_v48 = vpop.permute.xlu1 %1250 }
 0x315   : > { %v1261_v17 = vpop.permute.xlu1 %1260 }
 0x31c   : > { %v974_v56 = vpop.xlane.xlu0 %973 }
 0x31d   : > { %v980_v7 = vadd.f32 %v974_v56, %v964_v37 }
 0x31e   : > { %1456 = vperm.xlu0 %2790, %v4172_v59  }
 0x31f   : > { %984 = vst.msk [vmem:[#allocation3 + $0x30] sm:$0xff] %vm779_vm5, %v980_v7  ;;  %v1266_v7 = vpop.permute.xlu1 %1265 }
 0x320   : > { %v977_v24 = vpop.xlane.xlu0 %976 }
 0x321   : > { %v981_v14 = vadd.f32 %v977_v24, %v965_v39  ;;  %v756_v24 = vld [vmem:[#allocation3 + $0x8] sm:$0xff] }
 0x322   : > { %v760_v15 = vmul.f32 %v4771_v58, %v756_v24 }
 0x323   : > { %985 = vst.msk [vmem:[#allocation3 + $0x38] sm:$0xff] %vm779_vm5, %v981_v14  ;;  %v1452_v39 = vpop.permute.xlu1 %1451 }
 0x324   : > { %v1169_v26 = vpop.xlane.xlu0 %1168 }
 0x325   : > { %v1179_v61 = vadd.f32 %v1169_v26, %v1163_v11  ;;  %v959_v11 = vld [vmem:[#allocation3 + $0x28] sm:$0xff] }
 0x326   : > { %v963_v18 = vmul.f32 %v4772_v38, %v959_v11 }
 0x327   : > { %1183 = vst.msk [vmem:[#allocation3 + $0x40] sm:$0xff] %vm779_vm5, %v1179_v61 }
 0x328   : > { %v1175_v50 = vpop.xlane.xlu0 %1174 }
 0x329   : > { %v1181_v27 = vadd.f32 %v1175_v50, %v1165_v51  ;;  %v4773_v50 = vld [vmem:[#allocation50_spill] sm:$0xff] }
 0x32a   : > { %v1164_v12 = vmul.f32 %v4773_v50, %v1160_v33 }
 0x32b   : > { %1185 = vst.msk [vmem:[#allocation3 + $0x50] sm:$0xff] %vm779_vm5, %v1181_v27 }
 0x32c   : > { %v1178_v21 = vpop.xlane.xlu0 %1177 }
 0x32d   : > { %v1182_v5 = vadd.f32 %v1178_v21, %v1166_v47  ;;  %v1361_v47 = vld [vmem:[#allocation3 + $0x68] sm:$0xff] }
 0x32e   : > { %v1365_v28 = vmul.f32 %v4172_v59, %v1361_v47  ;;  %v1245_v59 = vld [vmem:[#allocation4 + $0x48] sm:$0xff] }
 0x32f   : > { %1186 = vst.msk [vmem:[#allocation3 + $0x58] sm:$0xff] %vm779_vm5, %v1182_v5 }
 0x330   : > { %v1370_v62 = vpop.xlane.xlu0 %1369 }
 0x331   : > { %v1380_v34 = vadd.f32 %v1370_v62, %v1364_v13  ;;  %v826_v29 = vpop.f32.mrb[16].mxu1  ;;  %v1046_v13 = vld [vmem:[#allocation4 + $0x38] sm:$0xff] }
 0x332   : > { %v869_v55 = vadd.f32 %v865_v16, %v826_v29  ;;  %v828_v10 = vpop.f32.mrb[17].mxu1  ;;  %v1069_v16 = vmul.f32 %v4183_v57, %v1045_v42  ;;  %v1070_v31 = vmul.f32 %v4188_v22, %v1046_v13 }
 0x333   : > { %1384 = vst.msk [vmem:[#allocation3 + $0x60] sm:$0xff] %vm779_vm5, %v1380_v34  ;;  %v829_v63 = vpop.f32.mrb[18].mxu1 }
 0x334   : > { %874 = vst.msk [vmem:[#allocation4] sm:$0xff] %vm873_vm6, %v869_v55  ;;  %v1376_v30 = vpop.xlane.xlu0 %1375  ;;  %v870_v46 = vadd.f32 %v866_v6, %v829_v63  ;;  %v831_v20 = vpop.f32.mrb[19].mxu1 }
 0x335   : > { %v1382_v23 = vadd.f32 %v1376_v30, %v1366_v9  ;;  %v1244_v9 = vld [vmem:[#allocation4 + $0x40] sm:$0xff] }
 0x336   : > { %875 = vst.msk [vmem:[#allocation4 + $0x8] sm:$0xff] %vm873_vm6, %v870_v46  ;;  %v1268_v63 = vmul.f32 %v1251_v48, %v1244_v9  ;;  %v1269_v46 = vmul.f32 %v4155_v60, %v1245_v59 }
 0x337   : > { %1386 = vst.msk [vmem:[#allocation3 + $0x70] sm:$0xff] %vm779_vm5, %v1382_v23 }
 0x339   : > { %v834_v25 = vpop.f32.mrb[20].mxu1 }
 0x33a   : > { %v871_v43 = vadd.f32 %v867_v41, %v834_v25  ;;  %v836_v35 = vpop.f32.mrb[21].mxu1  ;;  %v1247_v41 = vld [vmem:[#allocation4 + $0x58] sm:$0xff]  ;;  %v1270_v25 = vmul.f32 %v1261_v17, %v1246_v52 }
 0x33b   : > { %v837_v36 = vpop.f32.mrb[22].mxu1 }
 0x33c   : > { %876 = vst.msk [vmem:[#allocation4 + $0x10] sm:$0xff] %vm873_vm6, %v871_v43  ;;  %v872_v45 = vadd.f32 %v868_v44, %v837_v36  ;;  %v839_v49 = vpop.f32.mrb[23].mxu1  ;;  %v1271_v43 = vmul.f32 %v1266_v7, %v1247_v41 }
 0x33d   : > { %v1445_v49 = vld [vmem:[#allocation4 + $0x60] sm:$0xff] }
 0x33e   : > { %877 = vst.msk [vmem:[#allocation4 + $0x18] sm:$0xff] %vm873_vm6, %v872_v45  ;;  %v1469_v4 = vmul.f32 %v1452_v39, %v1445_v49 }
 0x341   : > { %v1028_v53 = vpop.f32.mrb[24].mxu1 }
 0x342   : > { %v1071_v32 = vadd.f32 %v1067_v2, %v1028_v53  ;;  %v1030_v40 = vpop.f32.mrb[25].mxu1 }
 0x343   : > { %v1031_v37 = vpop.f32.mrb[26].mxu1 }
 0x344   : > { %1075 = vst.msk [vmem:[#allocation4 + $0x20] sm:$0xff] %vm873_vm6, %v1071_v32  ;;  %v1072_v56 = vadd.f32 %v1068_v3, %v1031_v37  ;;  %v1033_v19 = vpop.f32.mrb[27].mxu1  ;;  %v1363_v32 = vld [vmem:[#allocation3 + $0x78] sm:$0xff] }
 0x345   : > { %v1367_v40 = vmul.f32 %v4153_v8, %v1363_v32  ;;  %v1446_v19 = vld [vmem:[#allocation4 + $0x68] sm:$0xff] }
 0x346   : > { %1076 = vst.msk [vmem:[#allocation4 + $0x28] sm:$0xff] %vm873_vm6, %v1072_v56 }
 0x34f   : > { %v768_v14 = vpop.xlane.xlu1 %767 }
 0x350   : > { %v776_v26 = vadd.f32 %v768_v14, %v760_v15  ;;  %v1447_v15 = vld [vmem:[#allocation4 + $0x70] sm:$0xff]  ;;  %v1448_v14 = vld [vmem:[#allocation4 + $0x78] sm:$0xff] }
 0x352   : > { %781 = vst.msk [vmem:[#allocation3 + $0x8] sm:$0xff] %vm779_vm5, %v776_v26 }
 0x353   : > { %v971_v61 = vpop.xlane.xlu1 %970 }
 0x354   : > { %v979_v51 = vadd.f32 %v971_v61, %v963_v18 }
 0x356   : > { %983 = vst.msk [vmem:[#allocation3 + $0x28] sm:$0xff] %vm779_vm5, %v979_v51 }
 0x357   : > { %v1172_v27 = vpop.xlane.xlu1 %1171 }
 0x358   : > { %v1180_v21 = vadd.f32 %v1172_v27, %v1164_v12 }
 0x35a   : > { %1184 = vst.msk [vmem:[#allocation3 + $0x48] sm:$0xff] %vm779_vm5, %v1180_v21 }
 0x35b   : > { %v1373_v54 = vpop.xlane.xlu1 %1372 }
 0x35c   : > { %v1381_v5 = vadd.f32 %v1373_v54, %v1365_v28 }
 0x35e   : > { %1385 = vst.msk [vmem:[#allocation3 + $0x68] sm:$0xff] %vm779_vm5, %v1381_v5 }
 0x35f   : > { %v1462_v39 = vpop.permute.xlu1 %1461 }
 0x360   : > { %v1471_v26 = vmul.f32 %v1462_v39, %v1447_v15 }
 0x363   : > { %v1036_v62 = vpop.f32.mrb[28].mxu1  ;;  %v1467_v11 = vpop.permute.xlu1 %1466 }
 0x364   : > { %v1073_v34 = vadd.f32 %v1069_v16, %v1036_v62  ;;  %v1038_v29 = vpop.f32.mrb[29].mxu1  ;;  %v1472_v18 = vmul.f32 %v1467_v11, %v1448_v14 }
 0x365   : > { %v1039_v6 = vpop.f32.mrb[30].mxu1 }
 0x366   : > { %1077 = vst.msk [vmem:[#allocation4 + $0x30] sm:$0xff] %vm873_vm6, %v1073_v34  ;;  %v1074_v55 = vadd.f32 %v1070_v31, %v1039_v6  ;;  %v1041_v10 = vpop.f32.mrb[31].mxu1 }
 0x368   : > { %1078 = vst.msk [vmem:[#allocation4 + $0x38] sm:$0xff] %vm873_vm6, %v1074_v55 }
 0x36b   : > { %v1229_v30 = vpop.f32.mrb[32].mxu1 }
 0x36c   : > { %v1272_v20 = vadd.f32 %v1268_v63, %v1229_v30  ;;  %v1231_v57 = vpop.f32.mrb[33].mxu1 }
 0x36d   : > { %v1232_v1 = vpop.f32.mrb[34].mxu1 }
 0x36e   : > { %1276 = vst.msk [vmem:[#allocation4 + $0x40] sm:$0xff] %vm873_vm6, %v1272_v20  ;;  %v1273_v22 = vadd.f32 %v1269_v46, %v1232_v1  ;;  %v1234_v23 = vpop.f32.mrb[35].mxu1 }
 0x370   : > { %1277 = vst.msk [vmem:[#allocation4 + $0x48] sm:$0xff] %vm873_vm6, %v1273_v22 }
 0x373   : > { %v1237_v44 = vpop.f32.mrb[36].mxu1 }
 0x374   : > { %v1274_v35 = vadd.f32 %v1270_v25, %v1237_v44  ;;  %v1239_v36 = vpop.f32.mrb[37].mxu1 }
 0x375   : > { %v1240_v48 = vpop.f32.mrb[38].mxu1 }
 0x376   : > { %1278 = vst.msk [vmem:[#allocation4 + $0x50] sm:$0xff] %vm873_vm6, %v1274_v35  ;;  %v1275_v60 = vadd.f32 %v1271_v43, %v1240_v48  ;;  %v1242_v45 = vpop.f32.mrb[39].mxu1 }
 0x378   : > { %1279 = vst.msk [vmem:[#allocation4 + $0x58] sm:$0xff] %vm873_vm6, %v1275_v60 }
 0x37b   : > { %v1430_v0 = vpop.f32.mrb[40].mxu1 }
 0x37c   : > { %v1473_v2 = vadd.f32 %v1469_v4, %v1430_v0  ;;  %v1432_v53 = vpop.f32.mrb[41].mxu1 }
 0x37d   : > { %v1433_v3 = vpop.f32.mrb[42].mxu1 }
 0x37e   : > { %1477 = vst.msk [vmem:[#allocation4 + $0x60] sm:$0xff] %vm873_vm6, %v1473_v2  ;;  %v1435_v17 = vpop.f32.mrb[43].mxu1 }
 0x395   : > { %v1379_v37 = vpop.xlane.xlu0 %1378 }
 0x396   : > { %v1383_v56 = vadd.f32 %v1379_v37, %v1367_v40 }
 0x398   : > { %1387 = vst.msk [vmem:[#allocation3 + $0x78] sm:$0xff] %vm779_vm5, %v1383_v56 }
 0x39d   : > { %v1457_v7 = vpop.permute.xlu0 %1456 }
 0x39e   : > { %v1470_v24 = vmul.f32 %v1457_v7, %v1446_v19 }
 0x3a0   : > { %v1474_v58 = vadd.f32 %v1470_v24, %v1433_v3 }
 0x3a2   : > { %1478 = vst.msk [vmem:[#allocation4 + $0x68] sm:$0xff] %vm873_vm6, %v1474_v58 }
 0x3dc   : > { %v1438_v38 = vpop.f32.mrb[44].mxu1 }
 0x3dd   : > { %v1475_v61 = vadd.f32 %v1471_v26, %v1438_v38  ;;  %v1440_v33 = vpop.f32.mrb[45].mxu1 }
 0x3de   : > { %v1441_v8 = vpop.f32.mrb[46].mxu1 }
 0x3df   : > { %1479 = vst.msk [vmem:[#allocation4 + $0x70] sm:$0xff] %vm873_vm6, %v1475_v61  ;;  %v1476_v51 = vadd.f32 %v1472_v18, %v1441_v8  ;;  %v1443_v50 = vpop.f32.mrb[47].mxu1 }
 0x3e1   : > { %1480 = vst.msk [vmem:[#allocation4 + $0x78] sm:$0xff] %vm873_vm6, %v1476_v51 }
 0x3e2 PF: > { %p2682_p1 = scmp.ne.s32.totalorder %s3084_s21, 1 }
 0x3e3   : > { %vm1514_vm7 = vcmask (!%p2682_p1), 1041408   ;;  %v1706_v12 = vld [vmem:[#allocation3] sm:$0xff] (!%p2682_p1)  ;;  %v1708_v27 = vld [vmem:[#allocation3 + $0x10] sm:$0xff] (!%p2682_p1)  ;;  %v1707_v47 = vld [vmem:[#allocation3 + $0x8] sm:$0xff] (!%p2682_p1)  ;;  %v3105_v5 = vmov (!%p2682_p1), 0   ;;  %vm1489_vm8 = vcmask (!%p2682_p1), 31744  }
 0x3e4   : > { %1488 = sbr.rel (%p2682_p1) target bundleno = 1840 (0x730), region = 52  ;;  %v4774_v21 = vld [vmem:[#allocation25_spill] sm:$0xff] (!%p2682_p1)  ;;  %v4775_v28 = vld [vmem:[#allocation24_spill] sm:$0xff] (!%p2682_p1)  ;;  %1553 = vmatprep.mubr.bf16.mxu0 (!%p2682_p1), %v3105_v5  ;;  %2890 = vrcp.f32 (!%p2682_p1), %v1706_v12  ;;  %2888 = vset.pattern.permute.xlu0 (!%p2682_p1), %v3105_v5  ;;  %v1912_v13 = vld [vmem:[#allocation3 + $0x20] sm:$0xff] (!%p2682_p1)  ;;  %vm1780_vm9 = vcmask (!%p2682_p1), 261120  }
 0x3e5   : > { %2683 = vmatprep.subr.msk.bf16.mxu0 (!%p2682_p1), %vm1514_vm7, %v4774_v21  ;;  %v1516_v54 = vsel (!%p2682_p1), %vm1514_vm7, %v4775_v28, 0  ;;  %v1709_v42 = vld [vmem:[#allocation3 + $0x18] sm:$0xff] (!%p2682_p1)  ;;  %2892 = vrcp.f32 (!%p2682_p1), %v1708_v27  ;;  %2889 = vset.pattern.permute.xlu1 (!%p2682_p1), %v3105_v5  ;;  %v4777_v62 = vld [vmem:[#allocation8_spill] sm:$0xff] (!%p2682_p1)  ;;  %v1913_v34 = vld [vmem:[#allocation3 + $0x28] sm:$0xff] (!%p2682_p1) }
 0x3e6   : > { %1522 = vmatpush1.bf16.msra.mxu0 (!%p2682_p1), %v1516_v54  ;;  %2894 = vrcp.f32 (!%p2682_p1), %v1707_v47  ;;  %1819 = vmatprep.mubr.bf16.mxu1 (!%p2682_p1), %v3105_v5  ;;  %v4776_v16 = vld [vmem:[#allocation9_spill] sm:$0xff] (!%p2682_p1)  ;;  %v1914_v29 = vld [vmem:[#allocation3 + $0x30] sm:$0xff] (!%p2682_p1)  ;;  %v2117_v9 = vld [vmem:[#allocation3 + $0x40] sm:$0xff] (!%p2682_p1) }
 0x3e7   : > { %2896 = vrcp.f32 (!%p2682_p1), %v1709_v42  ;;  %v4778_v31 = vpack.c.bf16 (!%p2682_p1), %v4776_v16, %v4777_v62  ;;  %v1915_v6 = vld [vmem:[#allocation3 + $0x38] sm:$0xff] (!%p2682_p1)  ;;  %v4779_v63 = vld [vmem:[#allocation11_spill] sm:$0xff] (!%p2682_p1)  ;;  %v4780_v30 = vld [vmem:[#allocation10_spill] sm:$0xff] (!%p2682_p1) }
 0x3e8   : > { %2898 = vrcp.f32 (!%p2682_p1), %v1912_v13  ;;  %v4781_v46 = vpack.c.bf16 (!%p2682_p1), %v4779_v63, %v4780_v30  ;;  %v2118_v20 = vld [vmem:[#allocation3 + $0x48] sm:$0xff] (!%p2682_p1)  ;;  %v2119_v1 = vld [vmem:[#allocation3 + $0x50] sm:$0xff] (!%p2682_p1)  ;;  %v2120_v23 = vld [vmem:[#allocation3 + $0x58] sm:$0xff] (!%p2682_p1) }
 0x3e9   : > { %2684 = vmatmul.mubr.msk.bf16.vlgmr.msra.gmra.mrb[0].mxu0 (!%p2682_p1), %vm1489_vm8, %v4778_v31  ;;  %2900 = vrcp.f32 (!%p2682_p1), %v1913_v34  ;;  %v2322_v41 = vld [vmem:[#allocation3 + $0x60] sm:$0xff] (!%p2682_p1)  ;;  %v4782_v44 = vld [vmem:[#allocation13_spill] sm:$0xff] (!%p2682_p1)  ;;  %v4783_v43 = vld [vmem:[#allocation12_spill] sm:$0xff] (!%p2682_p1) }
 0x3ea   : > { %1563 = vmatprep.mubr.bf16.mxu0 (!%p2682_p1), %v3105_v5  ;;  %2902 = vrcp.f32 (!%p2682_p1), %v1914_v29  ;;  %v4784_v35 = vpack.c.bf16 (!%p2682_p1), %v4782_v44, %v4783_v43  ;;  %v2323_v36 = vld [vmem:[#allocation3 + $0x68] sm:$0xff] (!%p2682_p1)  ;;  %v2324_v60 = vld [vmem:[#allocation3 + $0x70] sm:$0xff] (!%p2682_p1)  ;;  %v2325_v49 = vld [vmem:[#allocation3 + $0x78] sm:$0xff] (!%p2682_p1) }
 0x3eb   : > { %2904 = vrcp.f32 %v1915_v6  ;;  %v4785_v2 = vld [vmem:[#allocation15_spill] sm:$0xff]  ;;  %v4786_v53 = vld [vmem:[#allocation14_spill] sm:$0xff]  ;;  %v4788_v56 = vld [vmem:[#allocation17_spill] sm:$0xff] }
 0x3ec   : > { %2906 = vrcp.f32 %v2117_v9  ;;  %v4787_v3 = vpack.c.bf16 %v4785_v2, %v4786_v53  ;;  %v4789_v19 = vld [vmem:[#allocation16_spill] sm:$0xff]  ;;  %v4791_v58 = vld [vmem:[#allocation19_spill] sm:$0xff]  ;;  %v4792_v39 = vld [vmem:[#allocation18_spill] sm:$0xff] }
 0x3ed   : > { %2908 = vrcp.f32 %v2118_v20  ;;  %v4790_v7 = vpack.c.bf16 %v4788_v56, %v4789_v19  ;;  %v4793_v15 = vpack.c.bf16 %v4791_v58, %v4792_v39  ;;  %v4794_v14 = vld [vmem:[#allocation21_spill] sm:$0xff]  ;;  %v4795_v11 = vld [vmem:[#allocation20_spill] sm:$0xff]  ;;  %v4797_v38 = vld [vmem:[#allocation23_spill] sm:$0xff] }
 0x3ee   : > { %v2891_v55 = vpop.eup %2890  ;;  %2910 = vrcp.f32 %v2119_v1  ;;  %v4796_v26 = vpack.c.bf16 %v4794_v14, %v4795_v11  ;;  %v4798_v18 = vld [vmem:[#allocation22_spill] sm:$0xff]  ;;  %v1715_v12 = vld [vmem:[#allocation4 + $0x8] sm:$0xff]  ;;  %v1716_v27 = vld [vmem:[#allocation4 + $0x10] sm:$0xff] }
 0x3ef   : > { %v2893_v10 = vpop.eup %2892  ;;  %1720 = vperm.xlu0 %2888, %v2891_v55   ;;  %2912 = vrcp.f32 %v2120_v23  ;;  %v4799_v61 = vpack.c.bf16 %v4797_v38, %v4798_v18  ;;  %v1714_v33 = vld [vmem:[#allocation4] sm:$0xff]  ;;  %v1717_v13 = vld [vmem:[#allocation4 + $0x18] sm:$0xff]  ;;  %v1921_v62 = vld [vmem:[#allocation4 + $0x28] sm:$0xff] }
 0x3f0   : > { %v2895_v59 = vpop.eup %2894  ;;  %1730 = vperm.xlu1 %2889, %v2893_v10   ;;  %2914 = vrcp.f32 %v2322_v41  ;;  %v1920_v54 = vld [vmem:[#allocation4 + $0x20] sm:$0xff]  ;;  %v1922_v55 = vld [vmem:[#allocation4 + $0x30] sm:$0xff]  ;;  %v1923_v30 = vld [vmem:[#allocation4 + $0x38] sm:$0xff] }
 0x3f1   : > { %2685 = vmatmul.mubr.msk.bf16.gmra.mrb[4].mxu0 %vm1489_vm8, %v4781_v46  ;;  %v2897_v57 = vpop.eup %2896  ;;  %2916 = vrcp.f32 %v2323_v36  ;;  %v2126_v20 = vld [vmem:[#allocation4 + $0x48] sm:$0xff]  ;;  %v2330_v44 = vld [vmem:[#allocation4 + $0x60] sm:$0xff] }
 0x3f2   : > { %1573 = vmatprep.mubr.bf16.mxu0 %v3105_v5  ;;  %v2899_v22 = vpop.eup %2898  ;;  %2918 = vrcp.f32 %v2324_v60 }
 0x3f3   : > { %1725 = vperm.xlu0 %2888, %v2895_v59   ;;  %v2901_v52 = vpop.eup %2900  ;;  %2920 = vrcp.f32 %v2325_v49  ;;  %v2125_v59 = vld [vmem:[#allocation4 + $0x40] sm:$0xff] }
 0x3f4   : > { %1735 = vperm.xlu1 %2889, %v2897_v57   ;;  %v2903_v25 = vpop.eup %2902 }
 0x3f5   : > { %v2905_v48 = vpop.eup %2904 }
 0x3f6   : > { %v2907_v45 = vpop.eup %2906 }
 0x3f7   : > { %1926 = vperm.xlu0 %2888, %v2899_v22   ;;  %v2909_v4 = vpop.eup %2908 }
 0x3f8   : > { %1931 = vperm.xlu1 %2889, %v2901_v52   ;;  %v2911_v0 = vpop.eup %2910  ;;  %v2127_v52 = vld [vmem:[#allocation4 + $0x50] sm:$0xff] }
 0x3f9   : > { %2686 = vmatmul.mubr.msk.bf16.gmra.mrb[8].mxu0 %vm1489_vm8, %v4784_v35  ;;  %v2913_v17 = vpop.eup %2912  ;;  %v2128_v35 = vld [vmem:[#allocation4 + $0x58] sm:$0xff] }
 0x3fa   : > { %1583 = vmatprep.mubr.bf16.mxu0 %v3105_v5  ;;  %v2915_v32 = vpop.eup %2914 }
 0x3fb   : > { %1936 = vperm.xlu0 %2888, %v2903_v25   ;;  %v2917_v40 = vpop.eup %2916 }
 0x3fc   : > { %1941 = vperm.xlu1 %2889, %v2905_v48   ;;  %v2919_v37 = vpop.eup %2918  ;;  %v2331_v48 = vld [vmem:[#allocation4 + $0x68] sm:$0xff] }
 0x3fd   : > { %v2921_v24 = vpop.eup %2920 }
 0x3ff   : > { %2131 = vperm.xlu0 %2888, %v2907_v45  }
 0x400   : > { %2136 = vperm.xlu1 %2889, %v2909_v4  }
 0x401   : > { %2687 = vmatmul.mubr.msk.bf16.gmra.mrb[12].mxu0 %vm1489_vm8, %v4787_v3  ;;  %v2333_v3 = vld [vmem:[#allocation4 + $0x78] sm:$0xff] }
 0x402   : > { %1593 = vmatprep.mubr.bf16.mxu0 %v3105_v5 }
 0x403   : > { %2141 = vperm.xlu0 %2888, %v2911_v0   ;;  %v2332_v0 = vld [vmem:[#allocation4 + $0x70] sm:$0xff] }
 0x404   : > { %2146 = vperm.xlu1 %2889, %v2913_v17  }
 0x407   : > { %2336 = vperm.xlu0 %2888, %v2915_v32  }
 0x408   : > { %2341 = vperm.xlu1 %2889, %v2917_v40   ;;  %v2542_v40 = vld [vmem:[%s4605_s4] sm:$0xf] }
 0x409   : > { %2688 = vmatmul.mubr.msk.bf16.gmra.mrb[16].mxu0 %vm1489_vm8, %v4790_v7 }
 0x40a   : > { %1603 = vmatprep.mubr.bf16.mxu0 %v3105_v5 }
 0x40b   : > { %2346 = vperm.xlu0 %2888, %v2919_v37   ;;  %v2473_v37 = vld [vmem:[%s4604_s3] sm:$0xf] }
 0x40c   : > { %2351 = vperm.xlu1 %2889, %v2921_v24  }
 0x411   : > { %2689 = vmatmul.mubr.msk.bf16.gmra.mrb[20].mxu0 %vm1489_vm8, %v4793_v15 }
 0x412   : > { %1613 = vmatprep.mubr.bf16.mxu0 %v3105_v5 }
 0x419   : > { %2690 = vmatmul.mubr.msk.bf16.gmra.mrb[24].mxu0 %vm1489_vm8, %v4796_v26 }
 0x41a   : > { %1623 = vmatprep.mubr.bf16.mxu0 %v3105_v5 }
 0x421   : > { %2691 = vmatmul.mubr.msk.bf16.gmra.mrb[28].mxu0 %vm1489_vm8, %v4799_v61 }
 0x422   : > { %2511 = vmatprep.mubr.bf16.mxu0 %v3105_v5 }
 0x46e   : > { %v1721_v8 = vpop.permute.xlu0 %1720 }
 0x46f   : > { %v1738_v51 = vmul.f32 %v1721_v8, %v1714_v33  ;;  %v1731_v50 = vpop.permute.xlu1 %1730 }
 0x470   : > { %v1740_v42 = vmul.f32 %v1731_v50, %v1716_v27 }
 0x471   : > { %1742 = vxpose.xlu0.b32.start [1/4] (short) (narrow) %v1738_v51, 32 }
 0x472   : > { %v1726_v47 = vpop.permute.xlu0 %1725 }
 0x473   : > { %v1739_v21 = vmul.f32 %v1726_v47, %v1715_v12  ;;  %v1736_v28 = vpop.permute.xlu1 %1735 }
 0x474   : > { %v1741_v29 = vmul.f32 %v1736_v28, %v1717_v13 }
 0x475   : > { %1743 = vxpose.xlu0.b32.cont [2/4] (short) (narrow) %v1739_v21, 32 }
 0x476   : > { %v1927_v16 = vpop.permute.xlu0 %1926 }
 0x477   : > { %v1944_v31 = vmul.f32 %v1927_v16, %v1920_v54  ;;  %v1932_v34 = vpop.permute.xlu1 %1931 }
 0x478   : > { %v1945_v6 = vmul.f32 %v1932_v34, %v1921_v62 }
 0x479   : > { %1744 = vxpose.xlu0.b32.cont [3/4] (short) (narrow) %v1740_v42, 32  ;;  %1948 = vxpose.xlu1.b32.start [1/4] (short) (narrow) %v1944_v31, 32 }
 0x47a   : > { %v1937_v10 = vpop.permute.xlu0 %1936 }
 0x47b   : > { %v1942_v9 = vpop.permute.xlu1 %1941  ;;  %v1946_v63 = vmul.f32 %v1937_v10, %v1922_v55 }
 0x47c   : > { %v1947_v22 = vmul.f32 %v1942_v9, %v1923_v30 }
 0x47d   : > { %1745 = vxpose.xlu0.b32.end [4/4] (short) (narrow) %v1741_v29, 32  ;;  %1949 = vxpose.xlu1.b32.cont [2/4] (short) (narrow) %v1945_v6, 32 }
 0x47e   : > { %v2132_v46 = vpop.permute.xlu0 %2131 }
 0x47f   : > { %v2149_v57 = vmul.f32 %v2132_v46, %v2125_v59  ;;  %v2137_v1 = vpop.permute.xlu1 %2136 }
 0x480   : > { %v2150_v23 = vmul.f32 %v2137_v1, %v2126_v20 }
 0x481   : > { %1950 = vxpose.xlu1.b32.cont [3/4] (short) (narrow) %v1946_v63, 32  ;;  %2153 = vxpose.xlu0.b32.start [1/4] (short) (narrow) %v2149_v57, 32 }
 0x482   : > { %v2142_v41 = vpop.permute.xlu0 %2141 }
 0x483   : > { %v2147_v25 = vpop.permute.xlu1 %2146  ;;  %v2151_v43 = vmul.f32 %v2142_v41, %v2127_v52 }
 0x484   : > { %v2152_v49 = vmul.f32 %v2147_v25, %v2128_v35 }
 0x485   : > { %1951 = vxpose.xlu1.b32.end [4/4] (short) (narrow) %v1947_v22, 32  ;;  %2154 = vxpose.xlu0.b32.cont [2/4] (short) (narrow) %v2150_v23, 32 }
 0x486   : > { %v2337_v36 = vpop.permute.xlu0 %2336 }
 0x487   : > { %v2354_v60 = vmul.f32 %v2337_v36, %v2330_v44  ;;  %v2342_v45 = vpop.permute.xlu1 %2341 }
 0x488   : > { %v2355_v4 = vmul.f32 %v2342_v45, %v2331_v48 }
 0x489   : > { %2155 = vxpose.xlu0.b32.cont [3/4] (short) (narrow) %v2151_v43, 32  ;;  %2358 = vxpose.xlu1.b32.start [1/4] (short) (narrow) %v2354_v60, 32 }
 0x48a   : > { %v2347_v2 = vpop.permute.xlu0 %2346 }
 0x48b   : > { %v2356_v53 = vmul.f32 %v2347_v2, %v2332_v0  ;;  %v2352_v17 = vpop.permute.xlu1 %2351 }
 0x48c   : > { %v2357_v32 = vmul.f32 %v2352_v17, %v2333_v3 }
 0x48d   : > { %2156 = vxpose.xlu0.b32.end [4/4] (short) (narrow) %v2152_v49, 32  ;;  %2359 = vxpose.xlu1.b32.cont [2/4] (short) (narrow) %v2355_v4, 32 }
 0x491   : > { %2360 = vxpose.xlu1.b32.cont [3/4] (short) (narrow) %v2356_v53, 32 }
 0x495   : > { %2361 = vxpose.xlu1.b32.end [4/4] (short) (narrow) %v2357_v32, 32 }
 0x4b3   : > { %2545 = vperm.xlu1 %2889, %v2542_v40  }
 0x4b6   : > { %2476 = vperm.xlu0 %2888, %v2473_v37  }
 0x4bc   : > { %v1555_v56 = vpop.f32.mrb[0].mxu0 }
 0x4bd   : > { %v1557_v19 = vpop.f32.mrb[1].mxu0 }
 0x4be   : > { %v1559_v7 = vpop.f32.mrb[2].mxu0 }
 0x4bf   : > { %v1561_v24 = vpop.f32.mrb[3].mxu0 }
 0x4c4   : > { %v1565_v58 = vpop.f32.mrb[4].mxu0 }
 0x4c5   : > { %v1634_v39 = vmax.f32 %v1555_v56, %v1565_v58  ;;  %v1567_v15 = vpop.f32.mrb[5].mxu0 }
 0x4c6   : > { %v1643_v14 = vmax.f32 %v1557_v19, %v1567_v15  ;;  %v1569_v11 = vpop.f32.mrb[6].mxu0 }
 0x4c7   : > { %v1635_v26 = vmax.f32 %v1559_v7, %v1569_v11  ;;  %v1571_v38 = vpop.f32.mrb[7].mxu0 }
 0x4c8   : > { %v1644_v18 = vmax.f32 %v1561_v24, %v1571_v38 }
 0x4c9   : > { %v1636_v61 = vmax.f32 %v1634_v39, %v1635_v26 }
 0x4ca   : > { %v1645_v33 = vmax.f32 %v1643_v14, %v1644_v18 }
 0x4cb   : > { %v1637_v8 = vrot.slane %v1636_v61, 4 }
 0x4cc   : > { %v1646_v51 = vrot.slane %v1645_v33, 4  ;;  %v4276_v50 = vpop.f32.mrb[8].mxu0 }
 0x4cd   : > { %v1638_v12 = vmax.f32 %v1636_v61, %v1637_v8  ;;  %v4278_v27 = vpop.f32.mrb[9].mxu0 }
 0x4ce   : > { %v1647_v47 = vmax.f32 %v1645_v33, %v1646_v51  ;;  %v4280_v21 = vpop.f32.mrb[10].mxu0 }
 0x4cf   : > { %v1639_v28 = vrot.slane %v1638_v12, 2  ;;  %v4282_v54 = vpop.f32.mrb[11].mxu0 }
 0x4d0   : > { %v1648_v42 = vrot.slane %v1647_v47, 2 }
 0x4d1   : > { %v1640_v13 = vmax.f32 %v1638_v12, %v1639_v28 }
 0x4d2   : > { %v1649_v16 = vmax.f32 %v1647_v47, %v1648_v42 }
 0x4d3   : > { %v1641_v62 = vrot.slane %v1640_v13, 1 }
 0x4d4   : > { %v1650_v31 = vrot.slane %v1649_v16, 1  ;;  %v4284_v34 = vpop.f32.mrb[12].mxu0 }
 0x4d5   : > { %v1642_v29 = vmax.f32 %v1640_v13, %v1641_v62  ;;  %v1840_v6 = vmax.f32 %v4276_v50, %v4284_v34  ;;  %v4288_v55 = vpop.f32.mrb[13].mxu0 }
 0x4d6   : > { %v1651_v10 = vmax.f32 %v1649_v16, %v1650_v31  ;;  %v1849_v9 = vmax.f32 %v4278_v27, %v4288_v55  ;;  %v4292_v59 = vpop.f32.mrb[14].mxu0 }
 0x4d7   : > { %v1652_v63 = vsub.f32 %v1555_v56, %v1642_v29  ;;  %v1654_v30 = vsub.f32 %v1559_v7, %v1642_v29  ;;  %v1656_v46 = vsub.f32 %v1565_v58, %v1642_v29  ;;  %v1658_v20 = vsub.f32 %v1569_v11, %v1642_v29  ;;  %v4294_v57 = vpop.f32.mrb[15].mxu0 }
 0x4d8   : > { %v1657_v1 = vsub.f32 %v1567_v15, %v1651_v10  ;;  %v1659_v22 = vsub.f32 %v1571_v38, %v1651_v10  ;;  %v1841_v23 = vmax.f32 %v4280_v21, %v4292_v59  ;;  %v1850_v52 = vmax.f32 %v4282_v54, %v4294_v57 }
 0x4d9   : > { %v1660_v41 = vmul.f32 1.442695, %v1652_v63  ;;  %v1664_v25 = vmul.f32 1.442695, %v1654_v30  ;;  %v1653_v44 = vsub.f32 %v1557_v19, %v1651_v10  ;;  %v1668_v43 = vmul.f32 1.442695, %v1656_v46 }
 0x4da   : > { %v1842_v35 = vmax.f32 %v1840_v6, %v1841_v23  ;;  %v1851_v36 = vmax.f32 %v1849_v9, %v1850_v52  ;;  %v1655_v48 = vsub.f32 %v1561_v24, %v1651_v10  ;;  %v1672_v60 = vmul.f32 1.442695, %v1658_v20 }
 0x4db   : > { %2922 = vpow2.f32 %v1660_v41  ;;  %v1662_v2 = vmul.f32 1.442695, %v1653_v44  ;;  %v1670_v37 = vmul.f32 1.442695, %v1657_v1  ;;  %v1674_v7 = vmul.f32 1.442695, %v1659_v22 }
 0x4dc   : > { %2924 = vpow2.f32 %v1664_v25  ;;  %v1843_v45 = vrot.slane %v1842_v35, 4  ;;  %v4300_v49 = vpop.f32.mrb[16].mxu0  ;;  %v1852_v4 = vrot.slane %v1851_v36, 4  ;;  %v1666_v17 = vmul.f32 1.442695, %v1655_v48 }
 0x4dd   : > { %v4302_v0 = vpop.f32.mrb[17].mxu0  ;;  %2926 = vpow2.f32 %v1668_v43 }
 0x4de   : > { %v1844_v53 = vmax.f32 %v1842_v35, %v1843_v45  ;;  %v4304_v3 = vpop.f32.mrb[18].mxu0  ;;  %v1853_v32 = vmax.f32 %v1851_v36, %v1852_v4  ;;  %2928 = vpow2.f32 %v1672_v60 }
 0x4df   : > { %v4306_v40 = vpop.f32.mrb[19].mxu0  ;;  %2930 = vpow2.f32 %v1662_v2 }
 0x4e0   : > { %v1845_v56 = vrot.slane %v1844_v53, 2  ;;  %v1854_v19 = vrot.slane %v1853_v32, 2  ;;  %2932 = vpow2.f32 %v1666_v17 }
 0x4e1   : > { %2934 = vpow2.f32 %v1670_v37 }
 0x4e2   : > { %v1846_v24 = vmax.f32 %v1844_v53, %v1845_v56  ;;  %v1855_v58 = vmax.f32 %v1853_v32, %v1854_v19  ;;  %2936 = vpow2.f32 %v1674_v7 }
 0x4e4   : > { %v1847_v39 = vrot.slane %v1846_v24, 1  ;;  %v4308_v15 = vpop.f32.mrb[20].mxu0  ;;  %v1856_v11 = vrot.slane %v1855_v58, 1 }
 0x4e5   : > { %v4310_v14 = vpop.eup %2922  ;;  %v2045_v26 = vmax.f32 %v4300_v49, %v4308_v15  ;;  %v4314_v38 = vpop.f32.mrb[21].mxu0 }
 0x4e6   : > { %v4316_v18 = vpop.eup %2924  ;;  %v1848_v61 = vmax.f32 %v1846_v24, %v1847_v39  ;;  %v2054_v33 = vmax.f32 %v4302_v0, %v4314_v38  ;;  %v4320_v8 = vpop.f32.mrb[22].mxu0  ;;  %v1857_v12 = vmax.f32 %v1855_v58, %v1856_v11 }
 0x4e7   : > { %v1676_v51 = vadd.f32 %v4316_v18, %v4310_v14  ;;  %v2046_v47 = vmax.f32 %v4304_v3, %v4320_v8  ;;  %v4326_v28 = vpop.f32.mrb[23].mxu0  ;;  %v4328_v42 = vpop.eup %2926 }
 0x4e8   : > { %v1858_v13 = vsub.f32 %v4276_v50, %v1848_v61  ;;  %v1860_v16 = vsub.f32 %v4280_v21, %v1848_v61  ;;  %v1862_v62 = vsub.f32 %v4284_v34, %v1848_v61  ;;  %v1864_v31 = vsub.f32 %v4292_v59, %v1848_v61  ;;  %v4338_v63 = vpop.eup %2928 }
 0x4e9   : > { %v1677_v29 = vadd.f32 %v4328_v42, %v1676_v51  ;;  %v1859_v6 = vsub.f32 %v4278_v27, %v1857_v12  ;;  %v1861_v10 = vsub.f32 %v4282_v54, %v1857_v12  ;;  %v1863_v9 = vsub.f32 %v4288_v55, %v1857_v12  ;;  %v4341_v21 = vpop.eup %2930 }
 0x4ea   : > { %v1866_v30 = vmul.f32 1.442695, %v1858_v13  ;;  %v1870_v46 = vmul.f32 1.442695, %v1860_v16  ;;  %v1874_v20 = vmul.f32 1.442695, %v1862_v62  ;;  %v1865_v50 = vsub.f32 %v4294_v57, %v1857_v12  ;;  %v4344_v1 = vpop.eup %2932 }
 0x4eb   : > { %v1678_v34 = vadd.f32 %v4338_v63, %v1677_v29  ;;  %v1878_v59 = vmul.f32 1.442695, %v1864_v31  ;;  %v1868_v27 = vmul.f32 1.442695, %v1859_v6  ;;  %v1872_v22 = vmul.f32 1.442695, %v1861_v10  ;;  %v4354_v25 = vpop.eup %2934 }
 0x4ec   : > { %2938 = vpow2.f32 %v1866_v30  ;;  %v2047_v54 = vmax.f32 %v2045_v26, %v2046_v47  ;;  %v4346_v23 = vpop.f32.mrb[24].mxu0  ;;  %v2055_v52 = vmax.f32 %v4306_v40, %v4326_v28  ;;  %v1685_v57 = vadd.f32 %v4344_v1, %v4341_v21  ;;  %v4361_v4 = vpop.eup %2936 }
 0x4ed   : > { %v1679_v55 = vrot.slane %v1678_v34, 4  ;;  %2940 = vpow2.f32 %v1870_v46  ;;  %v4350_v41 = vpop.f32.mrb[25].mxu0  ;;  %v1876_v44 = vmul.f32 1.442695, %v1863_v9  ;;  %v1880_v2 = vmul.f32 1.442695, %v1865_v50 }
 0x4ee   : > { %2942 = vpow2.f32 %v1874_v20  ;;  %v2048_v43 = vrot.slane %v2047_v54, 4  ;;  %v4356_v35 = vpop.f32.mrb[26].mxu0  ;;  %v2056_v48 = vmax.f32 %v2054_v33, %v2055_v52  ;;  %v1686_v45 = vadd.f32 %v4354_v25, %v1685_v57 }
 0x4ef   : > { %v1680_v36 = vadd.f32 %v1679_v55, %v1678_v34  ;;  %2944 = vpow2.f32 %v1878_v59  ;;  %v4358_v60 = vpop.f32.mrb[27].mxu0 }
 0x4f0   : > { %2946 = vpow2.f32 %v1868_v27  ;;  %v2049_v53 = vmax.f32 %v2047_v54, %v2048_v43  ;;  %v2057_v32 = vrot.slane %v2056_v48, 4  ;;  %v1687_v37 = vadd.f32 %v4361_v4, %v1686_v45 }
 0x4f1   : > { %v1681_v17 = vrot.slane %v1680_v36, 2  ;;  %2948 = vpow2.f32 %v1872_v22 }
 0x4f2   : > { %v2050_v56 = vrot.slane %v2049_v53, 2  ;;  %2950 = vpow2.f32 %v1876_v44  ;;  %v2058_v19 = vmax.f32 %v2056_v48, %v2057_v32  ;;  %v1688_v7 = vrot.slane %v1687_v37, 4 }
 0x4f3   : > { %v1682_v24 = vadd.f32 %v1681_v17, %v1680_v36  ;;  %2952 = vpow2.f32 %v1880_v2 }
 0x4f4   : > { %v2051_v58 = vmax.f32 %v2049_v53, %v2050_v56  ;;  %v4364_v39 = vpop.f32.mrb[28].mxu0  ;;  %v2059_v11 = vrot.slane %v2058_v19, 2  ;;  %v1689_v33 = vadd.f32 %v1688_v7, %v1687_v37 }
 0x4f5   : > { %v2250_v26 = vmax.f32 %v4346_v23, %v4364_v39  ;;  %v4368_v61 = vpop.f32.mrb[29].mxu0  ;;  %v1683_v51 = vrot.slane %v1682_v24, 1 }
 0x4f6   : > { %v4370_v12 = vpop.eup %2938  ;;  %v2052_v47 = vrot.slane %v2051_v58, 1  ;;  %v2259_v13 = vmax.f32 %v4350_v41, %v4368_v61  ;;  %v4374_v16 = vpop.f32.mrb[30].mxu0  ;;  %v2060_v31 = vmax.f32 %v2058_v19, %v2059_v11  ;;  %v1690_v10 = vrot.slane %v1689_v33, 2 }
 0x4f7   : > { %v4376_v62 = vpop.eup %2940  ;;  %v2251_v29 = vmax.f32 %v4356_v35, %v4374_v16  ;;  %v4380_v6 = vpop.f32.mrb[31].mxu0  ;;  %v1684_v9 = vadd.f32 %v1683_v51, %v1682_v24 }
 0x4f8   : > { %v4382_v30 = vpop.eup %2942  ;;  %v1882_v46 = vadd.f32 %v4376_v62, %v4370_v12  ;;  %v2053_v20 = vmax.f32 %v2051_v58, %v2052_v47  ;;  %v2260_v50 = vmax.f32 %v4358_v60, %v4380_v6  ;;  %v2061_v59 = vrot.slane %v2060_v31, 1 }
 0x4f9   : > { %v4388_v34 = vpop.eup %2944  ;;  %v2252_v27 = vmax.f32 %v2250_v26, %v2251_v29  ;;  %v1691_v22 = vadd.f32 %v1690_v10, %v1689_v33  ;;  %2954 = vrcp.f32 %v1684_v9 }
 0x4fa   : > { %v4390_v54 = vpop.eup %2946  ;;  %v1883_v55 = vadd.f32 %v4382_v30, %v1882_v46  ;;  %v2063_v52 = vsub.f32 %v4300_v49, %v2053_v20  ;;  %v2065_v57 = vsub.f32 %v4304_v3, %v2053_v20  ;;  %v2067_v44 = vsub.f32 %v4308_v15, %v2053_v20 }
 0x4fb   : > { %v4396_v43 = vpop.eup %2948  ;;  %v2069_v36 = vsub.f32 %v4320_v8, %v2053_v20  ;;  %v2062_v48 = vmax.f32 %v2060_v31, %v2061_v59  ;;  %v2253_v45 = vrot.slane %v2252_v27, 4  ;;  %v2261_v2 = vmax.f32 %v2259_v13, %v2260_v50 }
 0x4fc   : > { %v1884_v53 = vadd.f32 %v4388_v34, %v1883_v55  ;;  %v1891_v17 = vadd.f32 %v4396_v43, %v4390_v54  ;;  %v2071_v32 = vmul.f32 1.442695, %v2063_v52  ;;  %v2075_v37 = vmul.f32 1.442695, %v2065_v57  ;;  %v4402_v56 = vpop.eup %2950 }
 0x4fd   : > { %v2079_v49 = vmul.f32 1.442695, %v2067_v44  ;;  %v2083_v3 = vmul.f32 1.442695, %v2069_v36  ;;  %v2064_v15 = vsub.f32 %v4302_v0, %v2062_v48  ;;  %v2066_v19 = vsub.f32 %v4306_v40, %v2062_v48  ;;  %v4406_v7 = vpop.eup %2952 }
 0x4fe   : > { %v1885_v8 = vrot.slane %v1884_v53, 4  ;;  %v1892_v24 = vadd.f32 %v4402_v56, %v1891_v17  ;;  %2956 = vpow2.f32 %v2071_v32  ;;  %v2068_v58 = vsub.f32 %v4314_v38, %v2062_v48 }
 0x4ff   : > { %2958 = vpow2.f32 %v2075_v37  ;;  %v2070_v11 = vsub.f32 %v4326_v28, %v2062_v48  ;;  %v2073_v26 = vmul.f32 1.442695, %v2064_v15  ;;  %v2077_v33 = vmul.f32 1.442695, %v2066_v19 }
 0x500   : > { %v1886_v51 = vadd.f32 %v1885_v8, %v1884_v53  ;;  %v1893_v47 = vadd.f32 %v4406_v7, %v1892_v24  ;;  %2960 = vpow2.f32 %v2079_v49  ;;  %v2081_v0 = vmul.f32 1.442695, %v2068_v58 }
 0x501   : > { %2962 = vpow2.f32 %v2083_v3  ;;  %v2085_v40 = vmul.f32 1.442695, %v2070_v11  ;;  %v2254_v13 = vmax.f32 %v2252_v27, %v2253_v45  ;;  %v2262_v31 = vrot.slane %v2261_v2, 4 }
 0x502   : > { %v1887_v29 = vrot.slane %v1886_v51, 2  ;;  %v1894_v10 = vrot.slane %v1893_v47, 4  ;;  %2964 = vpow2.f32 %v2073_v26  ;;  %v1692_v9 = vrot.slane %v1691_v22, 1 }
 0x503   : > { %v2955_v46 = vpop.eup %2954  ;;  %2966 = vpow2.f32 %v2077_v33  ;;  %v2255_v38 = vrot.slane %v2254_v13, 2  ;;  %v2263_v20 = vmax.f32 %v2261_v2, %v2262_v31 }
 0x504   : > { %v1888_v28 = vadd.f32 %v1887_v29, %v1886_v51  ;;  %v1895_v50 = vadd.f32 %v1894_v10, %v1893_v47  ;;  %2968 = vpow2.f32 %v2081_v0  ;;  %v1693_v59 = vadd.f32 %v1692_v9, %v1691_v22 }
 0x505   : > { %2970 = vpow2.f32 %v2085_v40  ;;  %v2256_v55 = vmax.f32 %v2254_v13, %v2255_v38  ;;  %v2264_v52 = vrot.slane %v2263_v20, 2  ;;  %v1696_v57 = vmul.f32 0.17677669, %v2955_v46 }
 0x506   : > { %v1889_v44 = vrot.slane %v1888_v28, 1  ;;  %v1896_v36 = vrot.slane %v1895_v50, 2  ;;  %2972 = vrcp.f32 %v1693_v59 }
 0x507   : > { %v2257_v27 = vrot.slane %v2256_v55, 1  ;;  %v2265_v48 = vmax.f32 %v2263_v20, %v2264_v52  ;;  %v4413_v45 = vmul.f32 %v4310_v14, %v1696_v57  ;;  %v4416_v53 = vmul.f32 %v4316_v18, %v1696_v57 }
 0x508   : > { %v4418_v2 = vpop.eup %2956  ;;  %v1890_v17 = vadd.f32 %v1889_v44, %v1888_v28  ;;  %v1897_v32 = vadd.f32 %v1896_v36, %v1895_v50  ;;  %v4421_v22 = vmul.f32 %v4328_v42, %v1696_v57  ;;  %v4424_v37 = vmul.f32 %v4338_v63, %v1696_v57 }
 0x509   : > { %v4426_v49 = vpop.eup %2958  ;;  %v2258_v3 = vmax.f32 %v2256_v55, %v2257_v27  ;;  %v2266_v15 = vrot.slane %v2265_v48, 1  ;;  %v1776_v14 = vpack.c.bf16 %v4416_v53, %v4413_v45 }
 0x50a   : > { %v4430_v19 = vpop.eup %2960  ;;  %v2087_v18 = vadd.f32 %v4426_v49, %v4418_v2  ;;  %v1778_v8 = vpack.c.bf16 %v4424_v37, %v4421_v22  ;;  %2974 = vrcp.f32 %v1890_v17  ;;  %v1898_v47 = vrot.slane %v1897_v32, 1 }
 0x50b   : > { %v4436_v42 = vpop.eup %2962  ;;  %v2268_v63 = vsub.f32 %v4346_v23, %v2258_v3  ;;  %v2270_v24 = vsub.f32 %v4356_v35, %v2258_v3  ;;  %v2272_v58 = vsub.f32 %v4364_v39, %v2258_v3  ;;  %v2274_v11 = vsub.f32 %v4374_v16, %v2258_v3 }
 0x50c   : > { %v4442_v26 = vpop.eup %2964  ;;  %v2088_v33 = vadd.f32 %v4430_v19, %v2087_v18  ;;  %v2267_v51 = vmax.f32 %v2265_v48, %v2266_v15 }
 0x50d   : > { %v4445_v0 = vpop.eup %2966  ;;  %v2276_v40 = vmul.f32 1.442695, %v2268_v63  ;;  %v2280_v13 = vmul.f32 1.442695, %v2270_v24  ;;  %v2284_v31 = vmul.f32 1.442695, %v2272_v58 }
 0x50e   : > { %v4447_v29 = vpop.eup %2968  ;;  %v2089_v23 = vadd.f32 %v4436_v42, %v2088_v33  ;;  %v2096_v35 = vadd.f32 %v4445_v0, %v4442_v26  ;;  %v2288_v39 = vmul.f32 1.442695, %v2274_v11  ;;  %v2269_v16 = vsub.f32 %v4350_v41, %v2267_v51 }
 0x50f   : > { %v4453_v10 = vpop.eup %2970  ;;  %2976 = vpow2.f32 %v2276_v40  ;;  %v2271_v9 = vsub.f32 %v4358_v60, %v2267_v51  ;;  %v2273_v46 = vsub.f32 %v4368_v61, %v2267_v51  ;;  %v2275_v38 = vsub.f32 %v4380_v6, %v2267_v51  ;;  %v1758_v60 = vpop.trf.xlu0 }
 0x510   : > { %v2973_v20 = vpop.eup %2972  ;;  %v2090_v28 = vrot.slane %v2089_v23, 4  ;;  %v2097_v50 = vadd.f32 %v4447_v29, %v2096_v35  ;;  %2978 = vpow2.f32 %v2280_v13  ;;  %v2278_v59 = vmul.f32 1.442695, %v2269_v16 }
 0x511   : > { %2980 = vpow2.f32 %v2284_v31  ;;  %v2282_v55 = vmul.f32 1.442695, %v2271_v9  ;;  %v2286_v52 = vmul.f32 1.442695, %v2273_v46  ;;  %v2290_v57 = vmul.f32 1.442695, %v2275_v38 }
 0x512   : > { %v2091_v41 = vadd.f32 %v2090_v28, %v2089_v23  ;;  %v2098_v44 = vadd.f32 %v4453_v10, %v2097_v50  ;;  %2982 = vpow2.f32 %v2288_v39  ;;  %v1697_v36 = vmul.f32 0.17677669, %v2973_v20 }
 0x513   : > { %2984 = vpow2.f32 %v2278_v59  ;;  %v1899_v61 = vadd.f32 %v1898_v47, %v1897_v32  ;;  %v1759_v47 = vpop.trf.xlu0 }
 0x514   : > { %v2975_v27 = vpop.eup %2974  ;;  %v2092_v6 = vrot.slane %v2091_v41, 2  ;;  %v2099_v48 = vrot.slane %v2098_v44, 4  ;;  %2986 = vpow2.f32 %v2282_v55  ;;  %v1699_v17 = vmul.f32 %v4341_v21, %v1697_v36 }
 0x515   : > { %2988 = vpow2.f32 %v2286_v52  ;;  %v1701_v3 = vmul.f32 %v4344_v1, %v1697_v36  ;;  %v1703_v15 = vmul.f32 %v4354_v25, %v1697_v36  ;;  %v1705_v18 = vmul.f32 %v4361_v4, %v1697_v36 }
 0x516   : > { %v2093_v63 = vadd.f32 %v2092_v6, %v2091_v41  ;;  %v2100_v24 = vadd.f32 %v2099_v48, %v2098_v44  ;;  %2990 = vpow2.f32 %v2290_v57  ;;  %v1902_v58 = vmul.f32 0.17677669, %v2975_v27  ;;  %v1964_v57 = vpop.trf.xlu1 }
 0x517   : > { %v1777_v11 = vpack.c.bf16 %v1701_v3, %v1699_v17  ;;  %v1779_v33 = vpack.c.bf16 %v1705_v18, %v1703_v15  ;;  %2992 = vrcp.f32 %v1899_v61  ;;  %v1760_v53 = vpop.trf.xlu0  ;;  %v1774_v28 = vpack.c.bf16 %v1759_v47, %v1758_v60 }
 0x518   : > { %v2094_v32 = vrot.slane %v2093_v63, 1  ;;  %v2101_v51 = vrot.slane %v2100_v24, 2  ;;  %v1904_v40 = vmul.f32 %v4370_v12, %v1902_v58  ;;  %v1906_v21 = vmul.f32 %v4376_v62, %v1902_v58 }
 0x519   : > { %v4466_v13 = vpop.eup %2976  ;;  %1787 = vmatprep.subr.bf16.mxu1 %v1777_v11  ;;  %v4469_v1 = vmul.f32 %v4382_v30, %v1902_v58  ;;  %v4472_v25 = vmul.f32 %v4388_v34, %v1902_v58 }
 0x51a   : > { %v4474_v4 = vpop.eup %2978  ;;  %v2095_v31 = vadd.f32 %v2094_v32, %v2093_v63  ;;  %v2102_v23 = vadd.f32 %v2101_v51, %v2100_v24  ;;  %1788 = vmatpush1.bf16.msra.mxu1 %v1776_v14  ;;  %v1982_v12 = vpack.c.bf16 %v1906_v21, %v1904_v40 }
 0x51b   : > { %v4479_v35 = vpop.eup %2980  ;;  %v2292_v62 = vadd.f32 %v4474_v4, %v4466_v13  ;;  %1789 = vmatprep.subr.bf16.mxu1 %v1779_v33  ;;  %v1984_v30 = vpack.c.bf16 %v4472_v25, %v4469_v1  ;;  %v1761_v41 = vpop.trf.xlu0 }
 0x51c   : > { %v4485_v34 = vpop.eup %2982  ;;  %v2103_v39 = vrot.slane %v2102_v23, 1  ;;  %2994 = vrcp.f32 %v2095_v31  ;;  %v1775_v63 = vpack.c.bf16 %v1761_v41, %v1760_v53 }
 0x51d   : > { %v4487_v16 = vpop.eup %2984  ;;  %v2293_v9 = vadd.f32 %v4479_v35, %v2292_v62 }
 0x51e   : > { %v4490_v45 = vpop.eup %2986  ;;  %1790 = vmatpush1.bf16.msra.mxu1 %v1778_v8  ;;  %v2104_v14 = vadd.f32 %v2103_v39, %v2102_v23 }
 0x51f   : > { %v4495_v46 = vpop.eup %2988  ;;  %v2294_v38 = vadd.f32 %v4485_v34, %v2293_v9  ;;  %v2301_v20 = vadd.f32 %v4490_v45, %v4487_v16  ;;  %v2169_v9 = vpop.trf.xlu0 }
 0x520   : > { %v4500_v50 = vpop.eup %2990  ;;  %2996 = vrcp.f32 %v2104_v14 }
 0x521   : > { %v2993_v59 = vpop.eup %2992  ;;  %v2295_v55 = vrot.slane %v2294_v38, 4  ;;  %v2302_v52 = vadd.f32 %v4495_v46, %v2301_v20  ;;  %2692 = vmatmul.mubr.msk.bf16.vlgmr.msra.gmra.mrb[0].mxu1 %vm1780_vm9, %v1774_v28 }
 0x522   : > { %1829 = vmatprep.mubr.bf16.mxu1 %v3105_v5  ;;  %v1903_v22 = vmul.f32 0.17677669, %v2993_v59 }
 0x523   : > { %v2296_v37 = vadd.f32 %v2295_v55, %v2294_v38  ;;  %v2303_v8 = vadd.f32 %v4500_v50, %v2302_v52 }
 0x524   : > { %v1905_v44 = vmul.f32 %v4390_v54, %v1903_v22  ;;  %v1907_v36 = vmul.f32 %v4396_v43, %v1903_v22  ;;  %v1909_v60 = vmul.f32 %v4402_v56, %v1903_v22  ;;  %v1911_v61 = vmul.f32 %v4406_v7, %v1903_v22  ;;  %v1965_v7 = vpop.trf.xlu1 }
 0x525   : > { %v2297_v27 = vrot.slane %v2296_v37, 2  ;;  %v2304_v6 = vrot.slane %v2303_v8, 4 }
 0x526   : > { %v2995_v48 = vpop.eup %2994  ;;  %v1983_v17 = vpack.c.bf16 %v1907_v36, %v1905_v44  ;;  %v1985_v3 = vpack.c.bf16 %v1911_v61, %v1909_v60 }
 0x527   : > { %v2298_v15 = vadd.f32 %v2297_v27, %v2296_v37  ;;  %v2305_v18 = vadd.f32 %v2304_v6, %v2303_v8  ;;  %v2107_v24 = vmul.f32 0.17677669, %v2995_v48 }
 0x528   : > { %1992 = vmatprep.subr.bf16.mxu1 %v1983_v17  ;;  %v1966_v62 = vpop.trf.xlu1 }
 0x529   : > { %v2299_v58 = vrot.slane %v2298_v15, 1  ;;  %v2306_v11 = vrot.slane %v2305_v18, 2  ;;  %2693 = vmatmul.mubr.msk.bf16.gmra.mrb[4].mxu1 %vm1780_vm9, %v1775_v63  ;;  %v2109_v54 = vmul.f32 %v4418_v2, %v2107_v24  ;;  %v2111_v43 = vmul.f32 %v4426_v49, %v2107_v24 }
 0x52a   : > { %v2997_v56 = vpop.eup %2996  ;;  %1993 = vmatpush1.bf16.msra.mxu1 %v1982_v12  ;;  %2024 = vmatprep.mubr.bf16.mxu1 %v3105_v5  ;;  %v2113_v33 = vmul.f32 %v4430_v19, %v2107_v24  ;;  %v2115_v32 = vmul.f32 %v4436_v42, %v2107_v24  ;;  %v1980_v19 = vpack.c.bf16 %v1965_v7, %v1964_v57 }
 0x52b   : > { %v2300_v51 = vadd.f32 %v2299_v58, %v2298_v15  ;;  %v2307_v47 = vadd.f32 %v2306_v11, %v2305_v18  ;;  %1994 = vmatprep.subr.bf16.mxu1 %v1985_v3  ;;  %v2108_v40 = vmul.f32 0.17677669, %v2997_v56  ;;  %v2187_v21 = vpack.c.bf16 %v2111_v43, %v2109_v54 }
 0x52c   : > { %v2189_v1 = vpack.c.bf16 %v2115_v32, %v2113_v33 }
 0x52d   : > { %v2110_v25 = vmul.f32 %v4442_v26, %v2108_v40  ;;  %v2112_v2 = vmul.f32 %v4445_v0, %v2108_v40  ;;  %v2114_v49 = vmul.f32 %v4447_v29, %v2108_v40  ;;  %v2116_v31 = vmul.f32 %v4453_v10, %v2108_v40  ;;  %v1967_v26 = vpop.trf.xlu1  ;;  %v2170_v10 = vpop.trf.xlu0 }
 0x52e   : > { %1995 = vmatpush1.bf16.msra.mxu1 %v1984_v30  ;;  %v2308_v23 = vrot.slane %v2307_v47, 1  ;;  %2998 = vrcp.f32 %v2300_v51  ;;  %v1981_v0 = vpack.c.bf16 %v1967_v26, %v1966_v62  ;;  %v2185_v22 = vpack.c.bf16 %v2170_v10, %v2169_v9 }
 0x52f   : > { %v2188_v12 = vpack.c.bf16 %v2112_v2, %v2110_v25  ;;  %v2190_v42 = vpack.c.bf16 %v2116_v31, %v2114_v49 }
 0x530   : > { %v2309_v39 = vadd.f32 %v2308_v23, %v2307_v47 }
 0x531   : > { %2694 = vmatmul.mubr.msk.bf16.vlgmr.msra.gmra.mrb[8].mxu1 %vm1780_vm9, %v1980_v19  ;;  %2197 = vmatprep.subr.bf16.mxu1 %v2188_v12  ;;  %v2171_v37 = vpop.trf.xlu0 }
 0x532   : > { %2034 = vmatprep.mubr.bf16.mxu1 %v3105_v5  ;;  %2198 = vmatpush1.bf16.msra.mxu1 %v2187_v21  ;;  %3000 = vrcp.f32 %v2309_v39 }
 0x533   : > { %2199 = vmatprep.subr.bf16.mxu1 %v2190_v42 }
 0x535   : > { %v2172_v44 = vpop.trf.xlu0 }
 0x536   : > { %2200 = vmatpush1.bf16.msra.mxu1 %v2189_v1  ;;  %v2186_v36 = vpack.c.bf16 %v2172_v44, %v2171_v37 }
 0x538   : > { %v2999_v29 = vpop.eup %2998 }
 0x539   : > { %2695 = vmatmul.mubr.msk.bf16.gmra.mrb[12].mxu1 %vm1780_vm9, %v1981_v0  ;;  %v2312_v30 = vmul.f32 0.17677669, %v2999_v29 }
 0x53a   : > { %2229 = vmatprep.mubr.bf16.mxu1 %v3105_v5 }
 0x53b   : > { %v2314_v53 = vmul.f32 %v4466_v13, %v2312_v30  ;;  %v2316_v14 = vmul.f32 %v4474_v4, %v2312_v30  ;;  %v2318_v38 = vmul.f32 %v4479_v35, %v2312_v30  ;;  %v2320_v20 = vmul.f32 %v4485_v34, %v2312_v30  ;;  %v2374_v34 = vpop.trf.xlu1 }
 0x53c   : > { %v3001_v28 = vpop.eup %3000 }
 0x53d   : > { %v2313_v59 = vmul.f32 0.17677669, %v3001_v28  ;;  %v2392_v55 = vpack.c.bf16 %v2316_v14, %v2314_v53  ;;  %v2394_v52 = vpack.c.bf16 %v2320_v20, %v2318_v38 }
 0x53f   : > { %v2315_v8 = vmul.f32 %v4487_v16, %v2313_v59  ;;  %v2317_v57 = vmul.f32 %v4490_v45, %v2313_v59  ;;  %v2319_v41 = vmul.f32 %v4495_v46, %v2313_v59  ;;  %v2321_v13 = vmul.f32 %v4500_v50, %v2313_v59  ;;  %v2375_v16 = vpop.trf.xlu1 }
 0x540   : > { %v2390_v45 = vpack.c.bf16 %v2375_v16, %v2374_v34 }
 0x541   : > { %2696 = vmatmul.mubr.msk.bf16.vlgmr.msra.gmra.mrb[16].mxu1 %vm1780_vm9, %v2185_v22  ;;  %v2393_v4 = vpack.c.bf16 %v2317_v57, %v2315_v8  ;;  %v2395_v35 = vpack.c.bf16 %v2321_v13, %v2319_v41  ;;  %v2477_v8 = vpop.permute.xlu0 %2476 }
 0x542   : > { %2239 = vmatprep.mubr.bf16.mxu1 %v3105_v5 }
 0x543   : > { %2402 = vmatprep.subr.bf16.mxu1 %v2393_v4  ;;  %v2376_v46 = vpop.trf.xlu1 }
 0x544   : > { %2403 = vmatpush1.bf16.msra.mxu1 %v2392_v55 }
 0x545   : > { %2404 = vmatprep.subr.bf16.mxu1 %v2395_v35 }
 0x547   : > { %v2377_v50 = vpop.trf.xlu1 }
 0x548   : > { %2405 = vmatpush1.bf16.msra.mxu1 %v2394_v52  ;;  %v2391_v60 = vpack.c.bf16 %v2377_v50, %v2376_v46  ;;  %v2455_v52 = vld [vmem:[%s4603_s2] sm:$0xf] }
 0x549   : > { %2697 = vmatmul.mubr.msk.bf16.gmra.mrb[20].mxu1 %vm1780_vm9, %v2186_v36  ;;  %v2456_v37 = vpack.c.bf16 %v2455_v52, %v2455_v52 }
 0x54a   : > { %2434 = vmatprep.mubr.bf16.mxu1 %v3105_v5 }
 0x551   : > { %2698 = vmatmul.mubr.msk.bf16.vlgmr.msra.gmra.mrb[24].mxu1 %vm1780_vm9, %v2390_v45 }
 0x552   : > { %2444 = vmatprep.mubr.bf16.mxu1 %v3105_v5 }
 0x559   : > { %2699 = vmatmul.mubr.msk.bf16.gmra.mrb[28].mxu1 %vm1780_vm9, %v2391_v60 }
 0x5f4   : > { %v1821_v61 = vpop.f32.mrb[0].mxu1 }
 0x5f5   : > { %v1823_v27 = vpop.f32.mrb[1].mxu1 }
 0x5f6   : > { %v1825_v6 = vpop.f32.mrb[2].mxu1 }
 0x5f7   : > { %v2457_v48 = vpack.c.bf16 %v1825_v6, %v1821_v61  ;;  %v1827_v17 = vpop.f32.mrb[3].mxu1 }
 0x5f8   : > { %v2458_v3 = vpack.c.bf16 %v1827_v17, %v1823_v27 }
 0x5fa   : > { %2479 = vmatprep.subr.bf16.mxu0 %v2458_v3 }
 0x5fb   : > { %2480 = vmatpush1.bf16.msra.mxu0 %v2457_v48 }
 0x5fc   : > { %v1831_v15 = vpop.f32.mrb[4].mxu1 }
 0x5fd   : > { %v1833_v18 = vpop.f32.mrb[5].mxu1 }
 0x5fe   : > { %v1835_v63 = vpop.f32.mrb[6].mxu1 }
 0x5ff   : > { %v2459_v24 = vpack.c.bf16 %v1835_v63, %v1831_v15  ;;  %v1837_v58 = vpop.f32.mrb[7].mxu1 }
 0x600   : > { %v2460_v11 = vpack.c.bf16 %v1837_v58, %v1833_v18 }
 0x602   : > { %2481 = vmatprep.subr.bf16.mxu0 %v2460_v11 }
 0x603   : > { %2482 = vmatpush1.bf16.msra.mxu0 %v2459_v24 }
 0x604   : > { %v2026_v5 = vpop.f32.mrb[8].mxu1 }
 0x605   : > { %v2028_v54 = vpop.f32.mrb[9].mxu1 }
 0x606   : > { %v2030_v43 = vpop.f32.mrb[10].mxu1 }
 0x607   : > { %v2461_v56 = vpack.c.bf16 %v2030_v43, %v2026_v5  ;;  %v2032_v7 = vpop.f32.mrb[11].mxu1  ;;  %v2546_v43 = vpop.permute.xlu1 %2545 }
 0x608   : > { %v2462_v33 = vpack.c.bf16 %v2032_v7, %v2028_v54 }
 0x60a   : > { %2483 = vmatprep.subr.bf16.mxu0 %v2462_v33 }
 0x60b   : > { %2484 = vmatpush1.bf16.msra.mxu0 %v2461_v56 }
 0x60c   : > { %v2036_v32 = vpop.f32.mrb[12].mxu1 }
 0x60d   : > { %v2038_v51 = vpop.f32.mrb[13].mxu1 }
 0x60e   : > { %v2040_v47 = vpop.f32.mrb[14].mxu1 }
 0x60f   : > { %v2463_v40 = vpack.c.bf16 %v2040_v47, %v2036_v32  ;;  %v2042_v21 = vpop.f32.mrb[15].mxu1 }
 0x610   : > { %v2464_v1 = vpack.c.bf16 %v2042_v21, %v2038_v51 }
 0x612   : > { %2485 = vmatprep.subr.bf16.mxu0 %v2464_v1 }
 0x613   : > { %2486 = vmatpush1.bf16.msra.mxu0 %v2463_v40 }
 0x614   : > { %v2231_v25 = vpop.f32.mrb[16].mxu1 }
 0x615   : > { %v2233_v2 = vpop.f32.mrb[17].mxu1 }
 0x616   : > { %v2235_v49 = vpop.f32.mrb[18].mxu1 }
 0x617   : > { %v2465_v31 = vpack.c.bf16 %v2235_v49, %v2231_v25  ;;  %v2237_v23 = vpop.f32.mrb[19].mxu1 }
 0x618   : > { %v2466_v19 = vpack.c.bf16 %v2237_v23, %v2233_v2 }
 0x61a   : > { %2487 = vmatprep.subr.bf16.mxu0 %v2466_v19 }
 0x61b   : > { %2488 = vmatpush1.bf16.msra.mxu0 %v2465_v31 }
 0x61c   : > { %v2241_v12 = vpop.f32.mrb[20].mxu1 }
 0x61d   : > { %v2243_v42 = vpop.f32.mrb[21].mxu1 }
 0x61e   : > { %v2245_v62 = vpop.f32.mrb[22].mxu1 }
 0x61f   : > { %v2467_v39 = vpack.c.bf16 %v2245_v62, %v2241_v12  ;;  %v2247_v9 = vpop.f32.mrb[23].mxu1 }
 0x620   : > { %v2468_v26 = vpack.c.bf16 %v2247_v9, %v2243_v42 }
 0x622   : > { %2489 = vmatprep.subr.bf16.mxu0 %v2468_v26 }
 0x623   : > { %2490 = vmatpush1.bf16.msra.mxu0 %v2467_v39 }
 0x624   : > { %v2436_v0 = vpop.f32.mrb[24].mxu1 }
 0x625   : > { %v2438_v29 = vpop.f32.mrb[25].mxu1 }
 0x626   : > { %v2440_v10 = vpop.f32.mrb[26].mxu1 }
 0x627   : > { %v2469_v30 = vpack.c.bf16 %v2440_v10, %v2436_v0  ;;  %v2442_v53 = vpop.f32.mrb[27].mxu1 }
 0x628   : > { %v2470_v14 = vpack.c.bf16 %v2442_v53, %v2438_v29 }
 0x62a   : > { %2491 = vmatprep.subr.bf16.mxu0 %v2470_v14 }
 0x62b   : > { %2492 = vmatpush1.bf16.msra.mxu0 %v2469_v30 }
 0x62c   : > { %v2446_v38 = vpop.f32.mrb[28].mxu1 }
 0x62d   : > { %v2448_v20 = vpop.f32.mrb[29].mxu1 }
 0x62e   : > { %v2450_v28 = vpop.f32.mrb[30].mxu1 }
 0x62f   : > { %v2471_v59 = vpack.c.bf16 %v2450_v28, %v2446_v38  ;;  %v2452_v55 = vpop.f32.mrb[31].mxu1 }
 0x630   : > { %v2472_v22 = vpack.c.bf16 %v2452_v55, %v2448_v20 }
 0x632   : > { %2493 = vmatprep.subr.bf16.mxu0 %v2472_v22 }
 0x633   : > { %2494 = vmatpush1.bf16.msra.mxu0 %v2471_v59 }
 0x636   : > { %2512 = vmatmul.mubr.bf16.vlgmr.msra.gmra.mrb[32].mxu0 %v2456_v37 }
 0x709   : > { %v2513_v57 = vpop.f32.mrb[32].mxu0 }
 0x70a   : > { %v2514_v41 = vadd.f32 %v2513_v57, %v2477_v8  ;;  %v2515_v13 = vpop.f32.mrb[33].mxu0 }
 0x70b   : > { %v2516_v4 = vadd.f32 %v2515_v13, %v2477_v8  ;;  %v2517_v35 = vpop.f32.mrb[34].mxu0 }
 0x70c   : > { %v2520_v34 = vmul.f32 %v2514_v41, %v2514_v41  ;;  %v2518_v44 = vpop.f32.mrb[35].mxu0 }
 0x70d   : > { %v2521_v36 = vmul.f32 %v2516_v4, %v2516_v4 }
 0x70e   : > { %v2522_v16 = vsel %vm270_vm0, %v2520_v34, 0.0 }
 0x70f   : > { %v2523_v45 = vrot.slane %v2522_v16, 4  ;;  %v2529_v46 = vsel %vm270_vm0, %v2521_v36, 0.0 }
 0x710   : > { %v2530_v50 = vrot.slane %v2529_v46, 4 }
 0x711   : > { %v2524_v60 = vadd.f32 %v2523_v45, %v2522_v16 }
 0x712   : > { %v2531_v61 = vadd.f32 %v2530_v50, %v2529_v46 }
 0x713   : > { %v2525_v27 = vrot.slane %v2524_v60, 2 }
 0x714   : > { %v2532_v6 = vrot.slane %v2531_v61, 2 }
 0x715   : > { %v2526_v48 = vadd.f32 %v2525_v27, %v2524_v60 }
 0x716   : > { %v2533_v17 = vadd.f32 %v2532_v6, %v2531_v61 }
 0x717   : > { %v2527_v3 = vrot.slane %v2526_v48, 1 }
 0x718   : > { %v2534_v15 = vrot.slane %v2533_v17, 1 }
 0x719   : > { %v2528_v18 = vadd.f32 %v2527_v3, %v2526_v48 }
 0x71a   : > { %v2535_v63 = vadd.f32 %v2534_v15, %v2533_v17 }
 0x71b   : > { %v2536_v24 = vmax.f32 %v2528_v18, 1e-24 }
 0x71c   : > { %v2537_v58 = vmax.f32 %v2535_v63, 1e-24 }
 0x71d   : > { %3002 = vrsqrt.f32 %v2536_v24 }
 0x71e   : > { %3004 = vrsqrt.f32 %v2537_v58 }
 0x727   : > { %v3003_v11 = vpop.eup %3002 }
 0x728   : > { %v3005_v5 = vpop.eup %3004  ;;  %v2540_v54 = vmul.f32 %v3003_v11, %v2514_v41 }
 0x729   : > { %v2541_v56 = vmul.f32 %v3005_v5, %v2516_v4 }
 0x72a   : > { %v2548_v7 = vmul.f32 %v2546_v43, %v2540_v54 }
 0x72b   : > { %v2549_v33 = vmul.f32 %v2546_v43, %v2541_v56 }
 0x72d   : > { %v2552_v32 = vcombine.low %v2548_v7, %v2549_v33 }
 0x72f   : > { %2554 = vst [vmem:[%s251_s15] sm:$0xff] %v2552_v32 }
 0x730 PF: > { %s2707_s13 = sshll.u32 %s3088_s22, 7  ;;  %s2573_s21 = sshll.u32 %s251_s15, 4  ;;  %s2574_s21 = int_to_ptr.vmem [resolvable:$true] %s2573_s21 }
 0x731   : > { %s4550_s14 = scalar_lea.hbm %s4606_s5, %s2707_s13  ;;  %s2556_s12 = scalar_lea.sflag [#allocation6], %s249_s10 }
 0x732   : > { %s3006_s16 = scalar_lea.vmem %s2574_s21, 128  ;;  %s3106_s26 = smov [#allocation5]  }
 0x733   : > { %p3007_p2 = scmp.ne.s32.totalorder %s2574_s21, %s3006_s16  ;;  %s3010_s27 = sshll.u32 %s3106_s26, 4  ;;  %s3011_s27 = int_to_ptr.vmem [resolvable:$false] %s3010_s27 }
 0x734   : > { %s3012_s8 = scalar_lea.vmem %s3011_s27, 256  ;;  %p3013_p6 = scmp.lt.s32.totalorder %s2574_s21, %s3011_s27 }
 0x735   : > { %p3008_p4 = pnand %p3007_p2, %p3186_p3  ;;  %p3014_p7 = scmp.lt.s32.totalorder %s3012_s8, %s3006_s16 }
 0x737   : > { %p3009_p5 = pneg %p3008_p4  ;;  %p3015_p8 = por %p3014_p7, %p3013_p6 }
 0x739   : > { %p3016_p10 = pnand %p3015_p8, %p3009_p5 }
 0x73b   : > { %3019 = shalt.err (!%p3016_p10)
}
 0x73c   : > { %s3020_s22 = scalar_lea.hbm %s4550_s14, 128  ;;  %s3024_s15 = scalar_lea.hbm %s4606_s5, 256 }
 0x73d   : > { %p3021_p11 = scmp.ne.s32.totalorder %s4550_s14, %s3020_s22  ;;  %p3025_p0 = scmp.lt.u32.totalorder %s4550_s14, %s4606_s5 }
 0x73e   : > { %p3026_p1 = scmp.lt.u32.totalorder %s3024_s15, %s3020_s22  ;;  %p3028_p4 = scmp.lt.u32.totalorder %s3020_s22, %s4550_s14 }
 0x73f   : > { %p3022_p12 = pnand %p3021_p11, %p3186_p3 }
 0x740   : > { %p3027_p2 = por %p3026_p1, %p3025_p0 }
 0x741   : > { %p3023_p13 = pneg %p3022_p12 }
 0x742   : > { %p3029_p5 = por %p3028_p4, %p3027_p2 }
 0x744   : > { %p3030_p6 = pnand %p3029_p5, %p3023_p13 }
 0x746   : > { %3033 = shalt.err (!%p3030_p6)
}
 0x747   : > { %2710 = dma.vmem_to_hbm [thread:$0]  (%p3186_p3), %s2574_s21, 128, %s4550_s14, %s2556_s12  }
 0x748 PF: > { %p2716_p7 = scmp.ge.s32.totalorder %s3100_s25, 2  ;;  %s2585_s7 = sand.u32 1, %s3072_s18  }
 0x749   : > { %s2586_s16 = scalar_lea.sflag [#allocation6], %s2585_s7 }
 0x74a   : > { %p2713_p8 = pnand %p2716_p7, %p3196_p9 }
 0x74c   : > { %3067 = dma.done.wait (!%p2713_p8), %s2586_s16, 128  }
 0x74d   : > { %3069 = vsyncadd (!%p2713_p8), %s2586_s16, 4294967168  ;;  %s18_s25 = sadd.s32 1, %s3100_s25   ;;  %s4800_s18 = smov %s3076_s19 }
 0x74e   : > { %p15_p10 = scmp.ge.s32.totalorder %s18_s25, 6   ;;  %s4801_s19 = smov %s3080_s20 }
 0x74f   : > { %s4802_s20 = smov %s3204_s9  ;;  %s4803_s21 = smov %s3092_s23 }
 0x750   : > { %s4804_s22 = smov %s3096_s24  ;;  %s4805_s23 = smov %s4808_s28 }
 0x751   : > { %s4806_s24 = smov %s4812_s29  ;;  %17 = sbr.rel (!%p15_p10) target bundleno = 5 (0x5), region = 87 }
 0x758   :  { %2591 = vsyncpa [#allocation6], 1 }
 0x759   :  { %2593 = vsyncpa [#allocation6 + $0x1], 1 }

</bundles_post_ra>
